<compile_context>
chip_gen: v5e
topology: v5e:2x2
jax: 0.10.0
libtpu: 0.0.40
codegen_flags: <defaults>
</compile_context>

<pallas_src>
import functools

import jax
import jax.numpy as jnp
from jax.experimental import pallas as pl
from jax.experimental.pallas import tpu as pltpu


# db3 reconstruction filters (pywt Wavelet('db3').rec_lo / .rec_hi), used
# un-reversed exactly like pytorch_wavelets' sfb1d (conv_transpose semantics).
_DB3_REC_LO = (
    0.3326705529509569, 0.8068915093133388, 0.4598775021193313,
    -0.13501102001039084, -0.08544127388224149, 0.035226291882100656,
)
_DB3_REC_HI = (
    0.035226291882100656, 0.08544127388224149, -0.13501102001039084,
    -0.4598775021193313, 0.8068915093133388, -0.3326705529509569,
)

# Coefficient layout of the combined tensor (hard-coded in the PyTorch module).
_YL_SLICE = (0, 1004)
_YH_SLICES = ((1004, 5006), (5006, 7009), (7009, 8013))   # finest -> coarsest


def _sfb_kernel(lo_ref, hi_ref, even_ref, odd_ref, *, m):
    """One synthesis-filter-bank level for a block of rows (polyphase form)."""
    # Even/odd output taps for the lo (g0) and hi (g1) branches; t indexes the
    # input offset in the 3-sample window (x[k], x[k+1], x[k+2]).
    e_lo = (_DB3_REC_LO[4], _DB3_REC_LO[2], _DB3_REC_LO[0])
    o_lo = (_DB3_REC_LO[5], _DB3_REC_LO[3], _DB3_REC_LO[1])
    e_hi = (_DB3_REC_HI[4], _DB3_REC_HI[2], _DB3_REC_HI[0])
    o_hi = (_DB3_REC_HI[5], _DB3_REC_HI[3], _DB3_REC_HI[1])

    acc_e = None
    acc_o = None
    for t in range(3):  # short fixed trip count -> fully unrolled at trace time
        lo_t = lo_ref[:, pl.ds(t, m)].astype(jnp.float32)
        hi_t = hi_ref[:, pl.ds(t, m)].astype(jnp.float32)
        te = e_lo[t] * lo_t + e_hi[t] * hi_t
        to = o_lo[t] * lo_t + o_hi[t] * hi_t
        acc_e = te if acc_e is None else acc_e + te
        acc_o = to if acc_o is None else acc_o + to

    even_ref[...] = acc_e.astype(even_ref.dtype)
    odd_ref[...] = acc_o.astype(odd_ref.dtype)


def _choose_row_tile(rows, lin, tile_m, vmem_budget_bytes):
    """Largest multiple-of-8 row tile whose double-buffered working set fits VMEM."""
    itemsize = 4
    # lo + hi inputs and even + odd outputs, each double-buffered by the pipeline.
    bytes_per_row = 4 * 2 * lin * itemsize
    cap = max(8, (vmem_budget_bytes // bytes_per_row) // 8 * 8)
    rows8 = ((rows + 7) // 8) * 8
    tm = min(max(8, (tile_m // 8) * 8), cap, rows8)
    return max(8, (tm // 8) * 8)


def _sfb_level(lo, hi, *, tile_m, vmem_budget_bytes):
    """One inverse-DWT level: (rows, Lin), (rows, Lin) -> (rows, 2*Lin - 4)."""
    rows, lin = lo.shape
    assert hi.shape == (rows, lin), (lo.shape, hi.shape)
    m = lin - 2                       # half of the output length
    out_dtype = lo.dtype

    tm = _choose_row_tile(rows, lin, tile_m, vmem_budget_bytes)
    n_blocks = pl.cdiv(rows, tm)      # cdiv + padding: no tm-divisibility games
    r_pad = n_blocks * tm
    if r_pad != rows:
        lo = jnp.pad(lo, ((0, r_pad - rows), (0, 0)))
        hi = jnp.pad(hi, ((0, r_pad - rows), (0, 0)))

    itemsize = jnp.dtype(out_dtype).itemsize
    cost = pl.CostEstimate(
        flops=24 * r_pad * m,                              # 2 phases * 6 taps * (mul+add)
        transcendentals=0,
        bytes_accessed=(2 * lin + 2 * m) * r_pad * itemsize,
    )

    even, odd = pl.pallas_call(
        functools.partial(_sfb_kernel, m=m),
        out_shape=(jax.ShapeDtypeStruct((r_pad, m), out_dtype),
                   jax.ShapeDtypeStruct((r_pad, m), out_dtype)),
        grid=(n_blocks,),
        in_specs=[pl.BlockSpec((tm, lin), lambda i: (i, 0)),
                  pl.BlockSpec((tm, lin), lambda i: (i, 0))],
        out_specs=(pl.BlockSpec((tm, m), lambda i: (i, 0)),
                   pl.BlockSpec((tm, m), lambda i: (i, 0))),
        compiler_params=pltpu.CompilerParams(dimension_semantics=("parallel",)),
        cost_estimate=cost,
    )(lo, hi)

    # Interleave the polyphase planes: y[.., 2k] = even[.., k], y[.., 2k+1] = odd[.., k].
    # Row-major stack+reshape in XLA is exactly this interleave.
    y = jnp.stack([even, odd], axis=-1).reshape(r_pad, 2 * m)
    return y[:rows]


def idwt_layer(combined, *, tile_m=256, vmem_budget_bytes=12 * 1024 * 1024):
    """Pallas implementation of IDWT_Layer.forward (3-level db3 IDWT, mode='zero')."""
    b, c, l = combined.shape
    assert l >= _YH_SLICES[-1][1], f"last dim must be >= {_YH_SLICES[-1][1]}, got {l}"
    rows = b * c
    x2d = combined.reshape(rows, l)

    yl = x2d[:, _YL_SLICE[0]:_YL_SLICE[1]]
    yh = [x2d[:, s:e] for (s, e) in _YH_SLICES]        # finest -> coarsest

    x0 = yl
    for hi in yh[::-1]:                                # reconstruct coarsest level first
        if x0.shape[-1] > hi.shape[-1]:                # 'unpad' the odd-length carry
            x0 = x0[:, :-1]
        x0 = _sfb_level(x0, hi, tile_m=tile_m, vmem_budget_bytes=vmem_budget_bytes)

    out = x0.reshape(b, c, x0.shape[-1])
    # TODO(synk): `reshape_tensor` is not defined in the provided module source;
    # return the reconstructed (B, C, 8000) signal unchanged.
    return out


def _idwt_reference(combined):
    """Pure-JAX reference using XLA transposed convolutions (independent code path)."""
    b, c, l = combined.shape
    x = combined.reshape(b * c, l).astype(jnp.float32)
    g0 = jnp.asarray(_DB3_REC_LO, jnp.float32)
    g1 = jnp.asarray(_DB3_REC_HI, jnp.float32)

    def tconv(z, w):
        # torch.conv_transpose1d(z, w, stride=2, padding=L-2) ==
        # correlation of the 2x-dilated input with the flipped filter, pad (1, 1).
        return jax.lax.conv_general_dilated(
            z[:, None, :], jnp.flip(w)[None, None, :],
            window_strides=(1,), padding=[(1, 1)], lhs_dilation=(2,),
            dimension_numbers=("NCH", "OIH", "NCH"))[:, 0, :]

    yl = x[:, _YL_SLICE[0]:_YL_SLICE[1]]
    yh = [x[:, s:e] for (s, e) in _YH_SLICES]
    x0 = yl
    for hi in yh[::-1]:
        if x0.shape[-1] > hi.shape[-1]:
            x0 = x0[:, :-1]
        x0 = tconv(x0, g0) + tconv(hi, g1)
    return x0.reshape(b, c, -1).astype(combined.dtype)


if __name__ == "__main__":
    key = jax.random.PRNGKey(0)
    # (batch=2, channels=4, combined length 8013) as implied by the module's slicing.
    x = jax.random.normal(key, (2, 4, 8013), dtype=jnp.float32)

    out = jax.jit(idwt_layer)(x)
    out = jax.block_until_ready(out)

    ref = _idwt_reference(x)
    assert out.shape == (2, 4, 8000), out.shape
    assert jnp.allclose(out, ref, atol=1e-4, rtol=1e-4), float(jnp.max(jnp.abs(out - ref)))

    print("KERNEL_OK")
</pallas_src>

<mosaic_0001>
module attributes {stable_mosaic.version = 11 : i64} {
  func.func @_sfb_kernel(%arg0: i32, %arg1: memref<8x1004xf32, #tpu.memory_space<vmem>>, %arg2: memref<8x1004xf32, #tpu.memory_space<vmem>>, %arg3: memref<8x1002xf32, #tpu.memory_space<vmem>>, %arg4: memref<8x1002xf32, #tpu.memory_space<vmem>>) attributes {dimension_semantics = [#tpu.dimension_semantics<parallel>], iteration_bounds = array<i64: 1>, scalar_prefetch = 0 : i64, scratch_operands = 0 : i64, tpu.core_type = #tpu.core_type<tc>, window_params = [{transform_indices = @transform_0, window_bounds = array<i64: 8, 1004>}, {transform_indices = @transform_1, window_bounds = array<i64: 8, 1004>}, {transform_indices = @transform_2, window_bounds = array<i64: 8, 1002>}, {transform_indices = @transform_3, window_bounds = array<i64: 8, 1002>}]} {
    %c0 = arith.constant 0 : index
    %c0_0 = arith.constant 0 : index
    %0 = vector.load %arg1[%c0, %c0_0] : memref<8x1004xf32, #tpu.memory_space<vmem>>, vector<8x1002xf32>
    %c0_1 = arith.constant 0 : index
    %c0_2 = arith.constant 0 : index
    %1 = vector.load %arg2[%c0_1, %c0_2] : memref<8x1004xf32, #tpu.memory_space<vmem>>, vector<8x1002xf32>
    %cst = arith.constant -0.0854412764 : f32
    %2 = vector.broadcast %cst : f32 to vector<8x1002xf32>
    %3 = arith.mulf %2, %0 : vector<8x1002xf32>
    %cst_3 = arith.constant 0.8068915 : f32
    %4 = vector.broadcast %cst_3 : f32 to vector<8x1002xf32>
    %5 = arith.mulf %4, %1 : vector<8x1002xf32>
    %6 = arith.addf %3, %5 : vector<8x1002xf32>
    %cst_4 = arith.constant 0.0352262929 : f32
    %7 = vector.broadcast %cst_4 : f32 to vector<8x1002xf32>
    %8 = arith.mulf %7, %0 : vector<8x1002xf32>
    %cst_5 = arith.constant -0.33267054 : f32
    %9 = vector.broadcast %cst_5 : f32 to vector<8x1002xf32>
    %10 = arith.mulf %9, %1 : vector<8x1002xf32>
    %11 = arith.addf %8, %10 : vector<8x1002xf32>
    %c0_6 = arith.constant 0 : index
    %c1 = arith.constant 1 : index
    %12 = vector.load %arg1[%c0_6, %c1] : memref<8x1004xf32, #tpu.memory_space<vmem>>, vector<8x1002xf32>
    %c0_7 = arith.constant 0 : index
    %c1_8 = arith.constant 1 : index
    %13 = vector.load %arg2[%c0_7, %c1_8] : memref<8x1004xf32, #tpu.memory_space<vmem>>, vector<8x1002xf32>
    %cst_9 = arith.constant 0.459877491 : f32
    %14 = vector.broadcast %cst_9 : f32 to vector<8x1002xf32>
    %15 = arith.mulf %14, %12 : vector<8x1002xf32>
    %cst_10 = arith.constant -0.135011017 : f32
    %16 = vector.broadcast %cst_10 : f32 to vector<8x1002xf32>
    %17 = arith.mulf %16, %13 : vector<8x1002xf32>
    %18 = arith.addf %15, %17 : vector<8x1002xf32>
    %cst_11 = arith.constant -0.135011017 : f32
    %19 = vector.broadcast %cst_11 : f32 to vector<8x1002xf32>
    %20 = arith.mulf %19, %12 : vector<8x1002xf32>
    %cst_12 = arith.constant -0.459877491 : f32
    %21 = vector.broadcast %cst_12 : f32 to vector<8x1002xf32>
    %22 = arith.mulf %21, %13 : vector<8x1002xf32>
    %23 = arith.addf %20, %22 : vector<8x1002xf32>
    %24 = arith.addf %6, %18 : vector<8x1002xf32>
    %25 = arith.addf %11, %23 : vector<8x1002xf32>
    %c0_13 = arith.constant 0 : index
    %c2 = arith.constant 2 : index
    %26 = vector.load %arg1[%c0_13, %c2] : memref<8x1004xf32, #tpu.memory_space<vmem>>, vector<8x1002xf32>
    %c0_14 = arith.constant 0 : index
    %c2_15 = arith.constant 2 : index
    %27 = vector.load %arg2[%c0_14, %c2_15] : memref<8x1004xf32, #tpu.memory_space<vmem>>, vector<8x1002xf32>
    %cst_16 = arith.constant 0.33267054 : f32
    %28 = vector.broadcast %cst_16 : f32 to vector<8x1002xf32>
    %29 = arith.mulf %28, %26 : vector<8x1002xf32>
    %cst_17 = arith.constant 0.0352262929 : f32
    %30 = vector.broadcast %cst_17 : f32 to vector<8x1002xf32>
    %31 = arith.mulf %30, %27 : vector<8x1002xf32>
    %32 = arith.addf %29, %31 : vector<8x1002xf32>
    %cst_18 = arith.constant 0.8068915 : f32
    %33 = vector.broadcast %cst_18 : f32 to vector<8x1002xf32>
    %34 = arith.mulf %33, %26 : vector<8x1002xf32>
    %cst_19 = arith.constant 0.0854412764 : f32
    %35 = vector.broadcast %cst_19 : f32 to vector<8x1002xf32>
    %36 = arith.mulf %35, %27 : vector<8x1002xf32>
    %37 = arith.addf %34, %36 : vector<8x1002xf32>
    %38 = arith.addf %24, %32 : vector<8x1002xf32>
    %39 = arith.addf %25, %37 : vector<8x1002xf32>
    %c0_20 = arith.constant 0 : index
    %c0_21 = arith.constant 0 : index
    %40 = vector.load %arg3[%c0_20, %c0_21] : memref<8x1002xf32, #tpu.memory_space<vmem>>, vector<8x1002xf32>
    tpu.vector_store %arg3[%c0_20, %c0_21], %38 {strides = array<i32>} : memref<8x1002xf32, #tpu.memory_space<vmem>>, vector<8x1002xf32>,
    %c0_22 = arith.constant 0 : index
    %c0_23 = arith.constant 0 : index
    %41 = vector.load %arg4[%c0_22, %c0_23] : memref<8x1002xf32, #tpu.memory_space<vmem>>, vector<8x1002xf32>
    tpu.vector_store %arg4[%c0_22, %c0_23], %39 {strides = array<i32>} : memref<8x1002xf32, #tpu.memory_space<vmem>>, vector<8x1002xf32>,
    return
  }
  func.func @transform_0(%arg0: i32) -> (i32, i32) {
    %c0_i32 = arith.constant 0 : i32
    %c0_i32_0 = arith.constant 0 : i32
    return %arg0, %c0_i32 : i32, i32
  }
  func.func @transform_1(%arg0: i32) -> (i32, i32) {
    %c0_i32 = arith.constant 0 : i32
    %c0_i32_0 = arith.constant 0 : i32
    return %arg0, %c0_i32 : i32, i32
  }
  func.func @transform_2(%arg0: i32) -> (i32, i32) {
    %c0_i32 = arith.constant 0 : i32
    %c0_i32_0 = arith.constant 0 : i32
    return %arg0, %c0_i32 : i32, i32
  }
  func.func @transform_3(%arg0: i32) -> (i32, i32) {
    %c0_i32 = arith.constant 0 : i32
    %c0_i32_0 = arith.constant 0 : i32
    return %arg0, %c0_i32 : i32, i32
  }
}

module attributes {stable_mosaic.version = 11 : i64} {
  func.func @_sfb_kernel(%arg0: i32, %arg1: memref<8x2003xf32, #tpu.memory_space<vmem>>, %arg2: memref<8x2003xf32, #tpu.memory_space<vmem>>, %arg3: memref<8x2001xf32, #tpu.memory_space<vmem>>, %arg4: memref<8x2001xf32, #tpu.memory_space<vmem>>) attributes {dimension_semantics = [#tpu.dimension_semantics<parallel>], iteration_bounds = array<i64: 1>, scalar_prefetch = 0 : i64, scratch_operands = 0 : i64, tpu.core_type = #tpu.core_type<tc>, window_params = [{transform_indices = @transform_0, window_bounds = array<i64: 8, 2003>}, {transform_indices = @transform_1, window_bounds = array<i64: 8, 2003>}, {transform_indices = @transform_2, window_bounds = array<i64: 8, 2001>}, {transform_indices = @transform_3, window_bounds = array<i64: 8, 2001>}]} {
    %c0 = arith.constant 0 : index
    %c0_0 = arith.constant 0 : index
    %0 = vector.load %arg1[%c0, %c0_0] : memref<8x2003xf32, #tpu.memory_space<vmem>>, vector<8x2001xf32>
    %c0_1 = arith.constant 0 : index
    %c0_2 = arith.constant 0 : index
    %1 = vector.load %arg2[%c0_1, %c0_2] : memref<8x2003xf32, #tpu.memory_space<vmem>>, vector<8x2001xf32>
    %cst = arith.constant -0.0854412764 : f32
    %2 = vector.broadcast %cst : f32 to vector<8x2001xf32>
    %3 = arith.mulf %2, %0 : vector<8x2001xf32>
    %cst_3 = arith.constant 0.8068915 : f32
    %4 = vector.broadcast %cst_3 : f32 to vector<8x2001xf32>
    %5 = arith.mulf %4, %1 : vector<8x2001xf32>
    %6 = arith.addf %3, %5 : vector<8x2001xf32>
    %cst_4 = arith.constant 0.0352262929 : f32
    %7 = vector.broadcast %cst_4 : f32 to vector<8x2001xf32>
    %8 = arith.mulf %7, %0 : vector<8x2001xf32>
    %cst_5 = arith.constant -0.33267054 : f32
    %9 = vector.broadcast %cst_5 : f32 to vector<8x2001xf32>
    %10 = arith.mulf %9, %1 : vector<8x2001xf32>
    %11 = arith.addf %8, %10 : vector<8x2001xf32>
    %c0_6 = arith.constant 0 : index
    %c1 = arith.constant 1 : index
    %12 = vector.load %arg1[%c0_6, %c1] : memref<8x2003xf32, #tpu.memory_space<vmem>>, vector<8x2001xf32>
    %c0_7 = arith.constant 0 : index
    %c1_8 = arith.constant 1 : index
    %13 = vector.load %arg2[%c0_7, %c1_8] : memref<8x2003xf32, #tpu.memory_space<vmem>>, vector<8x2001xf32>
    %cst_9 = arith.constant 0.459877491 : f32
    %14 = vector.broadcast %cst_9 : f32 to vector<8x2001xf32>
    %15 = arith.mulf %14, %12 : vector<8x2001xf32>
    %cst_10 = arith.constant -0.135011017 : f32
    %16 = vector.broadcast %cst_10 : f32 to vector<8x2001xf32>
    %17 = arith.mulf %16, %13 : vector<8x2001xf32>
    %18 = arith.addf %15, %17 : vector<8x2001xf32>
    %cst_11 = arith.constant -0.135011017 : f32
    %19 = vector.broadcast %cst_11 : f32 to vector<8x2001xf32>
    %20 = arith.mulf %19, %12 : vector<8x2001xf32>
    %cst_12 = arith.constant -0.459877491 : f32
    %21 = vector.broadcast %cst_12 : f32 to vector<8x2001xf32>
    %22 = arith.mulf %21, %13 : vector<8x2001xf32>
    %23 = arith.addf %20, %22 : vector<8x2001xf32>
    %24 = arith.addf %6, %18 : vector<8x2001xf32>
    %25 = arith.addf %11, %23 : vector<8x2001xf32>
    %c0_13 = arith.constant 0 : index
    %c2 = arith.constant 2 : index
    %26 = vector.load %arg1[%c0_13, %c2] : memref<8x2003xf32, #tpu.memory_space<vmem>>, vector<8x2001xf32>
    %c0_14 = arith.constant 0 : index
    %c2_15 = arith.constant 2 : index
    %27 = vector.load %arg2[%c0_14, %c2_15] : memref<8x2003xf32, #tpu.memory_space<vmem>>, vector<8x2001xf32>
    %cst_16 = arith.constant 0.33267054 : f32
    %28 = vector.broadcast %cst_16 : f32 to vector<8x2001xf32>
    %29 = arith.mulf %28, %26 : vector<8x2001xf32>
    %cst_17 = arith.constant 0.0352262929 : f32
    %30 = vector.broadcast %cst_17 : f32 to vector<8x2001xf32>
    %31 = arith.mulf %30, %27 : vector<8x2001xf32>
    %32 = arith.addf %29, %31 : vector<8x2001xf32>
    %cst_18 = arith.constant 0.8068915 : f32
    %33 = vector.broadcast %cst_18 : f32 to vector<8x2001xf32>
    %34 = arith.mulf %33, %26 : vector<8x2001xf32>
    %cst_19 = arith.constant 0.0854412764 : f32
    %35 = vector.broadcast %cst_19 : f32 to vector<8x2001xf32>
    %36 = arith.mulf %35, %27 : vector<8x2001xf32>
    %37 = arith.addf %34, %36 : vector<8x2001xf32>
    %38 = arith.addf %24, %32 : vector<8x2001xf32>
    %39 = arith.addf %25, %37 : vector<8x2001xf32>
    %c0_20 = arith.constant 0 : index
    %c0_21 = arith.constant 0 : index
    %40 = vector.load %arg3[%c0_20, %c0_21] : memref<8x2001xf32, #tpu.memory_space<vmem>>, vector<8x2001xf32>
    tpu.vector_store %arg3[%c0_20, %c0_21], %38 {strides = array<i32>} : memref<8x2001xf32, #tpu.memory_space<vmem>>, vector<8x2001xf32>,
    %c0_22 = arith.constant 0 : index
    %c0_23 = arith.constant 0 : index
    %41 = vector.load %arg4[%c0_22, %c0_23] : memref<8x2001xf32, #tpu.memory_space<vmem>>, vector<8x2001xf32>
    tpu.vector_store %arg4[%c0_22, %c0_23], %39 {strides = array<i32>} : memref<8x2001xf32, #tpu.memory_space<vmem>>, vector<8x2001xf32>,
    return
  }
  func.func @transform_0(%arg0: i32) -> (i32, i32) {
    %c0_i32 = arith.constant 0 : i32
    %c0_i32_0 = arith.constant 0 : i32
    return %arg0, %c0_i32 : i32, i32
  }
  func.func @transform_1(%arg0: i32) -> (i32, i32) {
    %c0_i32 = arith.constant 0 : i32
    %c0_i32_0 = arith.constant 0 : i32
    return %arg0, %c0_i32 : i32, i32
  }
  func.func @transform_2(%arg0: i32) -> (i32, i32) {
    %c0_i32 = arith.constant 0 : i32
    %c0_i32_0 = arith.constant 0 : i32
    return %arg0, %c0_i32 : i32, i32
  }
  func.func @transform_3(%arg0: i32) -> (i32, i32) {
    %c0_i32 = arith.constant 0 : i32
    %c0_i32_0 = arith.constant 0 : i32
    return %arg0, %c0_i32 : i32, i32
  }
}

module attributes {stable_mosaic.version = 11 : i64} {
  func.func @_sfb_kernel(%arg0: i32, %arg1: memref<8x4002xf32, #tpu.memory_space<vmem>>, %arg2: memref<8x4002xf32, #tpu.memory_space<vmem>>, %arg3: memref<8x4000xf32, #tpu.memory_space<vmem>>, %arg4: memref<8x4000xf32, #tpu.memory_space<vmem>>) attributes {dimension_semantics = [#tpu.dimension_semantics<parallel>], iteration_bounds = array<i64: 1>, scalar_prefetch = 0 : i64, scratch_operands = 0 : i64, tpu.core_type = #tpu.core_type<tc>, window_params = [{transform_indices = @transform_0, window_bounds = array<i64: 8, 4002>}, {transform_indices = @transform_1, window_bounds = array<i64: 8, 4002>}, {transform_indices = @transform_2, window_bounds = array<i64: 8, 4000>}, {transform_indices = @transform_3, window_bounds = array<i64: 8, 4000>}]} {
    %c0 = arith.constant 0 : index
    %c0_0 = arith.constant 0 : index
    %0 = vector.load %arg1[%c0, %c0_0] : memref<8x4002xf32, #tpu.memory_space<vmem>>, vector<8x4000xf32>
    %c0_1 = arith.constant 0 : index
    %c0_2 = arith.constant 0 : index
    %1 = vector.load %arg2[%c0_1, %c0_2] : memref<8x4002xf32, #tpu.memory_space<vmem>>, vector<8x4000xf32>
    %cst = arith.constant -0.0854412764 : f32
    %2 = vector.broadcast %cst : f32 to vector<8x4000xf32>
    %3 = arith.mulf %2, %0 : vector<8x4000xf32>
    %cst_3 = arith.constant 0.8068915 : f32
    %4 = vector.broadcast %cst_3 : f32 to vector<8x4000xf32>
    %5 = arith.mulf %4, %1 : vector<8x4000xf32>
    %6 = arith.addf %3, %5 : vector<8x4000xf32>
    %cst_4 = arith.constant 0.0352262929 : f32
    %7 = vector.broadcast %cst_4 : f32 to vector<8x4000xf32>
    %8 = arith.mulf %7, %0 : vector<8x4000xf32>
    %cst_5 = arith.constant -0.33267054 : f32
    %9 = vector.broadcast %cst_5 : f32 to vector<8x4000xf32>
    %10 = arith.mulf %9, %1 : vector<8x4000xf32>
    %11 = arith.addf %8, %10 : vector<8x4000xf32>
    %c0_6 = arith.constant 0 : index
    %c1 = arith.constant 1 : index
    %12 = vector.load %arg1[%c0_6, %c1] : memref<8x4002xf32, #tpu.memory_space<vmem>>, vector<8x4000xf32>
    %c0_7 = arith.constant 0 : index
    %c1_8 = arith.constant 1 : index
    %13 = vector.load %arg2[%c0_7, %c1_8] : memref<8x4002xf32, #tpu.memory_space<vmem>>, vector<8x4000xf32>
    %cst_9 = arith.constant 0.459877491 : f32
    %14 = vector.broadcast %cst_9 : f32 to vector<8x4000xf32>
    %15 = arith.mulf %14, %12 : vector<8x4000xf32>
    %cst_10 = arith.constant -0.135011017 : f32
    %16 = vector.broadcast %cst_10 : f32 to vector<8x4000xf32>
    %17 = arith.mulf %16, %13 : vector<8x4000xf32>
    %18 = arith.addf %15, %17 : vector<8x4000xf32>
    %cst_11 = arith.constant -0.135011017 : f32
    %19 = vector.broadcast %cst_11 : f32 to vector<8x4000xf32>
    %20 = arith.mulf %19, %12 : vector<8x4000xf32>
    %cst_12 = arith.constant -0.459877491 : f32
    %21 = vector.broadcast %cst_12 : f32 to vector<8x4000xf32>
    %22 = arith.mulf %21, %13 : vector<8x4000xf32>
    %23 = arith.addf %20, %22 : vector<8x4000xf32>
    %24 = arith.addf %6, %18 : vector<8x4000xf32>
    %25 = arith.addf %11, %23 : vector<8x4000xf32>
    %c0_13 = arith.constant 0 : index
    %c2 = arith.constant 2 : index
    %26 = vector.load %arg1[%c0_13, %c2] : memref<8x4002xf32, #tpu.memory_space<vmem>>, vector<8x4000xf32>
    %c0_14 = arith.constant 0 : index
    %c2_15 = arith.constant 2 : index
    %27 = vector.load %arg2[%c0_14, %c2_15] : memref<8x4002xf32, #tpu.memory_space<vmem>>, vector<8x4000xf32>
    %cst_16 = arith.constant 0.33267054 : f32
    %28 = vector.broadcast %cst_16 : f32 to vector<8x4000xf32>
    %29 = arith.mulf %28, %26 : vector<8x4000xf32>
    %cst_17 = arith.constant 0.0352262929 : f32
    %30 = vector.broadcast %cst_17 : f32 to vector<8x4000xf32>
    %31 = arith.mulf %30, %27 : vector<8x4000xf32>
    %32 = arith.addf %29, %31 : vector<8x4000xf32>
    %cst_18 = arith.constant 0.8068915 : f32
    %33 = vector.broadcast %cst_18 : f32 to vector<8x4000xf32>
    %34 = arith.mulf %33, %26 : vector<8x4000xf32>
    %cst_19 = arith.constant 0.0854412764 : f32
    %35 = vector.broadcast %cst_19 : f32 to vector<8x4000xf32>
    %36 = arith.mulf %35, %27 : vector<8x4000xf32>
    %37 = arith.addf %34, %36 : vector<8x4000xf32>
    %38 = arith.addf %24, %32 : vector<8x4000xf32>
    %39 = arith.addf %25, %37 : vector<8x4000xf32>
    %c0_20 = arith.constant 0 : index
    %c0_21 = arith.constant 0 : index
    %40 = vector.load %arg3[%c0_20, %c0_21] : memref<8x4000xf32, #tpu.memory_space<vmem>>, vector<8x4000xf32>
    tpu.vector_store %arg3[%c0_20, %c0_21], %38 {strides = array<i32>} : memref<8x4000xf32, #tpu.memory_space<vmem>>, vector<8x4000xf32>,
    %c0_22 = arith.constant 0 : index
    %c0_23 = arith.constant 0 : index
    %41 = vector.load %arg4[%c0_22, %c0_23] : memref<8x4000xf32, #tpu.memory_space<vmem>>, vector<8x4000xf32>
    tpu.vector_store %arg4[%c0_22, %c0_23], %39 {strides = array<i32>} : memref<8x4000xf32, #tpu.memory_space<vmem>>, vector<8x4000xf32>,
    return
  }
  func.func @transform_0(%arg0: i32) -> (i32, i32) {
    %c0_i32 = arith.constant 0 : i32
    %c0_i32_0 = arith.constant 0 : i32
    return %arg0, %c0_i32 : i32, i32
  }
  func.func @transform_1(%arg0: i32) -> (i32, i32) {
    %c0_i32 = arith.constant 0 : i32
    %c0_i32_0 = arith.constant 0 : i32
    return %arg0, %c0_i32 : i32, i32
  }
  func.func @transform_2(%arg0: i32) -> (i32, i32) {
    %c0_i32 = arith.constant 0 : i32
    %c0_i32_0 = arith.constant 0 : i32
    return %arg0, %c0_i32 : i32, i32
  }
  func.func @transform_3(%arg0: i32) -> (i32, i32) {
    %c0_i32 = arith.constant 0 : i32
    %c0_i32_0 = arith.constant 0 : i32
    return %arg0, %c0_i32 : i32, i32
  }
}

</mosaic_0001>

<bundles_post_ra>
// kernel: idwt_layer.3
= control target key start
LH: loop header
LB: loop body
LE: loop exit
PB: predicated region body
PF: predicated region fallthrough
CT: control target
= control target key end

     0   :  { %s390_s7 = smov 127   ;;  %vm149_vm0 = vcmask 1039360   ;;  %vm370_vm1 = vcmask 867328   ;;  %vm292_vm2 = vcmask 1031168   ;;  %s740_s0 = inlined_call_operand.vmem [shape: f32[8,1004], index: 0, kind: input, shape index: {}]   ;;  %s741_s1 = inlined_call_operand.vmem [shape: f32[8,1004], index: 1, kind: input, shape index: {}]   ;;  %s742_s2 = inlined_call_operand.vmem [shape: f32[8,1002], index: 2, kind: output, shape index: {0}]   ;;  %s743_s3 = inlined_call_operand.vmem [shape: f32[8,1002], index: 3, kind: output, shape index: {1}]  }
   0x1   :  { %v415_v0 = vld [vmem:[%s740_s0 + $0x20] sm:$0xff]  ;;  %v425_v2 = vld [vmem:[%s740_s0 + $0x10] sm:$0xff]  ;;  %v449_v10 = vld [vmem:[%s740_s0 + $0x28] sm:$0xff] }
   0x2   :  { %v420_v1 = vld [vmem:[%s741_s1 + $0x20] sm:$0xff]  ;;  %v81_v3 = vmul.f32 0.4598775, %v415_v0  ;;  %v432_v5 = vld [vmem:[%s741_s1 + $0x10] sm:$0xff]  ;;  %v79_v7 = vmul.f32 0.4598775, %v425_v2 }
   0x3   :  { %v89_v4 = vmul.f32 -0.13501102, %v420_v1  ;;  %v437_v6 = vld [vmem:[%s740_s0] sm:$0xff]  ;;  %v87_v8 = vmul.f32 -0.13501102, %v432_v5  ;;  %v456_v14 = vld [vmem:[%s741_s1 + $0x28] sm:$0xff] }
   0x4   :  { %v444_v9 = vld [vmem:[%s741_s1] sm:$0xff]  ;;  %v77_v12 = vmul.f32 0.4598775, %v437_v6  ;;  %v461_v15 = vld [vmem:[%s740_s0 + $0x18] sm:$0xff]  ;;  %v471_v18 = vld [vmem:[%s740_s0 + $0x8] sm:$0xff] }
   0x5   :  { %v97_v11 = vadd.f32 %v89_v4, %v81_v3  ;;  %v85_v13 = vmul.f32 -0.13501102, %v444_v9  ;;  %v95_v16 = vadd.f32 %v87_v8, %v79_v7  ;;  %v466_v17 = vld [vmem:[%s741_s1 + $0x18] sm:$0xff]  ;;  %v82_v20 = vmul.f32 0.4598775, %v449_v10  ;;  %v479_v22 = vld [vmem:[%s741_s1 + $0x8] sm:$0xff] }
   0x6   :  { %v90_v21 = vmul.f32 -0.13501102, %v456_v14  ;;  %v80_v23 = vmul.f32 0.4598775, %v461_v15  ;;  %v88_v24 = vmul.f32 -0.13501102, %v466_v17 }
   0x7   :  { %141 = vrot.lane.b32.xlu2 %v97_v11, %s390_s7  ;;  %v93_v19 = vadd.f32 %v85_v13, %v77_v12  ;;  %137 = vrot.lane.b32.xlu1 %v95_v16, %s390_s7  ;;  %v78_v25 = vmul.f32 0.4598775, %v471_v18  ;;  %v86_v26 = vmul.f32 -0.13501102, %v479_v22  ;;  %v490_v30 = vld [vmem:[%s740_s0 + $0x38] sm:$0xff]  ;;  %v500_v32 = vld [vmem:[%s740_s0 + $0x30] sm:$0xff] }
   0x8   :  { %v98_v27 = vadd.f32 %v90_v21, %v82_v20  ;;  %v96_v28 = vadd.f32 %v88_v24, %v80_v23  ;;  %v495_v31 = vld [vmem:[%s741_s1 + $0x38] sm:$0xff]  ;;  %v505_v33 = vld [vmem:[%s741_s1 + $0x30] sm:$0xff]  ;;  %v101_v34 = vmul.f32 -0.13501102, %v437_v6  ;;  %v109_v35 = vmul.f32 -0.4598775, %v444_v9 }
   0x9   :  { %133 = vrot.lane.b32.xlu0 %v93_v19, %s390_s7  ;;  %v94_v29 = vadd.f32 %v86_v26, %v78_v25  ;;  %v84_v36 = vmul.f32 0.4598775, %v490_v30  ;;  %v92_v37 = vmul.f32 -0.13501102, %v495_v31  ;;  %v83_v38 = vmul.f32 0.4598775, %v500_v32 }
   0xa   :  { %v91_v39 = vmul.f32 -0.13501102, %v505_v33  ;;  %v117_v40 = vadd.f32 %v109_v35, %v101_v34  ;;  %v104_v43 = vmul.f32 -0.13501102, %v461_v15  ;;  %v112_v44 = vmul.f32 -0.4598775, %v466_v17 }
   0xb   :  { %v100_v41 = vadd.f32 %v92_v37, %v84_v36  ;;  %v103_v45 = vmul.f32 -0.13501102, %v425_v2  ;;  %v111_v46 = vmul.f32 -0.4598775, %v432_v5  ;;  %v102_v47 = vmul.f32 -0.13501102, %v471_v18 }
   0xc   :  { %v99_v42 = vadd.f32 %v91_v39, %v83_v38  ;;  %v110_v48 = vmul.f32 -0.4598775, %v479_v22  ;;  %v120_v49 = vadd.f32 %v112_v44, %v104_v43  ;;  %v107_v52 = vmul.f32 -0.13501102, %v500_v32  ;;  %s391_s0 = smov 126  }
   0xd   :  { %v119_v50 = vadd.f32 %v111_v46, %v103_v45  ;;  %v115_v53 = vmul.f32 -0.4598775, %v505_v33  ;;  %v106_v54 = vmul.f32 -0.13501102, %v449_v10  ;;  %v114_v55 = vmul.f32 -0.4598775, %v456_v14 }
   0xe   :  { %v118_v51 = vadd.f32 %v110_v48, %v102_v47  ;;  %v105_v56 = vmul.f32 -0.13501102, %v415_v0  ;;  %v113_v57 = vmul.f32 -0.4598775, %v420_v1  ;;  %v221_v61 = vmul.f32 0.33267054, %v471_v18 }
   0xf   :  { %143 = vrot.lane.b32.xlu2 %v98_v27, %s390_s7  ;;  %139 = vrot.lane.b32.xlu1 %v96_v28, %s390_s7  ;;  %v123_v58 = vadd.f32 %v115_v53, %v107_v52  ;;  %v122_v59 = vadd.f32 %v114_v55, %v106_v54  ;;  %v229_v62 = vmul.f32 0.035226293, %v479_v22  ;;  %v220_v63 = vmul.f32 0.33267054, %v437_v6 }
  0x10   :  { %v121_v60 = vadd.f32 %v113_v57, %v105_v56  ;;  %v228_v3 = vmul.f32 0.035226293, %v444_v9  ;;  %v108_v4 = vmul.f32 -0.13501102, %v490_v30  ;;  %v116_v7 = vmul.f32 -0.4598775, %v495_v31 }
  0x11   :  { %135 = vrot.lane.b32.xlu0 %v94_v29, %s390_s7  ;;  %v237_v8 = vadd.f32 %v229_v62, %v221_v61  ;;  %v224_v13 = vmul.f32 0.33267054, %v415_v0  ;;  %v232_v16 = vmul.f32 0.035226293, %v420_v1  ;;  %v223_v19 = vmul.f32 0.33267054, %v461_v15 }
  0x12   :  { %v236_v11 = vadd.f32 %v228_v3, %v220_v63  ;;  %v124_v12 = vadd.f32 %v116_v7, %v108_v4  ;;  %v231_v20 = vmul.f32 0.035226293, %v466_v17  ;;  %v222_v21 = vmul.f32 0.33267054, %v425_v2 }
  0x13   :  { %v230_v23 = vmul.f32 0.035226293, %v432_v5  ;;  %v240_v24 = vadd.f32 %v232_v16, %v224_v13  ;;  %v227_v27 = vmul.f32 0.33267054, %v490_v30  ;;  %v235_v28 = vmul.f32 0.035226293, %v495_v31 }
  0x14   :  { %v239_v25 = vadd.f32 %v231_v20, %v223_v19  ;;  %v226_v29 = vmul.f32 0.33267054, %v500_v32  ;;  %v234_v34 = vmul.f32 0.035226293, %v505_v33  ;;  %v225_v35 = vmul.f32 0.33267054, %v449_v10 }
  0x15   :  { %v238_v26 = vadd.f32 %v230_v23, %v222_v21  ;;  %v233_v36 = vmul.f32 0.035226293, %v456_v14  ;;  %v243_v37 = vadd.f32 %v235_v28, %v227_v27  ;;  %v253_v43 = vmul.f32 0.08544128, %v479_v22 }
  0x16   :  { %v242_v38 = vadd.f32 %v234_v34, %v226_v29  ;;  %v244_v44 = vmul.f32 0.8068915, %v437_v6  ;;  %v252_v45 = vmul.f32 0.08544128, %v444_v9  ;;  %v256_v52 = vmul.f32 0.08544128, %v420_v1 }
  0x17   :  { %181 = vrot.lane.b32.xlu2 %v117_v40, %s390_s7  ;;  %147 = vrot.lane.b32.xlu1 %v100_v41, %s390_s7  ;;  %v241_v39 = vadd.f32 %v233_v36, %v225_v35  ;;  %v246_v40 = vmul.f32 0.8068915, %v425_v2  ;;  %v254_v41 = vmul.f32 0.08544128, %v432_v5  ;;  %v247_v53 = vmul.f32 0.8068915, %v461_v15 }
  0x18   :  { %v260_v48 = vadd.f32 %v252_v45, %v244_v44  ;;  %v255_v54 = vmul.f32 0.08544128, %v466_v17  ;;  %v258_v61 = vmul.f32 0.08544128, %v505_v33  ;;  %v32_v44 = vmul.f32 -0.08544128, %v461_v15 }
  0x19   :  { %145 = vrot.lane.b32.xlu0 %v99_v42, %s390_s7  ;;  %v245_v42 = vmul.f32 0.8068915, %v471_v18  ;;  %v262_v46 = vadd.f32 %v254_v41, %v246_v40  ;;  %v39_v45 = vmul.f32 0.8068915, %v432_v5 }
  0x1a   :  { %v263_v57 = vadd.f32 %v255_v54, %v247_v53 }
  0x1b   :  { %v261_v47 = vadd.f32 %v253_v43, %v245_v42 }
  0x1f   :  { %187 = vrot.lane.b32.xlu2 %v120_v49, %s390_s7  ;;  %185 = vrot.lane.b32.xlu1 %v119_v50, %s390_s7  ;;  %v249_v49 = vmul.f32 0.8068915, %v449_v10  ;;  %v257_v50 = vmul.f32 0.08544128, %v456_v14 }
  0x21   :  { %183 = vrot.lane.b32.xlu0 %v118_v51, %s390_s7  ;;  %v248_v51 = vmul.f32 0.8068915, %v415_v0  ;;  %v265_v55 = vadd.f32 %v257_v50, %v249_v49  ;;  %v31_v49 = vmul.f32 -0.08544128, %v425_v2  ;;  %v30_v50 = vmul.f32 -0.08544128, %v471_v18 }
  0x23   :  { %v264_v56 = vadd.f32 %v256_v52, %v248_v51  ;;  %v38_v51 = vmul.f32 0.8068915, %v479_v22 }
  0x27   :  { %193 = vrot.lane.b32.xlu2 %v123_v58, %s390_s7  ;;  %191 = vrot.lane.b32.xlu1 %v122_v59, %s390_s7  ;;  %v251_v58 = vmul.f32 0.8068915, %v490_v30  ;;  %v259_v59 = vmul.f32 0.08544128, %v495_v31 }
  0x29   :  { %189 = vrot.lane.b32.xlu0 %v121_v60, %s390_s7  ;;  %v250_v60 = vmul.f32 0.8068915, %v500_v32  ;;  %v267_v62 = vadd.f32 %v259_v59, %v251_v58  ;;  %v46_v58 = vadd.f32 %v38_v51, %v30_v50  ;;  %v54_v50 = vmul.f32 0.035226293, %v471_v18 }
  0x2a   :  { %v62_v51 = vmul.f32 -0.33267054, %v479_v22 }
  0x2b   :  { %v266_v63 = vadd.f32 %v258_v61, %v250_v60  ;;  %v41_v61 = vmul.f32 0.8068915, %v420_v1 }
  0x2c   :  { %v70_v18 = vadd.f32 %v62_v51, %v54_v50 }
  0x2f   :  { %278 = vrot.lane.b32.xlu2 %v237_v8, %s391_s0  ;;  %276 = vrot.lane.b32.xlu1 %v236_v11, %s391_s0 }
  0x31   :  { %195 = vrot.lane.b32.xlu0 %v124_v12, %s390_s7 }
  0x37   :  { %284 = vrot.lane.b32.xlu2 %v240_v24, %s391_s0  ;;  %282 = vrot.lane.b32.xlu1 %v239_v25, %s391_s0  ;;  %v36_v25 = vmul.f32 -0.08544128, %v490_v30 }
  0x39   :  { %280 = vrot.lane.b32.xlu0 %v238_v26, %s391_s0  ;;  %v44_v26 = vmul.f32 0.8068915, %v495_v31 }
  0x3b   :  { %v52_v34 = vadd.f32 %v44_v26, %v36_v25  ;;  %v35_v25 = vmul.f32 -0.08544128, %v500_v32  ;;  %v43_v26 = vmul.f32 0.8068915, %v505_v33 }
  0x3f   :  { %290 = vrot.lane.b32.xlu2 %v243_v37, %s391_s0  ;;  %288 = vrot.lane.b32.xlu1 %v242_v38, %s391_s0  ;;  %v37_v37 = vmul.f32 0.8068915, %v444_v9  ;;  %v29_v38 = vmul.f32 -0.08544128, %v437_v6 }
  0x41   :  { %286 = vrot.lane.b32.xlu0 %v241_v39, %s391_s0  ;;  %v45_v42 = vadd.f32 %v37_v37, %v29_v38 }
  0x47   :  { %328 = vrot.lane.b32.xlu2 %v262_v46, %s391_s0  ;;  %326 = vrot.lane.b32.xlu1 %v261_v47, %s391_s0  ;;  %v40_v46 = vmul.f32 0.8068915, %v466_v17 }
  0x49   :  { %324 = vrot.lane.b32.xlu0 %v260_v48, %s391_s0 }
  0x4f   :  { %334 = vrot.lane.b32.xlu2 %v265_v55, %s391_s0  ;;  %332 = vrot.lane.b32.xlu1 %v264_v56, %s391_s0  ;;  %v48_v55 = vadd.f32 %v40_v46, %v32_v44  ;;  %v47_v56 = vadd.f32 %v39_v45, %v31_v49  ;;  %v51_v45 = vadd.f32 %v43_v26, %v35_v25  ;;  %v56_v26 = vmul.f32 0.035226293, %v461_v15 }
  0x51   :  { %330 = vrot.lane.b32.xlu0 %v263_v57, %s391_s0 }
  0x57   :  { %338 = vrot.lane.b32.xlu1 %v267_v62, %s391_s0  ;;  %v33_v62 = vmul.f32 -0.08544128, %v415_v0 }
  0x59   :  { %336 = vrot.lane.b32.xlu0 %v266_v63, %s391_s0  ;;  %v49_v44 = vadd.f32 %v41_v61, %v33_v62  ;;  %v57_v62 = vmul.f32 0.035226293, %v415_v0 }
  0x61   :  { %v142_v3 = vpop.permute.xlu2 %141 }
  0x69   :  { %v588_v4 = vpop.permute.xlu2 %143 }
  0x6a   :  { %v592_v7 = vsel %vm149_vm0, %v142_v3, %v588_v4 }
  0x71   :  { %v594_v8 = vpop.permute.xlu2 %181 }
  0x79   :  { %v596_v11 = vpop.permute.xlu2 %187  ;;  %v138_v12 = vpop.permute.xlu1 %137 }
  0x7b   :  { %v134_v13 = vpop.permute.xlu0 %133 }
  0x81   :  { %v598_v16 = vpop.permute.xlu2 %193  ;;  %v140_v19 = vpop.permute.xlu1 %139 }
  0x82   :  { %v153_v57 = vsel %vm149_vm0, %v140_v19, %v142_v3  ;;  %v152_v59 = vsel %vm149_vm0, %v138_v12, %v140_v19  ;;  %v42_v3 = vmul.f32 0.8068915, %v456_v14 }
  0x83   :  { %v136_v20 = vpop.permute.xlu0 %135  ;;  %v168_v63 = vadd.f32 %v153_v57, %v48_v55  ;;  %v53_v55 = vmul.f32 0.035226293, %v437_v6 }
  0x84   :  { %v150_v43 = vsel %vm149_vm0, %v134_v13, %v136_v20  ;;  %v151_v60 = vsel %vm149_vm0, %v136_v20, %v138_v12  ;;  %v34_v13 = vmul.f32 -0.08544128, %v449_v10 }
  0x85   :  { %v165_v47 = vadd.f32 %v150_v43, %v45_v42  ;;  %v166_v37 = vadd.f32 %v151_v60, %v46_v58  ;;  %v55_v60 = vmul.f32 0.035226293, %v425_v2 }
  0x86   :  { %v50_v46 = vadd.f32 %v42_v3, %v34_v13 }
  0x89   :  { %v279_v21 = vpop.permute.xlu2 %278  ;;  %v148_v23 = vpop.permute.xlu1 %147 }
  0x8a   :  { %v172_v35 = vadd.f32 %v148_v23, %v52_v34 }
  0x8b   :  { %v146_v24 = vpop.permute.xlu0 %145 }
  0x91   :  { %v602_v27 = vpop.permute.xlu2 %284  ;;  %v604_v28 = vpop.permute.xlu1 %185 }
  0x92   :  { %v199_v15 = vsel %vm149_vm0, %v604_v28, %v596_v11 }
  0x93   :  { %v606_v29 = vpop.permute.xlu0 %183 }
  0x94   :  { %v198_v6 = vsel %vm149_vm0, %v606_v29, %v604_v28  ;;  %v67_v28 = vmul.f32 -0.33267054, %v505_v33 }
  0x95   :  { %v213_v61 = vadd.f32 %v198_v6, %v70_v18 }
  0x99   :  { %v291_v36 = vpop.permute.xlu2 %290  ;;  %v610_v39 = vpop.permute.xlu1 %191 }
  0x9a   :  { %v315_v40 = vadd.f32 %v291_v36, %v172_v35  ;;  %v167_v35 = vadd.f32 %v152_v59, %v47_v56  ;;  %v202_v33 = vsel %vm149_vm0, %v610_v39, %v598_v16 }
  0x9b   :  { %v612_v41 = vpop.permute.xlu0 %189 }
  0x9c   :  { %371 = vst.msk [vmem:[%s742_s2 + $0x38] sm:$0xff] %vm370_vm1, %v315_v40  ;;  %v201_v2 = vsel %vm149_vm0, %v612_v41, %v610_v39 }
  0xa1   :  { %v277_v48 = vpop.permute.xlu1 %276  ;;  %v329_v22 = vpop.permute.xlu2 %328 }
  0xa2   :  { %v293_v52 = vsel %vm292_vm2, %v277_v48, %v279_v21  ;;  %v169_v48 = vadd.f32 %v592_v7, %v49_v44 }
  0xa3   :  { %v626_v53 = vpop.permute.xlu0 %195  ;;  %v308_v54 = vadd.f32 %v293_v52, %v165_v47  ;;  %v156_v47 = vsel %vm149_vm0, %v146_v24, %v148_v23 }
  0xa4   :  { %v171_v49 = vadd.f32 %v156_v47, %v51_v45 }
  0xa5   :  { %363 = vst [vmem:[%s742_s2] sm:$0xff] %v308_v54  ;;  %v61_v54 = vmul.f32 -0.33267054, %v444_v9 }
  0xa7   :  { %v69_v9 = vadd.f32 %v61_v54, %v53_v55 }
  0xa9   :  { %v283_v34 = vpop.permute.xlu1 %282 }
  0xaa   :  { %v296_v19 = vsel %vm292_vm2, %v283_v34, %v602_v27 }
  0xab   :  { %v281_v12 = vpop.permute.xlu0 %280  ;;  %v311_v20 = vadd.f32 %v296_v19, %v168_v63  ;;  %v65_v63 = vmul.f32 -0.33267054, %v420_v1  ;;  %v335_v19 = vpop.permute.xlu2 %334 }
  0xac   :  { %v294_v38 = vsel %vm292_vm2, %v279_v21, %v281_v12  ;;  %v295_v40 = vsel %vm292_vm2, %v281_v12, %v283_v34  ;;  %v155_v21 = vsel %vm149_vm0, %v588_v4, %v146_v24  ;;  %v64_v34 = vmul.f32 -0.33267054, %v466_v17 }
  0xad   :  { %v309_v42 = vadd.f32 %v294_v38, %v166_v37  ;;  %v310_v43 = vadd.f32 %v295_v40, %v167_v35  ;;  %366 = vst [vmem:[%s742_s2 + $0x18] sm:$0xff] %v311_v20  ;;  %v170_v23 = vadd.f32 %v155_v21, %v50_v46  ;;  %v73_v3 = vadd.f32 %v65_v63, %v57_v62 }
  0xae   :  { %v72_v1 = vadd.f32 %v64_v34, %v56_v26  ;;  %v200_v17 = vsel %vm149_vm0, %v596_v11, %v612_v41  ;;  %v60_v12 = vmul.f32 0.035226293, %v490_v30  ;;  %v68_v20 = vmul.f32 -0.33267054, %v495_v31 }
  0xaf   :  { %364 = vst [vmem:[%s742_s2 + $0x8] sm:$0xff] %v309_v42  ;;  %v58_v38 = vmul.f32 0.035226293, %v449_v10  ;;  %v66_v40 = vmul.f32 -0.33267054, %v456_v14  ;;  %v216_v42 = vadd.f32 %v201_v2, %v73_v3 }
  0xb0   :  { %365 = vst [vmem:[%s742_s2 + $0x10] sm:$0xff] %v310_v43  ;;  %v59_v43 = vmul.f32 0.035226293, %v500_v32  ;;  %v215_v46 = vadd.f32 %v200_v17, %v72_v1  ;;  %v76_v21 = vadd.f32 %v68_v20, %v60_v12 }
  0xb1   :  { %v289_v52 = vpop.permute.xlu1 %288  ;;  %v74_v14 = vadd.f32 %v66_v40, %v58_v38 }
  0xb2   :  { %v299_v56 = vsel %vm292_vm2, %v289_v52, %v291_v36  ;;  %v63_v36 = vmul.f32 -0.33267054, %v432_v5  ;;  %v75_v32 = vadd.f32 %v67_v28, %v59_v43  ;;  %v219_v50 = vadd.f32 %v626_v53, %v76_v21 }
  0xb3   :  { %v287_v4 = vpop.permute.xlu0 %286  ;;  %v314_v24 = vadd.f32 %v299_v56, %v171_v49  ;;  %v203_v49 = vsel %vm149_vm0, %v598_v16, %v626_v53 }
  0xb4   :  { %v297_v57 = vsel %vm292_vm2, %v602_v27, %v287_v4  ;;  %v298_v7 = vsel %vm292_vm2, %v287_v4, %v289_v52  ;;  %v197_v27 = vsel %vm149_vm0, %v594_v8, %v606_v29  ;;  %v71_v0 = vadd.f32 %v63_v36, %v55_v60 }
  0xb5   :  { %v312_v58 = vadd.f32 %v297_v57, %v169_v48  ;;  %v313_v59 = vadd.f32 %v298_v7, %v170_v23  ;;  %369 = vst [vmem:[%s742_s2 + $0x30] sm:$0xff] %v314_v24  ;;  %v212_v25 = vadd.f32 %v197_v27, %v69_v9  ;;  %v217_v52 = vadd.f32 %v202_v33, %v74_v14 }
  0xb6   :  { %v214_v45 = vadd.f32 %v199_v15, %v71_v0  ;;  %v218_v23 = vadd.f32 %v203_v49, %v75_v32 }
  0xb7   :  { %367 = vst [vmem:[%s742_s2 + $0x20] sm:$0xff] %v312_v58 }
  0xb8   :  { %368 = vst [vmem:[%s742_s2 + $0x28] sm:$0xff] %v313_v59 }
  0xb9   :  { %v327_v13 = vpop.permute.xlu1 %326 }
  0xba   :  { %v341_v8 = vsel %vm292_vm2, %v327_v13, %v329_v22 }
  0xbb   :  { %v325_v29 = vpop.permute.xlu0 %324  ;;  %v356_v35 = vadd.f32 %v341_v8, %v213_v61 }
  0xbc   :  { %v340_v37 = vsel %vm292_vm2, %v325_v29, %v327_v13 }
  0xbd   :  { %v355_v5 = vadd.f32 %v340_v37, %v212_v25  ;;  %373 = vst [vmem:[%s743_s3 + $0x8] sm:$0xff] %v356_v35 }
  0xbf   :  { %372 = vst [vmem:[%s743_s3] sm:$0xff] %v355_v5 }
  0xc1   :  { %v333_v44 = vpop.permute.xlu1 %332 }
  0xc2   :  { %v344_v47 = vsel %vm292_vm2, %v333_v44, %v335_v19 }
  0xc3   :  { %v331_v11 = vpop.permute.xlu0 %330  ;;  %v359_v41 = vadd.f32 %v344_v47, %v216_v42 }
  0xc4   :  { %v342_v30 = vsel %vm292_vm2, %v329_v22, %v331_v11  ;;  %v343_v31 = vsel %vm292_vm2, %v331_v11, %v333_v44 }
  0xc5   :  { %v357_v10 = vadd.f32 %v342_v30, %v214_v45  ;;  %v358_v48 = vadd.f32 %v343_v31, %v215_v46  ;;  %376 = vst [vmem:[%s743_s3 + $0x20] sm:$0xff] %v359_v41 }
  0xc7   :  { %374 = vst [vmem:[%s743_s3 + $0x10] sm:$0xff] %v357_v10 }
  0xc8   :  { %375 = vst [vmem:[%s743_s3 + $0x18] sm:$0xff] %v358_v48 }
  0xc9   :  { %v339_v51 = vpop.permute.xlu1 %338 }
  0xca   :  { %v362_v54 = vadd.f32 %v339_v51, %v219_v50 }
  0xcb   :  { %v337_v55 = vpop.permute.xlu0 %336 }
  0xcc   :  { %v345_v56 = vsel %vm292_vm2, %v335_v19, %v337_v55  ;;  %v346_v4 = vsel %vm292_vm2, %v337_v55, %v339_v51  ;;  %379 = vst.msk [vmem:[%s743_s3 + $0x38] sm:$0xff] %vm370_vm1, %v362_v54 }
  0xcd   :  { %v360_v16 = vadd.f32 %v345_v56, %v217_v52  ;;  %v361_v39 = vadd.f32 %v346_v4, %v218_v23 }
  0xcf   :  { %377 = vst [vmem:[%s743_s3 + $0x28] sm:$0xff] %v360_v16 }
  0xd0   :  { %378 = vst [vmem:[%s743_s3 + $0x30] sm:$0xff] %v361_v39 }

// kernel: idwt_layer.4
= control target key start
LH: loop header
LB: loop body
LE: loop exit
PB: predicated region body
PF: predicated region fallthrough
CT: control target
= control target key end

     0   :  { %s761_s7 = smov 127   ;;  %s762_s24 = smov 126   ;;  %vm285_vm0 = vcmask 1039360   ;;  %vm572_vm1 = vcmask 1031168   ;;  %vm730_vm2 = vcmask 662528   ;;  %s1505_s0 = inlined_call_operand.vmem [shape: f32[8,2003], index: 0, kind: input, shape index: {}]   ;;  %s1506_s1 = inlined_call_operand.vmem [shape: f32[8,2003], index: 1, kind: input, shape index: {}]   ;;  %s1507_s2 = inlined_call_operand.vmem [shape: f32[8,2001], index: 2, kind: output, shape index: {0}]   ;;  %s1508_s3 = inlined_call_operand.vmem [shape: f32[8,2001], index: 3, kind: output, shape index: {1}]  }
   0x1   :  { %v786_v0 = vld [vmem:[%s1505_s0 + $0x20] sm:$0xff]  ;;  %v796_v2 = vld [vmem:[%s1505_s0 + $0x10] sm:$0xff]  ;;  %v820_v10 = vld [vmem:[%s1505_s0 + $0x28] sm:$0xff] }
   0x2   :  { %v791_v1 = vld [vmem:[%s1506_s1 + $0x20] sm:$0xff]  ;;  %1519 = vst [vmem:[#allocation2_spill] sm:$0xff] %v796_v2  ;;  %v145_v3 = vmul.f32 0.4598775, %v786_v0  ;;  %v803_v5 = vld [vmem:[%s1506_s1 + $0x10] sm:$0xff]  ;;  %v827_v14 = vld [vmem:[%s1506_s1 + $0x28] sm:$0xff] }
   0x3   :  { %v161_v4 = vmul.f32 -0.13501102, %v791_v1  ;;  %1520 = vst [vmem:[#allocation3_spill] sm:$0xff] %v803_v5  ;;  %v808_v6 = vld [vmem:[%s1505_s0] sm:$0xff]  ;;  %v143_v7 = vmul.f32 0.4598775, %v796_v2 }
   0x4   :  { %1521 = vst [vmem:[#allocation4_spill] sm:$0xff] %v808_v6  ;;  %v159_v8 = vmul.f32 -0.13501102, %v803_v5  ;;  %v815_v9 = vld [vmem:[%s1506_s1] sm:$0xff]  ;;  %v141_v12 = vmul.f32 0.4598775, %v808_v6 }
   0x5   :  { %1522 = vst [vmem:[#allocation5_spill] sm:$0xff] %v820_v10  ;;  %v177_v11 = vadd.f32 %v161_v4, %v145_v3  ;;  %v157_v13 = vmul.f32 -0.13501102, %v815_v9  ;;  %v832_v15 = vld [vmem:[%s1505_s0 + $0x18] sm:$0xff]  ;;  %v842_v18 = vld [vmem:[%s1505_s0 + $0x8] sm:$0xff]  ;;  %v861_v29 = vld [vmem:[%s1505_s0 + $0x40] sm:$0xff] }
   0x6   :  { %1523 = vst [vmem:[#allocation6_spill] sm:$0xff] %v827_v14  ;;  %v175_v16 = vadd.f32 %v159_v8, %v143_v7  ;;  %v837_v17 = vld [vmem:[%s1506_s1 + $0x18] sm:$0xff]  ;;  %v146_v20 = vmul.f32 0.4598775, %v820_v10  ;;  %v162_v21 = vmul.f32 -0.13501102, %v827_v14 }
   0x7   :  { %1524 = vst [vmem:[#allocation7_spill] sm:$0xff] %v842_v18  ;;  %261 = vrot.lane.b32.xlu2 %v177_v11, %s761_s7  ;;  %v173_v19 = vadd.f32 %v157_v13, %v141_v12  ;;  %v850_v22 = vld [vmem:[%s1506_s1 + $0x8] sm:$0xff]  ;;  %v144_v23 = vmul.f32 0.4598775, %v832_v15  ;;  %v160_v24 = vmul.f32 -0.13501102, %v837_v17 }
   0x8   :  { %1525 = vst [vmem:[#allocation8_spill] sm:$0xff] %v850_v22  ;;  %257 = vrot.lane.b32.xlu1 %v175_v16, %s761_s7  ;;  %v142_v25 = vmul.f32 0.4598775, %v842_v18  ;;  %v158_v26 = vmul.f32 -0.13501102, %v850_v22  ;;  %v178_v27 = vadd.f32 %v162_v21, %v146_v20  ;;  %v866_v30 = vld [vmem:[%s1506_s1 + $0x40] sm:$0xff] }
   0x9   :  { %253 = vrot.lane.b32.xlu0 %v173_v19, %s761_s7  ;;  %v176_v28 = vadd.f32 %v160_v24, %v144_v23  ;;  %v871_v32 = vld [vmem:[%s1505_s0 + $0x38] sm:$0xff]  ;;  %v881_v34 = vld [vmem:[%s1505_s0 + $0x30] sm:$0xff]  ;;  %v149_v36 = vmul.f32 0.4598775, %v861_v29  ;;  %v165_v37 = vmul.f32 -0.13501102, %v866_v30 }
   0xa   :  { %v174_v31 = vadd.f32 %v158_v26, %v142_v25  ;;  %v876_v33 = vld [vmem:[%s1506_s1 + $0x38] sm:$0xff]  ;;  %v886_v35 = vld [vmem:[%s1506_s1 + $0x30] sm:$0xff]  ;;  %v148_v38 = vmul.f32 0.4598775, %v871_v32  ;;  %v147_v40 = vmul.f32 0.4598775, %v881_v34 }
   0xb   :  { %v164_v39 = vmul.f32 -0.13501102, %v876_v33  ;;  %v163_v41 = vmul.f32 -0.13501102, %v886_v35  ;;  %v181_v42 = vadd.f32 %v165_v37, %v149_v36  ;;  %v900_v44 = vld [vmem:[%s1505_s0 + $0x58] sm:$0xff]  ;;  %v910_v47 = vld [vmem:[%s1505_s0 + $0x50] sm:$0xff] }
   0xc   :  { %v905_v45 = vld [vmem:[%s1506_s1 + $0x58] sm:$0xff]  ;;  %v915_v48 = vld [vmem:[%s1506_s1 + $0x50] sm:$0xff]  ;;  %v920_v49 = vld [vmem:[%s1505_s0 + $0x48] sm:$0xff]  ;;  %v152_v51 = vmul.f32 0.4598775, %v900_v44 }
   0xd   :  { %v180_v43 = vadd.f32 %v164_v39, %v148_v38  ;;  %v179_v46 = vadd.f32 %v163_v41, %v147_v40  ;;  %v925_v50 = vld [vmem:[%s1506_s1 + $0x48] sm:$0xff]  ;;  %v168_v52 = vmul.f32 -0.13501102, %v905_v45  ;;  %v151_v53 = vmul.f32 0.4598775, %v910_v47  ;;  %v939_v59 = vld [vmem:[%s1505_s0 + $0x70] sm:$0xff] }
   0xe   :  { %v167_v54 = vmul.f32 -0.13501102, %v915_v48  ;;  %v150_v55 = vmul.f32 0.4598775, %v920_v49  ;;  %v166_v56 = vmul.f32 -0.13501102, %v925_v50 }
   0xf   :  { %263 = vrot.lane.b32.xlu2 %v178_v27, %s761_s7  ;;  %v184_v57 = vadd.f32 %v168_v52, %v152_v51  ;;  %v944_v60 = vld [vmem:[%s1506_s1 + $0x70] sm:$0xff]  ;;  %v949_v62 = vld [vmem:[%s1505_s0 + $0x68] sm:$0xff]  ;;  %v959_v3 = vld [vmem:[%s1505_s0 + $0x60] sm:$0xff]  ;;  %v155_v7 = vmul.f32 0.4598775, %v939_v59 }
  0x10   :  { %259 = vrot.lane.b32.xlu1 %v176_v28, %s761_s7  ;;  %v183_v58 = vadd.f32 %v167_v54, %v151_v53  ;;  %v182_v61 = vadd.f32 %v166_v56, %v150_v55  ;;  %v954_v63 = vld [vmem:[%s1506_s1 + $0x68] sm:$0xff]  ;;  %v964_v4 = vld [vmem:[%s1506_s1 + $0x60] sm:$0xff]  ;;  %v171_v8 = vmul.f32 -0.13501102, %v944_v60  ;;  %v154_v11 = vmul.f32 0.4598775, %v949_v62 }
  0x11   :  { %255 = vrot.lane.b32.xlu0 %v174_v31, %s761_s7  ;;  %v170_v12 = vmul.f32 -0.13501102, %v954_v63  ;;  %v153_v13 = vmul.f32 0.4598775, %v959_v3  ;;  %v169_v16 = vmul.f32 -0.13501102, %v964_v4 }
  0x12   :  { %v187_v19 = vadd.f32 %v171_v8, %v155_v7  ;;  %v978_v23 = vld [vmem:[%s1505_s0 + $0x78] sm:$0xff]  ;;  %v190_v25 = vmul.f32 -0.13501102, %v842_v18  ;;  %v206_v26 = vmul.f32 -0.4598775, %v850_v22 }
  0x13   :  { %v186_v20 = vadd.f32 %v170_v12, %v154_v11  ;;  %v185_v21 = vadd.f32 %v169_v16, %v153_v13  ;;  %1526 = vst [vmem:[#allocation9_spill] sm:$0xff] %v978_v23  ;;  %v983_v24 = vld [vmem:[%s1506_s1 + $0x78] sm:$0xff]  ;;  %v189_v27 = vmul.f32 -0.13501102, %v808_v6  ;;  %v205_v28 = vmul.f32 -0.4598775, %v815_v9 }
  0x14   :  { %1527 = vst [vmem:[#allocation10_spill] sm:$0xff] %v983_v24  ;;  %v156_v31 = vmul.f32 0.4598775, %v978_v23  ;;  %v172_v36 = vmul.f32 -0.13501102, %v983_v24  ;;  %v222_v37 = vadd.f32 %v206_v26, %v190_v25 }
  0x15   :  { %v221_v38 = vadd.f32 %v205_v28, %v189_v27  ;;  %v193_v40 = vmul.f32 -0.13501102, %v786_v0  ;;  %v209_v41 = vmul.f32 -0.4598775, %v791_v1  ;;  %v207_v51 = vmul.f32 -0.4598775, %v803_v5 }
  0x16   :  { %v188_v39 = vadd.f32 %v172_v36, %v156_v31  ;;  %v196_v55 = vmul.f32 -0.13501102, %v871_v32  ;;  %v212_v56 = vmul.f32 -0.4598775, %v876_v33  ;;  %v210_v7 = vmul.f32 -0.4598775, %v827_v14 }
  0x17   :  { %269 = vrot.lane.b32.xlu2 %v181_v42, %s761_s7  ;;  %v192_v42 = vmul.f32 -0.13501102, %v832_v15  ;;  %v225_v52 = vadd.f32 %v209_v41, %v193_v40  ;;  %v199_v13 = vmul.f32 -0.13501102, %v910_v47  ;;  %v215_v16 = vmul.f32 -0.4598775, %v915_v48 }
  0x18   :  { %267 = vrot.lane.b32.xlu1 %v180_v43, %s761_s7  ;;  %v208_v43 = vmul.f32 -0.4598775, %v837_v17  ;;  %v228_v8 = vadd.f32 %v212_v56, %v196_v55  ;;  %v213_v25 = vmul.f32 -0.4598775, %v866_v30  ;;  %v202_v31 = vmul.f32 -0.13501102, %v949_v62 }
  0x19   :  { %265 = vrot.lane.b32.xlu0 %v179_v46, %s761_s7  ;;  %v191_v46 = vmul.f32 -0.13501102, %v796_v2  ;;  %v231_v26 = vadd.f32 %v215_v16, %v199_v13  ;;  %v218_v36 = vmul.f32 -0.4598775, %v954_v63  ;;  %v216_v40 = vmul.f32 -0.4598775, %v905_v45 }
  0x1a   :  { %v224_v53 = vadd.f32 %v208_v43, %v192_v42  ;;  %v219_v55 = vmul.f32 -0.4598775, %v944_v60  ;;  %v445_v13 = vmul.f32 0.035226293, %v850_v22 }
  0x1b   :  { %v223_v54 = vadd.f32 %v207_v51, %v191_v46  ;;  %v234_v41 = vadd.f32 %v218_v36, %v202_v31  ;;  %v428_v46 = vmul.f32 0.33267054, %v808_v6  ;;  %v444_v51 = vmul.f32 0.035226293, %v815_v9 }
  0x1c   :  { %v432_v31 = vmul.f32 0.33267054, %v786_v0  ;;  %v448_v36 = vmul.f32 0.035226293, %v791_v1 }
  0x1d   :  { %v460_v56 = vadd.f32 %v444_v51, %v428_v46  ;;  %v435_v51 = vmul.f32 0.33267054, %v871_v32 }
  0x1f   :  { %275 = vrot.lane.b32.xlu2 %v184_v57, %s761_s7  ;;  %v195_v57 = vmul.f32 -0.13501102, %v881_v34 }
  0x20   :  { %273 = vrot.lane.b32.xlu1 %v183_v58, %s761_s7  ;;  %v211_v58 = vmul.f32 -0.4598775, %v886_v35 }
  0x21   :  { %271 = vrot.lane.b32.xlu0 %v182_v61, %s761_s7  ;;  %v194_v61 = vmul.f32 -0.13501102, %v820_v10 }
  0x22   :  { %v227_v11 = vadd.f32 %v211_v58, %v195_v57 }
  0x23   :  { %v226_v12 = vadd.f32 %v210_v7, %v194_v61  ;;  %v431_v61 = vmul.f32 0.33267054, %v832_v15  ;;  %v447_v7 = vmul.f32 0.035226293, %v837_v17 }
  0x25   :  { %v463_v16 = vadd.f32 %v447_v7, %v431_v61  ;;  %v439_v61 = vmul.f32 0.33267054, %v900_v44  ;;  %v455_v7 = vmul.f32 0.035226293, %v905_v45 }
  0x27   :  { %281 = vrot.lane.b32.xlu2 %v187_v19, %s761_s7  ;;  %v198_v19 = vmul.f32 -0.13501102, %v920_v49 }
  0x28   :  { %279 = vrot.lane.b32.xlu1 %v186_v20, %s761_s7  ;;  %v214_v20 = vmul.f32 -0.4598775, %v925_v50 }
  0x29   :  { %277 = vrot.lane.b32.xlu0 %v185_v21, %s761_s7  ;;  %v197_v21 = vmul.f32 -0.13501102, %v861_v29 }
  0x2a   :  { %v230_v27 = vadd.f32 %v214_v20, %v198_v19 }
  0x2b   :  { %v229_v28 = vadd.f32 %v213_v25, %v197_v21  ;;  %v434_v21 = vmul.f32 0.33267054, %v881_v34  ;;  %v450_v25 = vmul.f32 0.035226293, %v886_v35 }
  0x2f   :  { %351 = vrot.lane.b32.xlu2 %v222_v37, %s761_s7  ;;  %v201_v37 = vmul.f32 -0.13501102, %v959_v3 }
  0x30   :  { %349 = vrot.lane.b32.xlu1 %v221_v38, %s761_s7  ;;  %v217_v38 = vmul.f32 -0.4598775, %v964_v4 }
  0x31   :  { %283 = vrot.lane.b32.xlu0 %v188_v39, %s761_s7  ;;  %v200_v39 = vmul.f32 -0.13501102, %v900_v44 }
  0x32   :  { %v233_v42 = vadd.f32 %v217_v38, %v201_v37  ;;  %v466_v37 = vadd.f32 %v450_v25, %v434_v21  ;;  %v459_v21 = vmul.f32 0.035226293, %v983_v24  ;;  %v442_v25 = vmul.f32 0.33267054, %v939_v59 }
  0x33   :  { %v232_v43 = vadd.f32 %v216_v40, %v200_v39  ;;  %v464_v39 = vadd.f32 %v448_v36, %v432_v31  ;;  %v437_v40 = vmul.f32 0.33267054, %v920_v49  ;;  %v441_v31 = vmul.f32 0.33267054, %v949_v62 }
  0x34   :  { %v457_v36 = vmul.f32 0.035226293, %v954_v63 }
  0x37   :  { %357 = vrot.lane.b32.xlu2 %v225_v52, %s761_s7  ;;  %v204_v52 = vmul.f32 -0.13501102, %v978_v23 }
  0x38   :  { %355 = vrot.lane.b32.xlu1 %v224_v53, %s761_s7  ;;  %v220_v53 = vmul.f32 -0.4598775, %v983_v24 }
  0x39   :  { %353 = vrot.lane.b32.xlu0 %v223_v54, %s761_s7  ;;  %v203_v54 = vmul.f32 -0.13501102, %v939_v59 }
  0x3a   :  { %v236_v57 = vadd.f32 %v220_v53, %v204_v52  ;;  %v451_v52 = vmul.f32 0.035226293, %v876_v33 }
  0x3b   :  { %v235_v58 = vadd.f32 %v219_v55, %v203_v54 }
  0x3f   :  { %363 = vrot.lane.b32.xlu2 %v228_v8, %s761_s7  ;;  %v430_v8 = vmul.f32 0.33267054, %v796_v2 }
  0x40   :  { %361 = vrot.lane.b32.xlu1 %v227_v11, %s761_s7  ;;  %v446_v11 = vmul.f32 0.035226293, %v803_v5 }
  0x41   :  { %359 = vrot.lane.b32.xlu0 %v226_v12, %s761_s7  ;;  %v429_v12 = vmul.f32 0.33267054, %v842_v18 }
  0x42   :  { %v462_v19 = vadd.f32 %v446_v11, %v430_v8  ;;  %v438_v11 = vmul.f32 0.33267054, %v910_v47 }
  0x43   :  { %v461_v20 = vadd.f32 %v445_v13, %v429_v12  ;;  %v454_v12 = vmul.f32 0.035226293, %v915_v48 }
  0x47   :  { %369 = vrot.lane.b32.xlu2 %v231_v26, %s761_s7  ;;  %v433_v26 = vmul.f32 0.33267054, %v820_v10 }
  0x48   :  { %367 = vrot.lane.b32.xlu1 %v230_v27, %s761_s7  ;;  %v449_v27 = vmul.f32 0.035226293, %v827_v14 }
  0x49   :  { %365 = vrot.lane.b32.xlu0 %v229_v28, %s761_s7 }
  0x4a   :  { %v465_v38 = vadd.f32 %v449_v27, %v433_v26  ;;  %v458_v26 = vmul.f32 0.035226293, %v944_v60 }
  0x4f   :  { %375 = vrot.lane.b32.xlu2 %v234_v41, %s761_s7  ;;  %v453_v41 = vmul.f32 0.035226293, %v925_v50 }
  0x50   :  { %373 = vrot.lane.b32.xlu1 %v233_v42, %s761_s7  ;;  %v436_v42 = vmul.f32 0.33267054, %v861_v29 }
  0x51   :  { %371 = vrot.lane.b32.xlu0 %v232_v43, %s761_s7  ;;  %v452_v43 = vmul.f32 0.035226293, %v866_v30  ;;  %v469_v54 = vadd.f32 %v453_v41, %v437_v40  ;;  %v474_v40 = vadd.f32 %v458_v26, %v442_v25  ;;  %v473_v41 = vadd.f32 %v457_v36, %v441_v31 }
  0x52   :  { %v496_v25 = vmul.f32 0.08544128, %v791_v1  ;;  %v479_v31 = vmul.f32 0.8068915, %v832_v15  ;;  %v495_v36 = vmul.f32 0.08544128, %v837_v17 }
  0x53   :  { %v468_v55 = vadd.f32 %v452_v43, %v436_v42  ;;  %v478_v42 = vmul.f32 0.8068915, %v796_v2  ;;  %v494_v43 = vmul.f32 0.08544128, %v803_v5 }
  0x57   :  { %540 = vrot.lane.b32.xlu2 %v460_v56, %s762_s24  ;;  %v467_v56 = vadd.f32 %v451_v52, %v435_v51  ;;  %v477_v51 = vmul.f32 0.8068915, %v842_v18  ;;  %v493_v52 = vmul.f32 0.08544128, %v850_v22 }
  0x58   :  { %379 = vrot.lane.b32.xlu1 %v236_v57, %s761_s7  ;;  %v440_v57 = vmul.f32 0.33267054, %v959_v3 }
  0x59   :  { %377 = vrot.lane.b32.xlu0 %v235_v58, %s761_s7  ;;  %v456_v58 = vmul.f32 0.035226293, %v964_v4 }
  0x5b   :  { %v472_v13 = vadd.f32 %v456_v58, %v440_v57 }
  0x5f   :  { %546 = vrot.lane.b32.xlu2 %v463_v16, %s762_s24  ;;  %v471_v16 = vadd.f32 %v455_v7, %v439_v61 }
  0x60   :  { %544 = vrot.lane.b32.xlu1 %v462_v19, %s762_s24  ;;  %v470_v19 = vadd.f32 %v454_v12, %v438_v11  ;;  %v510_v11 = vadd.f32 %v494_v43, %v478_v42 }
  0x61   :  { %542 = vrot.lane.b32.xlu0 %v461_v20, %s762_s24  ;;  %v262_v28 = vpop.permute.xlu2 %261  ;;  %v443_v20 = vmul.f32 0.33267054, %v978_v23 }
  0x67   :  { %552 = vrot.lane.b32.xlu2 %v466_v37, %s762_s24 }
  0x68   :  { %550 = vrot.lane.b32.xlu1 %v465_v38, %s762_s24 }
  0x69   :  { %548 = vrot.lane.b32.xlu0 %v464_v39, %s762_s24  ;;  %v1064_v46 = vpop.permute.xlu2 %263  ;;  %v475_v39 = vadd.f32 %v459_v21, %v443_v20  ;;  %v481_v20 = vmul.f32 0.8068915, %v820_v10  ;;  %v497_v21 = vmul.f32 0.08544128, %v827_v14 }
  0x6a   :  { %v1070_v53 = vsel %vm285_vm0, %v262_v28, %v1064_v46 }
  0x6f   :  { %558 = vrot.lane.b32.xlu2 %v469_v54, %s762_s24 }
  0x70   :  { %556 = vrot.lane.b32.xlu1 %v468_v55, %s762_s24  ;;  %v476_v55 = vmul.f32 0.8068915, %v808_v6 }
  0x71   :  { %554 = vrot.lane.b32.xlu0 %v467_v56, %s762_s24  ;;  %v1079_v8 = vpop.permute.xlu2 %269  ;;  %v492_v56 = vmul.f32 0.08544128, %v815_v9 }
  0x77   :  { %564 = vrot.lane.b32.xlu2 %v472_v13, %s762_s24 }
  0x78   :  { %562 = vrot.lane.b32.xlu1 %v471_v16, %s762_s24  ;;  %v509_v16 = vadd.f32 %v493_v52, %v477_v51  ;;  %v511_v51 = vadd.f32 %v495_v36, %v479_v31  ;;  %v484_v52 = vmul.f32 0.8068915, %v861_v29 }
  0x79   :  { %560 = vrot.lane.b32.xlu0 %v470_v19, %s762_s24  ;;  %v1090_v27 = vpop.permute.xlu2 %275  ;;  %v508_v19 = vadd.f32 %v492_v56, %v476_v55  ;;  %v500_v55 = vmul.f32 0.08544128, %v866_v30  ;;  %v483_v56 = vmul.f32 0.8068915, %v871_v32 }
  0x7a   :  { %v258_v37 = vpop.permute.xlu1 %257 }
  0x7b   :  { %v254_v38 = vpop.permute.xlu0 %253 }
  0x7f   :  { %570 = vrot.lane.b32.xlu2 %v475_v39, %s762_s24 }
  0x80   :  { %568 = vrot.lane.b32.xlu1 %v474_v40, %s762_s24  ;;  %v513_v40 = vadd.f32 %v497_v21, %v481_v20  ;;  %v516_v21 = vadd.f32 %v500_v55, %v484_v52  ;;  %v501_v52 = vmul.f32 0.08544128, %v925_v50 }
  0x81   :  { %566 = vrot.lane.b32.xlu0 %v473_v41, %s762_s24  ;;  %v1101_v54 = vpop.permute.xlu2 %281 }
  0x82   :  { %v260_v57 = vpop.permute.xlu1 %259 }
  0x83   :  { %v1106_v58 = vsel %vm285_vm0, %v258_v37, %v260_v57  ;;  %v1109_v61 = vsel %vm285_vm0, %v260_v57, %v262_v28  ;;  %v256_v7 = vpop.permute.xlu0 %255  ;;  %v480_v28 = vmul.f32 0.8068915, %v786_v0  ;;  %v499_v57 = vmul.f32 0.08544128, %v876_v33 }
  0x84   :  { %v1112_v12 = vsel %vm285_vm0, %v254_v38, %v256_v7  ;;  %v1115_v13 = vsel %vm285_vm0, %v256_v7, %v258_v37  ;;  %v482_v7 = vmul.f32 0.8068915, %v881_v34 }
  0x85   :  { %v512_v43 = vadd.f32 %v496_v25, %v480_v28  ;;  %v515_v31 = vadd.f32 %v499_v57, %v483_v56 }
  0x87   :  { %640 = vrot.lane.b32.xlu2 %v510_v11, %s762_s24  ;;  %v498_v11 = vmul.f32 0.08544128, %v886_v35 }
  0x88   :  { %638 = vrot.lane.b32.xlu1 %v509_v16, %s762_s24 }
  0x89   :  { %636 = vrot.lane.b32.xlu0 %v508_v19, %s762_s24  ;;  %v1124_v26 = vpop.permute.xlu2 %351  ;;  %v514_v36 = vadd.f32 %v498_v11, %v482_v7 }
  0x8a   :  { %v268_v37 = vpop.permute.xlu1 %267 }
  0x8b   :  { %v1130_v38 = vsel %vm285_vm0, %v268_v37, %v1079_v8  ;;  %v266_v39 = vpop.permute.xlu0 %265 }
  0x8c   :  { %v1134_v41 = vsel %vm285_vm0, %v1064_v46, %v266_v39  ;;  %v1137_v42 = vsel %vm285_vm0, %v266_v39, %v268_v37  ;;  %v487_v37 = vmul.f32 0.8068915, %v900_v44  ;;  %v503_v39 = vmul.f32 0.08544128, %v905_v45 }
  0x8e   :  { %v519_v7 = vadd.f32 %v503_v39, %v487_v37  ;;  %v505_v37 = vmul.f32 0.08544128, %v954_v63  ;;  %v488_v39 = vmul.f32 0.8068915, %v959_v3 }
  0x8f   :  { %646 = vrot.lane.b32.xlu2 %v513_v40, %s762_s24  ;;  %v486_v40 = vmul.f32 0.8068915, %v910_v47 }
  0x90   :  { %644 = vrot.lane.b32.xlu1 %v512_v43, %s762_s24  ;;  %v502_v43 = vmul.f32 0.08544128, %v915_v48 }
  0x91   :  { %642 = vrot.lane.b32.xlu0 %v511_v51, %s762_s24  ;;  %v1146_v46 = vpop.permute.xlu2 %357  ;;  %v485_v51 = vmul.f32 0.8068915, %v920_v49 }
  0x92   :  { %v274_v16 = vpop.permute.xlu1 %273 }
  0x93   :  { %v1152_v19 = vsel %vm285_vm0, %v274_v16, %v1090_v27  ;;  %v272_v20 = vpop.permute.xlu0 %271 }
  0x94   :  { %v1156_v28 = vsel %vm285_vm0, %v1079_v8, %v272_v20  ;;  %v1159_v25 = vsel %vm285_vm0, %v272_v20, %v274_v16  ;;  %v518_v20 = vadd.f32 %v502_v43, %v486_v40  ;;  %v504_v40 = vmul.f32 0.08544128, %v964_v4 }
  0x97   :  { %652 = vrot.lane.b32.xlu2 %v516_v21, %s762_s24  ;;  %v517_v21 = vadd.f32 %v501_v52, %v485_v51 }
  0x98   :  { %650 = vrot.lane.b32.xlu1 %v515_v31, %s762_s24  ;;  %v490_v31 = vmul.f32 0.8068915, %v939_v59 }
  0x99   :  { %648 = vrot.lane.b32.xlu0 %v514_v36, %s762_s24  ;;  %v364_v8 = vpop.permute.xlu2 %363  ;;  %v506_v36 = vmul.f32 0.08544128, %v944_v60 }
  0x9a   :  { %v280_v55 = vpop.permute.xlu1 %279 }
  0x9b   :  { %v1172_v56 = vsel %vm285_vm0, %v280_v55, %v1101_v54  ;;  %v278_v57 = vpop.permute.xlu0 %277 }
  0x9c   :  { %1528 = vst [vmem:[#allocation11_spill] sm:$0xff] %v1172_v56  ;;  %v1176_v11 = vsel %vm285_vm0, %v1090_v27, %v278_v57  ;;  %v1179_v16 = vsel %vm285_vm0, %v278_v57, %v280_v55  ;;  %v489_v56 = vmul.f32 0.8068915, %v949_v62  ;;  %v522_v55 = vadd.f32 %v506_v36, %v490_v31 }
  0x9d   :  { %1529 = vst [vmem:[#allocation12_spill] sm:$0xff] %v1179_v16 }
  0x9f   :  { %658 = vrot.lane.b32.xlu2 %v519_v7, %s762_s24  ;;  %v521_v7 = vadd.f32 %v505_v37, %v489_v56 }
  0xa0   :  { %656 = vrot.lane.b32.xlu1 %v518_v20, %s762_s24  ;;  %v520_v20 = vadd.f32 %v504_v40, %v488_v39 }
  0xa1   :  { %654 = vrot.lane.b32.xlu0 %v517_v21, %s762_s24  ;;  %v370_v27 = vpop.permute.xlu2 %369 }
  0xa2   :  { %v350_v43 = vpop.permute.xlu1 %349 }
  0xa3   :  { %v1192_v51 = vsel %vm285_vm0, %v350_v43, %v1124_v26  ;;  %v1194_v52 = vpop.permute.xlu0 %283  ;;  %v491_v43 = vmul.f32 0.8068915, %v978_v23 }
  0xa4   :  { %1530 = vst [vmem:[#allocation13_spill] sm:$0xff] %v1192_v51  ;;  %v1199_v57 = vsel %vm285_vm0, %v1101_v54, %v1194_v52  ;;  %v507_v51 = vmul.f32 0.08544128, %v983_v24 }
  0xa6   :  { %v523_v37 = vadd.f32 %v507_v51, %v491_v43 }
  0xa7   :  { %664 = vrot.lane.b32.xlu2 %v522_v55, %s762_s24 }
  0xa8   :  { %662 = vrot.lane.b32.xlu1 %v521_v7, %s762_s24 }
  0xa9   :  { %660 = vrot.lane.b32.xlu0 %v520_v20, %s762_s24  ;;  %v376_v21 = vpop.permute.xlu2 %375 }
  0xaa   :  { %v356_v16 = vpop.permute.xlu1 %355 }
  0xab   :  { %v1208_v31 = vsel %vm285_vm0, %v356_v16, %v1146_v46  ;;  %v354_v54 = vpop.permute.xlu0 %353 }
  0xac   :  { %1531 = vst [vmem:[#allocation14_spill] sm:$0xff] %v1208_v31  ;;  %v1212_v56 = vsel %vm285_vm0, %v1124_v26, %v354_v54  ;;  %v1215_v36 = vsel %vm285_vm0, %v354_v54, %v356_v16 }
  0xad   :  { %1532 = vst [vmem:[#allocation15_spill] sm:$0xff] %v1212_v56  ;;  %v76_v56 = vmul.f32 0.8068915, %v983_v24 }
  0xae   :  { %1533 = vst [vmem:[#allocation16_spill] sm:$0xff] %v1215_v36 }
  0xb1   :  { %666 = vrot.lane.b32.xlu0 %v523_v37, %s762_s24  ;;  %v541_v39 = vpop.permute.xlu2 %540 }
  0xb2   :  { %v362_v40 = vpop.permute.xlu1 %361 }
  0xb3   :  { %v1219_v55 = vsel %vm285_vm0, %v362_v40, %v364_v8  ;;  %v360_v7 = vpop.permute.xlu0 %359 }
  0xb4   :  { %1534 = vst [vmem:[#allocation17_spill] sm:$0xff] %v1219_v55  ;;  %v1223_v20 = vsel %vm285_vm0, %v1146_v46, %v360_v7  ;;  %v1226_v31 = vsel %vm285_vm0, %v360_v7, %v362_v40 }
  0xb5   :  { %1535 = vst [vmem:[#allocation18_spill] sm:$0xff] %v1223_v20 }
  0xb6   :  { %1536 = vst [vmem:[#allocation19_spill] sm:$0xff] %v1226_v31 }
  0xb9   :  { %v1228_v26 = vpop.permute.xlu2 %546 }
  0xba   :  { %v368_v16 = vpop.permute.xlu1 %367 }
  0xbb   :  { %v1231_v51 = vsel %vm285_vm0, %v368_v16, %v370_v27  ;;  %v366_v43 = vpop.permute.xlu0 %365 }
  0xbc   :  { %1537 = vst [vmem:[#allocation20_spill] sm:$0xff] %v1231_v51  ;;  %v1234_v54 = vsel %vm285_vm0, %v364_v8, %v366_v43  ;;  %v1237_v37 = vsel %vm285_vm0, %v366_v43, %v368_v16  ;;  %v63_v8 = vmul.f32 0.8068915, %v803_v5  ;;  %v47_v16 = vmul.f32 -0.08544128, %v796_v2 }
  0xbd   :  { %1538 = vst [vmem:[#allocation21_spill] sm:$0xff] %v1234_v54  ;;  %v46_v43 = vmul.f32 -0.08544128, %v842_v18  ;;  %v61_v54 = vmul.f32 0.8068915, %v815_v9 }
  0xbe   :  { %1539 = vst [vmem:[#allocation22_spill] sm:$0xff] %v1237_v37  ;;  %v60_v2 = vmul.f32 -0.08544128, %v978_v23 }
  0xc1   :  { %v1239_v55 = vpop.permute.xlu2 %552 }
  0xc2   :  { %v374_v46 = vpop.permute.xlu1 %373 }
  0xc3   :  { %v1242_v36 = vsel %vm285_vm0, %v374_v46, %v376_v21  ;;  %v372_v40 = vpop.permute.xlu0 %371 }
  0xc4   :  { %1540 = vst [vmem:[#allocation23_spill] sm:$0xff] %v1242_v36  ;;  %v1245_v7 = vsel %vm285_vm0, %v370_v27, %v372_v40  ;;  %v1248_v31 = vsel %vm285_vm0, %v372_v40, %v374_v46  ;;  %v62_v36 = vmul.f32 0.8068915, %v850_v22  ;;  %v45_v27 = vmul.f32 -0.08544128, %v808_v6 }
  0xc5   :  { %1541 = vst [vmem:[#allocation24_spill] sm:$0xff] %v1245_v7  ;;  %v65_v22 = vmul.f32 0.8068915, %v791_v1  ;;  %v49_v6 = vmul.f32 -0.08544128, %v786_v0 }
  0xc6   :  { %1542 = vst [vmem:[#allocation25_spill] sm:$0xff] %v1248_v31  ;;  %v79_v31 = vadd.f32 %v63_v8, %v47_v16  ;;  %v78_v20 = vadd.f32 %v62_v36, %v46_v43  ;;  %v77_v5 = vadd.f32 %v61_v54, %v45_v27  ;;  %v66_v36 = vmul.f32 0.8068915, %v827_v14 }
  0xc7   :  { %v64_v8 = vmul.f32 0.8068915, %v837_v17 }
  0xc8   :  { %v317_v16 = vadd.f32 %v1112_v12, %v77_v5  ;;  %v318_v43 = vadd.f32 %v1115_v13, %v78_v20  ;;  %v81_v5 = vadd.f32 %v65_v22, %v49_v6  ;;  %v53_v22 = vmul.f32 -0.08544128, %v861_v29 }
  0xc9   :  { %v1250_v51 = vpop.permute.xlu2 %558 }
  0xca   :  { %v1255_v37 = vpop.permute.xlu1 %379 }
  0xcb   :  { %1543 = vst [vmem:[#allocation26_spill] sm:$0xff] %v1255_v37  ;;  %v378_v7 = vpop.permute.xlu0 %377 }
  0xcc   :  { %v1261_v46 = vsel %vm285_vm0, %v376_v21, %v378_v7  ;;  %v1265_v40 = vsel %vm285_vm0, %v378_v7, %v1255_v37  ;;  %v48_v21 = vmul.f32 -0.08544128, %v832_v15  ;;  %v50_v7 = vmul.f32 -0.08544128, %v820_v10 }
  0xcd   :  { %1544 = vst [vmem:[#allocation27_spill] sm:$0xff] %v1261_v46  ;;  %v319_v46 = vadd.f32 %v1106_v58, %v79_v31  ;;  %v92_v37 = vadd.f32 %v76_v56, %v60_v2  ;;  %v52_v2 = vmul.f32 -0.08544128, %v871_v32  ;;  %v51_v56 = vmul.f32 -0.08544128, %v881_v34 }
  0xce   :  { %1545 = vst [vmem:[#allocation28_spill] sm:$0xff] %v1265_v40  ;;  %v82_v14 = vadd.f32 %v66_v36, %v50_v7  ;;  %v80_v12 = vadd.f32 %v64_v8, %v48_v21 }
  0xcf   :  { %v332_v13 = vadd.f32 %v1194_v52, %v92_v37  ;;  %v321_v37 = vadd.f32 %v1070_v53, %v81_v5 }
  0xd0   :  { %v322_v6 = vadd.f32 %v1134_v41, %v82_v14 }
  0xd1   :  { %v1271_v18 = vpop.permute.xlu2 %564 }
  0xd2   :  { %v545_v54 = vpop.permute.xlu1 %544 }
  0xd3   :  { %v575_v27 = vsel %vm572_vm1, %v545_v54, %v1228_v26  ;;  %v543_v40 = vpop.permute.xlu0 %542 }
  0xd4   :  { %v606_v24 = vadd.f32 %v575_v27, %v319_v46  ;;  %v573_v23 = vsel %vm572_vm1, %v541_v39, %v543_v40  ;;  %v574_v58 = vsel %vm572_vm1, %v543_v40, %v545_v54  ;;  %v69_v39 = vmul.f32 0.8068915, %v866_v30 }
  0xd5   :  { %v604_v31 = vadd.f32 %v573_v23, %v317_v16  ;;  %v605_v10 = vadd.f32 %v574_v58, %v318_v43  ;;  %v68_v23 = vmul.f32 0.8068915, %v876_v33  ;;  %v67_v46 = vmul.f32 0.8068915, %v886_v35 }
  0xd6   :  { %717 = vst [vmem:[%s1507_s2 + $0x10] sm:$0xff] %v606_v24  ;;  %v71_v16 = vmul.f32 0.8068915, %v915_v48  ;;  %v54_v43 = vmul.f32 -0.08544128, %v920_v49 }
  0xd7   :  { %715 = vst [vmem:[%s1507_s2] sm:$0xff] %v604_v31  ;;  %v84_v54 = vadd.f32 %v68_v23, %v52_v2  ;;  %v83_v8 = vadd.f32 %v67_v46, %v51_v56  ;;  %v56_v58 = vmul.f32 -0.08544128, %v900_v44  ;;  %v72_v31 = vmul.f32 0.8068915, %v905_v45 }
  0xd8   :  { %716 = vst [vmem:[%s1507_s2 + $0x8] sm:$0xff] %v605_v10  ;;  %v320_v10 = vadd.f32 %v1109_v61, %v80_v12  ;;  %v85_v61 = vadd.f32 %v69_v39, %v53_v22  ;;  %v59_v46 = vmul.f32 -0.08544128, %v939_v59 }
  0xd9   :  { %v1297_v24 = vpop.permute.xlu2 %570  ;;  %v324_v12 = vadd.f32 %v1130_v38, %v84_v54  ;;  %v323_v2 = vadd.f32 %v1137_v42, %v83_v8  ;;  %v88_v45 = vadd.f32 %v72_v31, %v56_v58  ;;  %v1547_v58 = vld [vmem:[#allocation8_spill] sm:$0xff] }
  0xda   :  { %v619_v20 = vadd.f32 %v1297_v24, %v332_v13  ;;  %v551_v52 = vpop.permute.xlu1 %550  ;;  %v325_v27 = vadd.f32 %v1156_v28, %v85_v61  ;;  %v70_v13 = vmul.f32 0.8068915, %v925_v50  ;;  %v110_v31 = vmul.f32 -0.33267054, %v1547_v58 }
  0xdb   :  { %v578_v40 = vsel %vm572_vm1, %v551_v52, %v1239_v55  ;;  %v549_v21 = vpop.permute.xlu0 %548 }
  0xdc   :  { %731 = vst.msk [vmem:[%s1507_s2 + $0x78] sm:$0xff] %vm730_vm2, %v619_v20  ;;  %v609_v14 = vadd.f32 %v578_v40, %v322_v6  ;;  %v576_v41 = vsel %vm572_vm1, %v1228_v26, %v549_v21  ;;  %v577_v7 = vsel %vm572_vm1, %v549_v21, %v551_v52  ;;  %v55_v26 = vmul.f32 -0.08544128, %v910_v47 }
  0xdd   :  { %v607_v53 = vadd.f32 %v576_v41, %v320_v10  ;;  %v608_v36 = vadd.f32 %v577_v7, %v321_v37  ;;  %v86_v42 = vadd.f32 %v70_v13, %v54_v43  ;;  %v74_v52 = vmul.f32 0.8068915, %v954_v63  ;;  %v1546_v43 = vld [vmem:[#allocation7_spill] sm:$0xff]  ;;  %v1549_v13 = vld [vmem:[#allocation12_spill] sm:$0xff] }
  0xde   :  { %720 = vst [vmem:[%s1507_s2 + $0x28] sm:$0xff] %v609_v14  ;;  %v87_v38 = vadd.f32 %v71_v16, %v55_v26  ;;  %v57_v37 = vmul.f32 -0.08544128, %v959_v3  ;;  %v328_v10 = vadd.f32 %v1176_v11, %v88_v45  ;;  %v75_v40 = vmul.f32 0.8068915, %v944_v60 }
  0xdf   :  { %718 = vst [vmem:[%s1507_s2 + $0x18] sm:$0xff] %v607_v53  ;;  %v326_v41 = vadd.f32 %v1159_v25, %v86_v42  ;;  %v73_v7 = vmul.f32 0.8068915, %v964_v4  ;;  %v109_v26 = vmul.f32 -0.33267054, %v815_v9 }
  0xe0   :  { %719 = vst [vmem:[%s1507_s2 + $0x20] sm:$0xff] %v608_v36  ;;  %v327_v14 = vadd.f32 %v1152_v19, %v87_v38  ;;  %v91_v60 = vadd.f32 %v75_v40, %v59_v46 }
  0xe1   :  { %v89_v25 = vadd.f32 %v73_v7, %v57_v37  ;;  %v97_v37 = vmul.f32 0.035226293, %v786_v0 }
  0xe2   :  { %v557_v5 = vpop.permute.xlu1 %556  ;;  %v331_v16 = vadd.f32 %v1199_v57, %v91_v60  ;;  %v115_v60 = vmul.f32 -0.33267054, %v886_v35 }
  0xe3   :  { %v581_v23 = vsel %vm572_vm1, %v557_v5, %v1250_v51  ;;  %v555_v56 = vpop.permute.xlu0 %554 }
  0xe4   :  { %v612_v6 = vadd.f32 %v581_v23, %v325_v27  ;;  %v579_v22 = vsel %vm572_vm1, %v1239_v55, %v555_v56  ;;  %v580_v28 = vsel %vm572_vm1, %v555_v56, %v557_v5  ;;  %v58_v55 = vmul.f32 -0.08544128, %v949_v62  ;;  %v1550_v56 = vld [vmem:[#allocation4_spill] sm:$0xff] }
  0xe5   :  { %v610_v39 = vadd.f32 %v579_v22, %v323_v2  ;;  %v611_v20 = vadd.f32 %v580_v28, %v324_v12  ;;  %v94_v27 = vmul.f32 0.035226293, %v1546_v43  ;;  %v1548_v12 = vld [vmem:[#allocation11_spill] sm:$0xff]  ;;  %v329_v23 = vadd.f32 %v1549_v13, %v89_v25  ;;  %v1559_v13 = vld [vmem:[#allocation6_spill] sm:$0xff] }
  0xe6   :  { %723 = vst [vmem:[%s1507_s2 + $0x40] sm:$0xff] %v612_v6  ;;  %v90_v19 = vadd.f32 %v74_v52, %v58_v55  ;;  %v93_v6 = vmul.f32 0.035226293, %v1550_v56  ;;  %v1551_v55 = vld [vmem:[#allocation15_spill] sm:$0xff]  ;;  %v100_v43 = vmul.f32 0.035226293, %v871_v32 }
  0xe7   :  { %721 = vst [vmem:[%s1507_s2 + $0x30] sm:$0xff] %v610_v39  ;;  %v126_v38 = vadd.f32 %v110_v31, %v94_v27  ;;  %v116_v27 = vmul.f32 -0.33267054, %v876_v33  ;;  %v1557_v31 = vld [vmem:[#allocation14_spill] sm:$0xff] }
  0xe8   :  { %722 = vst [vmem:[%s1507_s2 + $0x38] sm:$0xff] %v611_v20  ;;  %v330_v2 = vadd.f32 %v1548_v12, %v90_v19  ;;  %v125_v42 = vadd.f32 %v109_v26, %v93_v6  ;;  %v1555_v19 = vld [vmem:[#allocation5_spill] sm:$0xff]  ;;  %v1556_v26 = vld [vmem:[#allocation18_spill] sm:$0xff]  ;;  %v1558_v12 = vld [vmem:[#allocation16_spill] sm:$0xff] }
  0xe9   :  { %v413_v52 = vadd.f32 %v1551_v55, %v126_v38  ;;  %v98_v25 = vmul.f32 0.035226293, %v1555_v19  ;;  %v1560_v38 = vld [vmem:[#allocation21_spill] sm:$0xff] }
  0xea   :  { %v563_v21 = vpop.permute.xlu1 %562 }
  0xeb   :  { %v584_v53 = vsel %vm572_vm1, %v563_v21, %v1271_v18  ;;  %v561_v36 = vpop.permute.xlu0 %560 }
  0xec   :  { %v615_v61 = vadd.f32 %v584_v53, %v328_v10  ;;  %v582_v54 = vsel %vm572_vm1, %v1250_v51, %v561_v36  ;;  %v583_v11 = vsel %vm572_vm1, %v561_v36, %v563_v21  ;;  %v641_v51 = vpop.permute.xlu2 %640  ;;  %v113_v10 = vmul.f32 -0.33267054, %v791_v1  ;;  %v1552_v21 = vld [vmem:[#allocation13_spill] sm:$0xff]  ;;  %v1554_v53 = vld [vmem:[#allocation3_spill] sm:$0xff] }
  0xed   :  { %v613_v59 = vadd.f32 %v582_v54, %v326_v41  ;;  %v614_v8 = vadd.f32 %v583_v11, %v327_v14  ;;  %v412_v14 = vadd.f32 %v1552_v21, %v125_v42  ;;  %v1553_v41 = vld [vmem:[#allocation2_spill] sm:$0xff]  ;;  %v111_v36 = vmul.f32 -0.33267054, %v1554_v53 }
  0xee   :  { %726 = vst [vmem:[%s1507_s2 + $0x58] sm:$0xff] %v615_v61  ;;  %v95_v7 = vmul.f32 0.035226293, %v1553_v41  ;;  %v117_v21 = vmul.f32 -0.33267054, %v866_v30 }
  0xef   :  { %724 = vst [vmem:[%s1507_s2 + $0x48] sm:$0xff] %v613_v59  ;;  %v129_v59 = vadd.f32 %v113_v10, %v97_v37  ;;  %v1562_v10 = vld [vmem:[#allocation19_spill] sm:$0xff]  ;;  %v105_v30 = vmul.f32 0.035226293, %v959_v3 }
  0xf0   :  { %725 = vst [vmem:[%s1507_s2 + $0x50] sm:$0xff] %v614_v8  ;;  %v127_v1 = vadd.f32 %v111_v36, %v95_v7  ;;  %v99_v8 = vmul.f32 0.035226293, %v881_v34 }
  0xf2   :  { %v569_v5 = vpop.permute.xlu1 %568  ;;  %v131_v33 = vadd.f32 %v115_v60, %v99_v8  ;;  %v1565_v60 = vld [vmem:[#allocation22_spill] sm:$0xff] }
  0xf3   :  { %v587_v22 = vsel %vm572_vm1, %v569_v5, %v1297_v24  ;;  %v567_v28 = vpop.permute.xlu0 %566  ;;  %v112_v24 = vmul.f32 -0.33267054, %v837_v17 }
  0xf4   :  { %v618_v39 = vadd.f32 %v587_v22, %v331_v16  ;;  %v585_v9 = vsel %vm572_vm1, %v1271_v18, %v567_v28  ;;  %v586_v57 = vsel %vm572_vm1, %v567_v28, %v569_v5  ;;  %v96_v18 = vmul.f32 0.035226293, %v832_v15  ;;  %v647_v40 = vpop.permute.xlu2 %646 }
  0xf5   :  { %v616_v20 = vadd.f32 %v585_v9, %v329_v23  ;;  %v617_v45 = vadd.f32 %v586_v57, %v330_v2  ;;  %v416_v16 = vadd.f32 %v1556_v26, %v129_v59  ;;  %v414_v2 = vadd.f32 %v1558_v12, %v127_v1  ;;  %v1564_v1 = vld [vmem:[#allocation20_spill] sm:$0xff]  ;;  %v1566_v12 = vld [vmem:[#allocation9_spill] sm:$0xff] }
  0xf6   :  { %729 = vst [vmem:[%s1507_s2 + $0x70] sm:$0xff] %v618_v39  ;;  %v128_v0 = vadd.f32 %v112_v24, %v96_v18  ;;  %v114_v23 = vmul.f32 -0.33267054, %v1559_v13  ;;  %v132_v9 = vadd.f32 %v116_v27, %v100_v43  ;;  %v103_v18 = vmul.f32 0.035226293, %v910_v47  ;;  %v1567_v13 = vld [vmem:[#allocation10_spill] sm:$0xff] }
  0xf7   :  { %727 = vst [vmem:[%s1507_s2 + $0x60] sm:$0xff] %v616_v20  ;;  %v118_v20 = vmul.f32 -0.33267054, %v925_v50  ;;  %v119_v24 = vmul.f32 -0.33267054, %v915_v48 }
  0xf8   :  { %728 = vst [vmem:[%s1507_s2 + $0x68] sm:$0xff] %v617_v45  ;;  %v415_v5 = vadd.f32 %v1557_v31, %v128_v0  ;;  %v130_v57 = vadd.f32 %v114_v23, %v98_v25  ;;  %v101_v45 = vmul.f32 0.035226293, %v861_v29  ;;  %v419_v42 = vadd.f32 %v1560_v38, %v132_v9  ;;  %v758_v25 = vld [vmem:[%s1506_s1 + $0x58] sm:$0xff] }
  0xf9   :  { %v135_v47 = vadd.f32 %v119_v24, %v103_v18  ;;  %v122_v59 = vmul.f32 -0.33267054, %v954_v63  ;;  %v120_v3 = vmul.f32 -0.33267054, %v758_v25  ;;  %v124_v23 = vmul.f32 -0.33267054, %v1567_v13 }
  0xfa   :  { %v639_v46 = vpop.permute.xlu1 %638 }
  0xfb   :  { %v669_v61 = vsel %vm572_vm1, %v639_v46, %v641_v51  ;;  %v637_v54 = vpop.permute.xlu0 %636 }
  0xfc   :  { %v700_v15 = vadd.f32 %v669_v61, %v413_v52  ;;  %v668_v17 = vsel %vm572_vm1, %v637_v54, %v639_v46  ;;  %v653_v28 = vpop.permute.xlu2 %652  ;;  %v1561_v52 = vld [vmem:[#allocation17_spill] sm:$0xff]  ;;  %v417_v46 = vadd.f32 %v1562_v10, %v130_v57  ;;  %v133_v61 = vadd.f32 %v117_v21, %v101_v45 }
  0xfd   :  { %v699_v11 = vadd.f32 %v668_v17, %v412_v14  ;;  %v418_v37 = vadd.f32 %v1561_v52, %v131_v33  ;;  %v104_v54 = vmul.f32 0.035226293, %v900_v44  ;;  %v760_v33 = vld [vmem:[%s1506_s1 + $0x70] sm:$0xff] }
  0xfe   :  { %733 = vst [vmem:[%s1508_s3 + $0x8] sm:$0xff] %v700_v15  ;;  %v1563_v15 = vld [vmem:[#allocation24_spill] sm:$0xff]  ;;  %v420_v19 = vadd.f32 %v1565_v60, %v133_v61  ;;  %v123_v57 = vmul.f32 -0.33267054, %v760_v33 }
  0xff   :  { %732 = vst [vmem:[%s1508_s3] sm:$0xff] %v699_v11  ;;  %v422_v17 = vadd.f32 %v1563_v15, %v135_v47  ;;  %v106_v11 = vmul.f32 0.035226293, %v949_v62  ;;  %v136_v31 = vadd.f32 %v120_v3, %v104_v54 }
 0x101   :  { %v138_v27 = vadd.f32 %v122_v59, %v106_v11 }
 0x102   :  { %v645_v58 = vpop.permute.xlu1 %644 }
 0x103   :  { %v672_v56 = vsel %vm572_vm1, %v645_v58, %v647_v40  ;;  %v643_v34 = vpop.permute.xlu0 %642 }
 0x104   :  { %v703_v6 = vadd.f32 %v672_v56, %v416_v16  ;;  %v670_v35 = vsel %vm572_vm1, %v641_v51, %v643_v34  ;;  %v671_v22 = vsel %vm572_vm1, %v643_v34, %v645_v58  ;;  %v102_v51 = vmul.f32 0.035226293, %v920_v49  ;;  %v659_v48 = vpop.permute.xlu2 %658  ;;  %v759_v56 = vld [vmem:[%s1505_s0 + $0x70] sm:$0xff] }
 0x105   :  { %v701_v39 = vadd.f32 %v670_v35, %v414_v2  ;;  %v702_v32 = vadd.f32 %v671_v22, %v415_v5  ;;  %v108_v2 = vmul.f32 0.035226293, %v1566_v12  ;;  %v107_v34 = vmul.f32 0.035226293, %v759_v56 }
 0x106   :  { %736 = vst [vmem:[%s1508_s3 + $0x20] sm:$0xff] %v703_v6  ;;  %v134_v36 = vadd.f32 %v118_v20, %v102_v51  ;;  %v1568_v6 = vld [vmem:[#allocation27_spill] sm:$0xff] }
 0x107   :  { %734 = vst [vmem:[%s1508_s3 + $0x10] sm:$0xff] %v701_v39  ;;  %v425_v35 = vadd.f32 %v1568_v6, %v138_v27  ;;  %v139_v52 = vadd.f32 %v123_v57, %v107_v34 }
 0x108   :  { %735 = vst [vmem:[%s1508_s3 + $0x18] sm:$0xff] %v702_v32  ;;  %v421_v8 = vadd.f32 %v1564_v1, %v134_v36  ;;  %v1570_v32 = vld [vmem:[#allocation25_spill] sm:$0xff] }
 0x109   :  { %v423_v9 = vadd.f32 %v1570_v32, %v136_v31 }
 0x10a   :  { %v651_v55 = vpop.permute.xlu1 %650 }
 0x10b   :  { %v675_v14 = vsel %vm572_vm1, %v651_v55, %v653_v28  ;;  %v649_v49 = vpop.permute.xlu0 %648 }
 0x10c   :  { %v706_v41 = vadd.f32 %v675_v14, %v419_v42  ;;  %v673_v50 = vsel %vm572_vm1, %v647_v40, %v649_v49  ;;  %v674_v29 = vsel %vm572_vm1, %v649_v49, %v651_v55  ;;  %v121_v40 = vmul.f32 -0.33267054, %v964_v4  ;;  %v665_v5 = vpop.permute.xlu2 %664 }
 0x10d   :  { %v704_v7 = vadd.f32 %v673_v50, %v417_v46  ;;  %v705_v53 = vadd.f32 %v674_v29, %v418_v37  ;;  %v140_v55 = vadd.f32 %v124_v23, %v108_v2  ;;  %v1571_v37 = vld [vmem:[#allocation26_spill] sm:$0xff]  ;;  %v1572_v46 = vld [vmem:[#allocation28_spill] sm:$0xff] }
 0x10e   :  { %739 = vst [vmem:[%s1508_s3 + $0x38] sm:$0xff] %v706_v41  ;;  %v137_v58 = vadd.f32 %v121_v40, %v105_v30  ;;  %v426_v21 = vadd.f32 %v1572_v46, %v139_v52 }
 0x10f   :  { %737 = vst [vmem:[%s1508_s3 + $0x28] sm:$0xff] %v704_v7  ;;  %v427_v10 = vadd.f32 %v1571_v37, %v140_v55 }
 0x110   :  { %738 = vst [vmem:[%s1508_s3 + $0x30] sm:$0xff] %v705_v53 }
 0x112   :  { %v657_v0 = vpop.permute.xlu1 %656 }
 0x113   :  { %v678_v4 = vsel %vm572_vm1, %v657_v0, %v659_v48  ;;  %v655_v26 = vpop.permute.xlu0 %654 }
 0x114   :  { %v709_v44 = vadd.f32 %v678_v4, %v422_v17  ;;  %v676_v16 = vsel %vm572_vm1, %v653_v28, %v655_v26  ;;  %v677_v62 = vsel %vm572_vm1, %v655_v26, %v657_v0  ;;  %v1569_v28 = vld [vmem:[#allocation23_spill] sm:$0xff] }
 0x115   :  { %v707_v43 = vadd.f32 %v676_v16, %v420_v19  ;;  %v708_v63 = vadd.f32 %v677_v62, %v421_v8  ;;  %v424_v39 = vadd.f32 %v1569_v28, %v137_v58 }
 0x116   :  { %742 = vst [vmem:[%s1508_s3 + $0x50] sm:$0xff] %v709_v44 }
 0x117   :  { %740 = vst [vmem:[%s1508_s3 + $0x40] sm:$0xff] %v707_v43 }
 0x118   :  { %741 = vst [vmem:[%s1508_s3 + $0x48] sm:$0xff] %v708_v63 }
 0x11a   :  { %v663_v22 = vpop.permute.xlu1 %662 }
 0x11b   :  { %v681_v51 = vsel %vm572_vm1, %v663_v22, %v665_v5  ;;  %v661_v20 = vpop.permute.xlu0 %660 }
 0x11c   :  { %v712_v45 = vadd.f32 %v681_v51, %v425_v35  ;;  %v679_v38 = vsel %vm572_vm1, %v659_v48, %v661_v20  ;;  %v680_v42 = vsel %vm572_vm1, %v661_v20, %v663_v22 }
 0x11d   :  { %v710_v18 = vadd.f32 %v679_v38, %v423_v9  ;;  %v711_v24 = vadd.f32 %v680_v42, %v424_v39 }
 0x11e   :  { %745 = vst [vmem:[%s1508_s3 + $0x68] sm:$0xff] %v712_v45 }
 0x11f   :  { %743 = vst [vmem:[%s1508_s3 + $0x58] sm:$0xff] %v710_v18 }
 0x120   :  { %744 = vst [vmem:[%s1508_s3 + $0x60] sm:$0xff] %v711_v24 }
 0x123   :  { %v667_v14 = vpop.permute.xlu0 %666 }
 0x124   :  { %v682_v49 = vsel %vm572_vm1, %v665_v5, %v667_v14  ;;  %v714_v41 = vadd.f32 %v667_v14, %v427_v10 }
 0x125   :  { %v713_v50 = vadd.f32 %v682_v49, %v426_v21 }
 0x126   :  { %747 = vst.msk [vmem:[%s1508_s3 + $0x78] sm:$0xff] %vm730_vm2, %v714_v41 }
 0x127   :  { %746 = vst [vmem:[%s1508_s3 + $0x70] sm:$0xff] %v713_v50 }

// kernel: idwt_layer.5
= control target key start
LH: loop header
LB: loop body
LE: loop exit
PB: predicated region body
PF: predicated region fallthrough
CT: control target
= control target key end

     0   :  { %s1558_s7 = smov 127   ;;  %vm557_vm0 = vcmask 1039360   ;;  %s1559_s10 = smov 126   ;;  %vm1132_vm1 = vcmask 1031168   ;;  %vm1450_vm2 = vcmask 261120   ;;  %s3387_s0 = inlined_call_operand.vmem [shape: f32[8,4002], index: 0, kind: input, shape index: {}]   ;;  %s3388_s1 = inlined_call_operand.vmem [shape: f32[8,4002], index: 1, kind: input, shape index: {}]   ;;  %s3389_s2 = inlined_call_operand.vmem [shape: f32[8,4000], index: 2, kind: output, shape index: {0}]   ;;  %s3390_s3 = inlined_call_operand.vmem [shape: f32[8,4000], index: 3, kind: output, shape index: {1}]  }
   0x1   :  { %v1583_v0 = vld [vmem:[%s3387_s0 + $0x20] sm:$0xff]  ;;  %v1593_v2 = vld [vmem:[%s3387_s0 + $0x10] sm:$0xff]  ;;  %v1617_v10 = vld [vmem:[%s3387_s0 + $0x28] sm:$0xff] }
   0x2   :  { %v1588_v1 = vld [vmem:[%s3388_s1 + $0x20] sm:$0xff]  ;;  %v273_v3 = vmul.f32 0.4598775, %v1583_v0  ;;  %v1600_v5 = vld [vmem:[%s3388_s1 + $0x10] sm:$0xff]  ;;  %v271_v7 = vmul.f32 0.4598775, %v1593_v2 }
   0x3   :  { %v305_v4 = vmul.f32 -0.13501102, %v1588_v1  ;;  %3470 = vst [vmem:[#allocation2_spill] sm:$0xff] %v1600_v5  ;;  %v1605_v6 = vld [vmem:[%s3387_s0] sm:$0xff]  ;;  %v303_v8 = vmul.f32 -0.13501102, %v1600_v5 }
   0x4   :  { %v1612_v9 = vld [vmem:[%s3388_s1] sm:$0xff]  ;;  %v269_v12 = vmul.f32 0.4598775, %v1605_v6  ;;  %v1624_v14 = vld [vmem:[%s3388_s1 + $0x28] sm:$0xff]  ;;  %v1629_v15 = vld [vmem:[%s3387_s0 + $0x18] sm:$0xff] }
   0x5   :  { %3471 = vst [vmem:[#allocation3_spill] sm:$0xff] %v1612_v9  ;;  %v337_v11 = vadd.f32 %v305_v4, %v273_v3  ;;  %v301_v13 = vmul.f32 -0.13501102, %v1612_v9  ;;  %v335_v16 = vadd.f32 %v303_v8, %v271_v7  ;;  %v1634_v17 = vld [vmem:[%s3388_s1 + $0x18] sm:$0xff]  ;;  %v1639_v18 = vld [vmem:[%s3387_s0 + $0x8] sm:$0xff]  ;;  %v1658_v29 = vld [vmem:[%s3387_s0 + $0x40] sm:$0xff] }
   0x6   :  { %v274_v20 = vmul.f32 0.4598775, %v1617_v10  ;;  %v306_v21 = vmul.f32 -0.13501102, %v1624_v14  ;;  %v1647_v22 = vld [vmem:[%s3388_s1 + $0x8] sm:$0xff]  ;;  %3472 = vst [vmem:[#allocation4_spill] sm:$0xff] %v1658_v29 }
   0x7   :  { %501 = vrot.lane.b32.xlu2 %v337_v11, %s1558_s7  ;;  %v333_v19 = vadd.f32 %v301_v13, %v269_v12  ;;  %497 = vrot.lane.b32.xlu1 %v335_v16, %s1558_s7  ;;  %v272_v23 = vmul.f32 0.4598775, %v1629_v15  ;;  %v304_v24 = vmul.f32 -0.13501102, %v1634_v17  ;;  %v270_v25 = vmul.f32 0.4598775, %v1639_v18 }
   0x8   :  { %v302_v26 = vmul.f32 -0.13501102, %v1647_v22  ;;  %v338_v27 = vadd.f32 %v306_v21, %v274_v20  ;;  %v1663_v30 = vld [vmem:[%s3388_s1 + $0x40] sm:$0xff]  ;;  %v1668_v32 = vld [vmem:[%s3387_s0 + $0x38] sm:$0xff]  ;;  %v1678_v34 = vld [vmem:[%s3387_s0 + $0x30] sm:$0xff] }
   0x9   :  { %493 = vrot.lane.b32.xlu0 %v333_v19, %s1558_s7  ;;  %v336_v28 = vadd.f32 %v304_v24, %v272_v23  ;;  %3473 = vst [vmem:[#allocation5_spill] sm:$0xff] %v1663_v30  ;;  %v1673_v33 = vld [vmem:[%s3388_s1 + $0x38] sm:$0xff]  ;;  %v1683_v35 = vld [vmem:[%s3388_s1 + $0x30] sm:$0xff]  ;;  %v277_v36 = vmul.f32 0.4598775, %v1658_v29  ;;  %v1717_v49 = vld [vmem:[%s3387_s0 + $0x48] sm:$0xff] }
   0xa   :  { %v334_v31 = vadd.f32 %v302_v26, %v270_v25  ;;  %v309_v37 = vmul.f32 -0.13501102, %v1663_v30  ;;  %v276_v38 = vmul.f32 0.4598775, %v1668_v32  ;;  %v308_v39 = vmul.f32 -0.13501102, %v1673_v33 }
   0xb   :  { %v275_v40 = vmul.f32 0.4598775, %v1678_v34  ;;  %v307_v41 = vmul.f32 -0.13501102, %v1683_v35  ;;  %v1697_v44 = vld [vmem:[%s3387_s0 + $0x58] sm:$0xff]  ;;  %v1707_v47 = vld [vmem:[%s3387_s0 + $0x50] sm:$0xff] }
   0xc   :  { %v341_v42 = vadd.f32 %v309_v37, %v277_v36  ;;  %v340_v43 = vadd.f32 %v308_v39, %v276_v38  ;;  %v1702_v45 = vld [vmem:[%s3388_s1 + $0x58] sm:$0xff]  ;;  %v1712_v48 = vld [vmem:[%s3388_s1 + $0x50] sm:$0xff]  ;;  %v1722_v50 = vld [vmem:[%s3388_s1 + $0x48] sm:$0xff]  ;;  %v280_v51 = vmul.f32 0.4598775, %v1697_v44 }
   0xd   :  { %v339_v46 = vadd.f32 %v307_v41, %v275_v40  ;;  %v312_v52 = vmul.f32 -0.13501102, %v1702_v45  ;;  %v279_v53 = vmul.f32 0.4598775, %v1707_v47  ;;  %v311_v54 = vmul.f32 -0.13501102, %v1712_v48 }
   0xe   :  { %v278_v55 = vmul.f32 0.4598775, %v1717_v49  ;;  %v310_v56 = vmul.f32 -0.13501102, %v1722_v50  ;;  %v1736_v59 = vld [vmem:[%s3387_s0 + $0x70] sm:$0xff]  ;;  %v1746_v62 = vld [vmem:[%s3387_s0 + $0x68] sm:$0xff] }
   0xf   :  { %503 = vrot.lane.b32.xlu2 %v338_v27, %s1558_s7  ;;  %499 = vrot.lane.b32.xlu1 %v336_v28, %s1558_s7  ;;  %v344_v57 = vadd.f32 %v312_v52, %v280_v51  ;;  %v343_v58 = vadd.f32 %v311_v54, %v279_v53  ;;  %3474 = vst [vmem:[#allocation6_spill] sm:$0xff] %v1736_v59  ;;  %v1741_v60 = vld [vmem:[%s3388_s1 + $0x70] sm:$0xff]  ;;  %v1751_v63 = vld [vmem:[%s3388_s1 + $0x68] sm:$0xff]  ;;  %v283_v7 = vmul.f32 0.4598775, %v1736_v59 }
  0x10   :  { %3475 = vst [vmem:[#allocation7_spill] sm:$0xff] %v1741_v60  ;;  %v342_v61 = vadd.f32 %v310_v56, %v278_v55  ;;  %v1756_v3 = vld [vmem:[%s3387_s0 + $0x60] sm:$0xff]  ;;  %v315_v8 = vmul.f32 -0.13501102, %v1741_v60  ;;  %v282_v11 = vmul.f32 0.4598775, %v1746_v62 }
  0x11   :  { %495 = vrot.lane.b32.xlu0 %v334_v31, %s1558_s7  ;;  %v1761_v4 = vld [vmem:[%s3388_s1 + $0x60] sm:$0xff]  ;;  %v314_v12 = vmul.f32 -0.13501102, %v1751_v63  ;;  %v281_v13 = vmul.f32 0.4598775, %v1756_v3  ;;  %v1775_v21 = vld [vmem:[%s3387_s0 + $0x88] sm:$0xff] }
  0x12   :  { %v313_v16 = vmul.f32 -0.13501102, %v1761_v4  ;;  %v347_v19 = vadd.f32 %v315_v8, %v283_v7  ;;  %3476 = vst [vmem:[#allocation8_spill] sm:$0xff] %v1775_v21  ;;  %v1780_v23 = vld [vmem:[%s3388_s1 + $0x88] sm:$0xff]  ;;  %v1785_v25 = vld [vmem:[%s3387_s0 + $0x80] sm:$0xff]  ;;  %v1795_v27 = vld [vmem:[%s3387_s0 + $0x78] sm:$0xff] }
  0x13   :  { %v346_v20 = vadd.f32 %v314_v12, %v282_v11  ;;  %3477 = vst [vmem:[#allocation9_spill] sm:$0xff] %v1780_v23  ;;  %v1790_v26 = vld [vmem:[%s3388_s1 + $0x80] sm:$0xff]  ;;  %v1800_v28 = vld [vmem:[%s3388_s1 + $0x78] sm:$0xff]  ;;  %v286_v31 = vmul.f32 0.4598775, %v1775_v21  ;;  %v1834_v54 = vld [vmem:[%s3387_s0 + $0x90] sm:$0xff] }
  0x14   :  { %v345_v24 = vadd.f32 %v313_v16, %v281_v13  ;;  %3478 = vst [vmem:[#allocation10_spill] sm:$0xff] %v1800_v28  ;;  %v318_v36 = vmul.f32 -0.13501102, %v1780_v23  ;;  %v285_v37 = vmul.f32 0.4598775, %v1785_v25  ;;  %v1824_v52 = vld [vmem:[%s3387_s0 + $0x98] sm:$0xff] }
  0x15   :  { %v317_v38 = vmul.f32 -0.13501102, %v1790_v26  ;;  %v284_v39 = vmul.f32 0.4598775, %v1795_v27  ;;  %v316_v40 = vmul.f32 -0.13501102, %v1800_v28 }
  0x16   :  { %v350_v41 = vadd.f32 %v318_v36, %v286_v31  ;;  %v1829_v53 = vld [vmem:[%s3388_s1 + $0x98] sm:$0xff]  ;;  %3479 = vst [vmem:[#allocation11_spill] sm:$0xff] %v1834_v54  ;;  %v1839_v55 = vld [vmem:[%s3388_s1 + $0x90] sm:$0xff]  ;;  %v287_v7 = vmul.f32 0.4598775, %v1834_v54  ;;  %v1873_v31 = vld [vmem:[%s3387_s0 + $0xa8] sm:$0xff] }
  0x17   :  { %509 = vrot.lane.b32.xlu2 %v341_v42, %s1558_s7  ;;  %507 = vrot.lane.b32.xlu1 %v340_v43, %s1558_s7  ;;  %v349_v42 = vadd.f32 %v317_v38, %v285_v37  ;;  %v1814_v43 = vld [vmem:[%s3387_s0 + $0xa0] sm:$0xff]  ;;  %v348_v51 = vadd.f32 %v316_v40, %v284_v39  ;;  %3480 = vst [vmem:[#allocation12_spill] sm:$0xff] %v1839_v55  ;;  %v319_v8 = vmul.f32 -0.13501102, %v1839_v55  ;;  %v1853_v13 = vld [vmem:[%s3387_s0 + $0xb8] sm:$0xff] }
  0x18   :  { %v289_v56 = vmul.f32 0.4598775, %v1814_v43  ;;  %3481 = vst [vmem:[#allocation13_spill] sm:$0xff] %v1853_v13  ;;  %v1858_v16 = vld [vmem:[%s3388_s1 + $0xb8] sm:$0xff]  ;;  %v1878_v36 = vld [vmem:[%s3388_s1 + $0xa8] sm:$0xff] }
  0x19   :  { %505 = vrot.lane.b32.xlu0 %v339_v46, %s1558_s7  ;;  %v1819_v46 = vld [vmem:[%s3388_s1 + $0xa0] sm:$0xff]  ;;  %3482 = vst [vmem:[#allocation14_spill] sm:$0xff] %v1858_v16  ;;  %v292_v37 = vmul.f32 0.4598775, %v1853_v13  ;;  %v324_v38 = vmul.f32 -0.13501102, %v1858_v16 }
  0x1f   :  { %515 = vrot.lane.b32.xlu2 %v344_v57, %s1558_s7  ;;  %513 = vrot.lane.b32.xlu1 %v343_v58, %s1558_s7  ;;  %v321_v57 = vmul.f32 -0.13501102, %v1819_v46  ;;  %v288_v58 = vmul.f32 0.4598775, %v1824_v52 }
  0x21   :  { %511 = vrot.lane.b32.xlu0 %v342_v61, %s1558_s7  ;;  %v320_v61 = vmul.f32 -0.13501102, %v1829_v53  ;;  %v353_v11 = vadd.f32 %v321_v57, %v289_v56  ;;  %v1892_v57 = vld [vmem:[%s3387_s0 + $0xd0] sm:$0xff] }
  0x22   :  { %3485 = vst [vmem:[#allocation17_spill] sm:$0xff] %v1892_v57 }
  0x23   :  { %v352_v12 = vadd.f32 %v320_v61, %v288_v58  ;;  %v1897_v58 = vld [vmem:[%s3388_s1 + $0xd0] sm:$0xff] }
  0x24   :  { %3486 = vst [vmem:[#allocation18_spill] sm:$0xff] %v1897_v58 }
  0x27   :  { %521 = vrot.lane.b32.xlu2 %v347_v19, %s1558_s7  ;;  %519 = vrot.lane.b32.xlu1 %v346_v20, %s1558_s7  ;;  %v351_v19 = vadd.f32 %v319_v8, %v287_v7  ;;  %v1863_v20 = vld [vmem:[%s3387_s0 + $0xb0] sm:$0xff]  ;;  %v1902_v7 = vld [vmem:[%s3387_s0 + $0xc8] sm:$0xff] }
  0x28   :  { %3483 = vst [vmem:[#allocation15_spill] sm:$0xff] %v1863_v20  ;;  %v291_v39 = vmul.f32 0.4598775, %v1863_v20  ;;  %v1907_v8 = vld [vmem:[%s3388_s1 + $0xc8] sm:$0xff] }
  0x29   :  { %517 = vrot.lane.b32.xlu0 %v345_v24, %s1558_s7  ;;  %v1868_v24 = vld [vmem:[%s3388_s1 + $0xb0] sm:$0xff]  ;;  %3487 = vst [vmem:[#allocation19_spill] sm:$0xff] %v1902_v7 }
  0x2a   :  { %3484 = vst [vmem:[#allocation16_spill] sm:$0xff] %v1868_v24  ;;  %v323_v40 = vmul.f32 -0.13501102, %v1868_v24 }
  0x2b   :  { %3488 = vst [vmem:[#allocation20_spill] sm:$0xff] %v1907_v8 }
  0x2c   :  { %v355_v56 = vadd.f32 %v323_v40, %v291_v39  ;;  %v326_v39 = vmul.f32 -0.13501102, %v1907_v8 }
  0x2f   :  { %527 = vrot.lane.b32.xlu2 %v350_v41, %s1558_s7  ;;  %525 = vrot.lane.b32.xlu1 %v349_v42, %s1558_s7  ;;  %v290_v41 = vmul.f32 0.4598775, %v1873_v31  ;;  %v322_v42 = vmul.f32 -0.13501102, %v1878_v36 }
  0x31   :  { %523 = vrot.lane.b32.xlu0 %v348_v51, %s1558_s7  ;;  %v356_v51 = vadd.f32 %v324_v38, %v292_v37  ;;  %v354_v61 = vadd.f32 %v322_v42, %v290_v41  ;;  %v327_v37 = vmul.f32 -0.13501102, %v1897_v58  ;;  %v294_v38 = vmul.f32 0.4598775, %v1902_v7 }
  0x33   :  { %v358_v24 = vadd.f32 %v326_v39, %v294_v38  ;;  %v1956_v38 = vld [vmem:[%s3388_s1 + $0xd8] sm:$0xff] }
  0x34   :  { %3494 = vst [vmem:[#allocation26_spill] sm:$0xff] %v1956_v38 }
  0x37   :  { %533 = vrot.lane.b32.xlu2 %v353_v11, %s1558_s7  ;;  %531 = vrot.lane.b32.xlu1 %v352_v12, %s1558_s7  ;;  %v1912_v11 = vld [vmem:[%s3387_s0 + $0xc0] sm:$0xff] }
  0x38   :  { %v1917_v12 = vld [vmem:[%s3388_s1 + $0xc0] sm:$0xff]  ;;  %v293_v40 = vmul.f32 0.4598775, %v1912_v11 }
  0x39   :  { %529 = vrot.lane.b32.xlu0 %v351_v19, %s1558_s7  ;;  %v295_v19 = vmul.f32 0.4598775, %v1892_v57  ;;  %v325_v41 = vmul.f32 -0.13501102, %v1917_v12  ;;  %v328_v57 = vmul.f32 -0.13501102, %v1956_v38 }
  0x3b   :  { %v359_v42 = vadd.f32 %v327_v37, %v295_v19  ;;  %v357_v7 = vadd.f32 %v325_v41, %v293_v40  ;;  %v1946_v19 = vld [vmem:[%s3388_s1 + $0xe0] sm:$0xff]  ;;  %v1951_v37 = vld [vmem:[%s3387_s0 + $0xd8] sm:$0xff] }
  0x3c   :  { %3492 = vst [vmem:[#allocation24_spill] sm:$0xff] %v1946_v19  ;;  %v329_v8 = vmul.f32 -0.13501102, %v1946_v19  ;;  %v296_v58 = vmul.f32 0.4598775, %v1951_v37 }
  0x3d   :  { %3493 = vst [vmem:[#allocation25_spill] sm:$0xff] %v1951_v37 }
  0x3e   :  { %v360_v13 = vadd.f32 %v328_v57, %v296_v58  ;;  %v365_v57 = vmul.f32 -0.13501102, %v1605_v6  ;;  %v397_v58 = vmul.f32 -0.4598775, %v1612_v9  ;;  %v400_v9 = vmul.f32 -0.4598775, %v1634_v17 }
  0x3f   :  { %539 = vrot.lane.b32.xlu2 %v356_v51, %s1558_s7  ;;  %537 = vrot.lane.b32.xlu1 %v355_v56, %s1558_s7  ;;  %v1931_v51 = vld [vmem:[%s3387_s0 + $0xe8] sm:$0xff] }
  0x40   :  { %3489 = vst [vmem:[#allocation21_spill] sm:$0xff] %v1931_v51  ;;  %v1936_v56 = vld [vmem:[%s3388_s1 + $0xe8] sm:$0xff]  ;;  %v298_v39 = vmul.f32 0.4598775, %v1931_v51 }
  0x41   :  { %535 = vrot.lane.b32.xlu0 %v354_v61, %s1558_s7  ;;  %3490 = vst [vmem:[#allocation22_spill] sm:$0xff] %v1936_v56  ;;  %v1941_v61 = vld [vmem:[%s3387_s0 + $0xe0] sm:$0xff]  ;;  %v330_v40 = vmul.f32 -0.13501102, %v1936_v56 }
  0x42   :  { %3491 = vst [vmem:[#allocation23_spill] sm:$0xff] %v1941_v61  ;;  %v297_v41 = vmul.f32 0.4598775, %v1941_v61  ;;  %v429_v61 = vadd.f32 %v397_v58, %v365_v57  ;;  %v398_v57 = vmul.f32 -0.4598775, %v1647_v22 }
  0x43   :  { %v362_v20 = vadd.f32 %v330_v40, %v298_v39 }
  0x44   :  { %v361_v16 = vadd.f32 %v329_v8, %v297_v41  ;;  %v1985_v8 = vld [vmem:[%s3388_s1 + $0xf0] sm:$0xff] }
  0x45   :  { %3496 = vst [vmem:[#allocation28_spill] sm:$0xff] %v1985_v8  ;;  %v331_v19 = vmul.f32 -0.13501102, %v1985_v8 }
  0x47   :  { %545 = vrot.lane.b32.xlu2 %v359_v42, %s1558_s7  ;;  %543 = vrot.lane.b32.xlu1 %v358_v24, %s1558_s7  ;;  %v1970_v42 = vld [vmem:[%s3387_s0 + $0xf8] sm:$0xff] }
  0x48   :  { %v1975_v24 = vld [vmem:[%s3388_s1 + $0xf8] sm:$0xff]  ;;  %v300_v39 = vmul.f32 0.4598775, %v1970_v42 }
  0x49   :  { %541 = vrot.lane.b32.xlu0 %v357_v7, %s1558_s7  ;;  %3495 = vst [vmem:[#allocation27_spill] sm:$0xff] %v1975_v24  ;;  %v1980_v7 = vld [vmem:[%s3387_s0 + $0xf0] sm:$0xff]  ;;  %v332_v40 = vmul.f32 -0.13501102, %v1975_v24  ;;  %v399_v24 = vmul.f32 -0.4598775, %v1600_v5 }
  0x4a   :  { %v299_v41 = vmul.f32 0.4598775, %v1980_v7  ;;  %v369_v5 = vmul.f32 -0.13501102, %v1583_v0 }
  0x4b   :  { %v364_v56 = vadd.f32 %v332_v40, %v300_v39  ;;  %v403_v40 = vmul.f32 -0.4598775, %v1683_v35 }
  0x4c   :  { %v363_v51 = vadd.f32 %v331_v19, %v299_v41  ;;  %v402_v41 = vmul.f32 -0.4598775, %v1624_v14 }
  0x4f   :  { %551 = vrot.lane.b32.xlu2 %v362_v20, %s1558_s7  ;;  %549 = vrot.lane.b32.xlu1 %v361_v16, %s1558_s7  ;;  %v368_v20 = vmul.f32 -0.13501102, %v1629_v15  ;;  %v367_v16 = vmul.f32 -0.13501102, %v1593_v2 }
  0x51   :  { %547 = vrot.lane.b32.xlu0 %v360_v13, %s1558_s7  ;;  %v366_v13 = vmul.f32 -0.13501102, %v1639_v18  ;;  %v432_v58 = vadd.f32 %v400_v9, %v368_v20  ;;  %v431_v19 = vadd.f32 %v399_v24, %v367_v16  ;;  %v401_v9 = vmul.f32 -0.4598775, %v1588_v1 }
  0x53   :  { %v430_v39 = vadd.f32 %v398_v57, %v366_v13  ;;  %v433_v16 = vadd.f32 %v401_v9, %v369_v5  ;;  %v374_v13 = vmul.f32 -0.13501102, %v1717_v49  ;;  %v406_v57 = vmul.f32 -0.4598775, %v1722_v50 }
  0x54   :  { %v404_v5 = vmul.f32 -0.4598775, %v1673_v33 }
  0x57   :  { %685 = vrot.lane.b32.xlu2 %v429_v61, %s1558_s7  ;;  %555 = vrot.lane.b32.xlu1 %v364_v56, %s1558_s7  ;;  %v371_v61 = vmul.f32 -0.13501102, %v1678_v34  ;;  %v370_v56 = vmul.f32 -0.13501102, %v1617_v10 }
  0x59   :  { %553 = vrot.lane.b32.xlu0 %v363_v51, %s1558_s7  ;;  %v435_v24 = vadd.f32 %v403_v40, %v371_v61  ;;  %v434_v20 = vadd.f32 %v402_v41, %v370_v56  ;;  %v372_v61 = vmul.f32 -0.13501102, %v1668_v32  ;;  %v438_v56 = vadd.f32 %v406_v57, %v374_v13 }
  0x5a   :  { %v375_v13 = vmul.f32 -0.13501102, %v1707_v47  ;;  %v407_v57 = vmul.f32 -0.4598775, %v1712_v48 }
  0x5b   :  { %v436_v9 = vadd.f32 %v404_v5, %v372_v61  ;;  %v380_v5 = vmul.f32 -0.13501102, %v1795_v27 }
  0x5c   :  { %v439_v61 = vadd.f32 %v407_v57, %v375_v13 }
  0x5f   :  { %691 = vrot.lane.b32.xlu2 %v432_v58, %s1558_s7  ;;  %689 = vrot.lane.b32.xlu1 %v431_v19, %s1558_s7  ;;  %v373_v58 = vmul.f32 -0.13501102, %v1658_v29  ;;  %v405_v19 = vmul.f32 -0.4598775, %v1663_v30  ;;  %v408_v30 = vmul.f32 -0.4598775, %v1702_v45 }
  0x61   :  { %687 = vrot.lane.b32.xlu0 %v430_v39, %s1558_s7  ;;  %v502_v51 = vpop.permute.xlu2 %501  ;;  %v437_v41 = vadd.f32 %v405_v19, %v373_v58 }
  0x67   :  { %697 = vrot.lane.b32.xlu2 %v435_v24, %s1558_s7  ;;  %695 = vrot.lane.b32.xlu1 %v434_v20, %s1558_s7  ;;  %v377_v24 = vmul.f32 -0.13501102, %v1756_v3  ;;  %v409_v20 = vmul.f32 -0.4598775, %v1761_v4 }
  0x69   :  { %693 = vrot.lane.b32.xlu0 %v433_v16, %s1558_s7  ;;  %v2021_v39 = vpop.permute.xlu2 %503  ;;  %v376_v16 = vmul.f32 -0.13501102, %v1697_v44  ;;  %v441_v58 = vadd.f32 %v409_v20, %v377_v24  ;;  %v378_v24 = vmul.f32 -0.13501102, %v1746_v62 }
  0x6a   :  { %v2027_v40 = vsel %vm557_vm0, %v502_v51, %v2021_v39 }
  0x6b   :  { %3497 = vst [vmem:[#allocation29_spill] sm:$0xff] %v2027_v40  ;;  %v440_v19 = vadd.f32 %v408_v30, %v376_v16  ;;  %v410_v30 = vmul.f32 -0.4598775, %v1751_v63 }
  0x6f   :  { %703 = vrot.lane.b32.xlu2 %v438_v56, %s1558_s7  ;;  %701 = vrot.lane.b32.xlu1 %v437_v41, %s1558_s7  ;;  %v412_v56 = vmul.f32 -0.4598775, %v1800_v28  ;;  %v379_v41 = vmul.f32 -0.13501102, %v1736_v59  ;;  %v415_v59 = vmul.f32 -0.4598775, %v1839_v55 }
  0x70   :  { %v386_v55 = vmul.f32 -0.13501102, %v1873_v31 }
  0x71   :  { %699 = vrot.lane.b32.xlu0 %v436_v9, %s1558_s7  ;;  %v2036_v29 = vpop.permute.xlu2 %509  ;;  %v411_v9 = vmul.f32 -0.4598775, %v1741_v60  ;;  %v444_v13 = vadd.f32 %v412_v56, %v380_v5  ;;  %v414_v60 = vmul.f32 -0.4598775, %v1780_v23  ;;  %v381_v5 = vmul.f32 -0.13501102, %v1785_v25 }
  0x72   :  { %v413_v56 = vmul.f32 -0.4598775, %v1790_v26 }
  0x73   :  { %v443_v57 = vadd.f32 %v411_v9, %v379_v41 }
  0x77   :  { %709 = vrot.lane.b32.xlu2 %v441_v58, %s1558_s7  ;;  %707 = vrot.lane.b32.xlu1 %v440_v19, %s1558_s7  ;;  %v442_v58 = vadd.f32 %v410_v30, %v378_v24  ;;  %v383_v19 = vmul.f32 -0.13501102, %v1834_v54  ;;  %v418_v54 = vmul.f32 -0.4598775, %v1878_v36 }
  0x79   :  { %705 = vrot.lane.b32.xlu0 %v439_v61, %s1558_s7  ;;  %v2047_v40 = vpop.permute.xlu2 %515  ;;  %v498_v20 = vpop.permute.xlu1 %497  ;;  %v382_v61 = vmul.f32 -0.13501102, %v1775_v21  ;;  %v445_v21 = vadd.f32 %v413_v56, %v381_v5  ;;  %v450_v56 = vadd.f32 %v418_v54, %v386_v55  ;;  %v3506_v54 = vld [vmem:[#allocation14_spill] sm:$0xff] }
  0x7a   :  { %v420_v55 = vmul.f32 -0.4598775, %v3506_v54  ;;  %v424_v54 = vmul.f32 -0.4598775, %v1956_v38  ;;  %v427_v38 = vmul.f32 -0.4598775, %v1985_v8 }
  0x7b   :  { %v494_v16 = vpop.permute.xlu0 %493  ;;  %v446_v23 = vadd.f32 %v414_v60, %v382_v61  ;;  %v416_v60 = vmul.f32 -0.4598775, %v1829_v53  ;;  %v877_v8 = vmul.f32 0.035226293, %v1647_v22 }
  0x7f   :  { %715 = vrot.lane.b32.xlu2 %v444_v13, %s1558_s7  ;;  %713 = vrot.lane.b32.xlu1 %v443_v57, %s1558_s7  ;;  %v447_v13 = vadd.f32 %v415_v59, %v383_v19  ;;  %v417_v59 = vmul.f32 -0.4598775, %v1819_v46 }
  0x81   :  { %711 = vrot.lane.b32.xlu0 %v442_v58, %s1558_s7  ;;  %v2058_v28 = vpop.permute.xlu2 %521  ;;  %v500_v41 = vpop.permute.xlu1 %499 }
  0x82   :  { %v2063_v9 = vsel %vm557_vm0, %v498_v20, %v500_v41  ;;  %v2066_v24 = vsel %vm557_vm0, %v500_v41, %v502_v51  ;;  %v385_v51 = vmul.f32 -0.13501102, %v1814_v43 }
  0x83   :  { %3498 = vst [vmem:[#allocation30_spill] sm:$0xff] %v2063_v9  ;;  %v496_v30 = vpop.permute.xlu0 %495 }
  0x84   :  { %3499 = vst [vmem:[#allocation31_spill] sm:$0xff] %v2066_v24  ;;  %v2069_v57 = vsel %vm557_vm0, %v494_v16, %v496_v30  ;;  %v2072_v58 = vsel %vm557_vm0, %v496_v30, %v498_v20  ;;  %v384_v20 = vmul.f32 -0.13501102, %v1824_v52 }
  0x85   :  { %3500 = vst [vmem:[#allocation32_spill] sm:$0xff] %v2069_v57  ;;  %v392_v57 = vmul.f32 -0.13501102, %v1951_v37 }
  0x86   :  { %3501 = vst [vmem:[#allocation33_spill] sm:$0xff] %v2072_v58  ;;  %v448_v30 = vadd.f32 %v416_v60, %v384_v20  ;;  %v421_v58 = vmul.f32 -0.4598775, %v1917_v12 }
  0x87   :  { %721 = vrot.lane.b32.xlu2 %v447_v13, %s1558_s7  ;;  %719 = vrot.lane.b32.xlu1 %v446_v23, %s1558_s7  ;;  %v389_v13 = vmul.f32 -0.13501102, %v1912_v11 }
  0x89   :  { %717 = vrot.lane.b32.xlu0 %v445_v21, %s1558_s7  ;;  %v2081_v16 = vpop.permute.xlu2 %527  ;;  %v508_v19 = vpop.permute.xlu1 %507  ;;  %v449_v21 = vadd.f32 %v417_v59, %v385_v51  ;;  %v3508_v51 = vld [vmem:[#allocation16_spill] sm:$0xff] }
  0x8a   :  { %v2087_v61 = vsel %vm557_vm0, %v508_v19, %v2036_v29  ;;  %v419_v59 = vmul.f32 -0.4598775, %v3508_v51 }
  0x8b   :  { %3502 = vst [vmem:[#allocation34_spill] sm:$0xff] %v2087_v61  ;;  %v506_v5 = vpop.permute.xlu0 %505  ;;  %v3505_v61 = vld [vmem:[#allocation13_spill] sm:$0xff] }
  0x8c   :  { %v2091_v23 = vsel %vm557_vm0, %v2021_v39, %v506_v5  ;;  %v2094_v41 = vsel %vm557_vm0, %v506_v5, %v508_v19  ;;  %v388_v9 = vmul.f32 -0.13501102, %v3505_v61  ;;  %v3507_v19 = vld [vmem:[#allocation15_spill] sm:$0xff] }
  0x8d   :  { %3503 = vst [vmem:[#allocation35_spill] sm:$0xff] %v2091_v23  ;;  %v387_v5 = vmul.f32 -0.13501102, %v3507_v19  ;;  %v453_v23 = vadd.f32 %v421_v58, %v389_v13  ;;  %v3513_v58 = vld [vmem:[#allocation18_spill] sm:$0xff] }
  0x8e   :  { %3504 = vst [vmem:[#allocation36_spill] sm:$0xff] %v2094_v41  ;;  %v423_v13 = vmul.f32 -0.4598775, %v3513_v58 }
  0x8f   :  { %727 = vrot.lane.b32.xlu2 %v450_v56, %s1558_s7  ;;  %725 = vrot.lane.b32.xlu1 %v449_v21, %s1558_s7  ;;  %v451_v24 = vadd.f32 %v419_v59, %v387_v5 }
  0x91   :  { %723 = vrot.lane.b32.xlu0 %v448_v30, %s1558_s7  ;;  %v2103_v39 = vpop.permute.xlu2 %533  ;;  %v514_v20 = vpop.permute.xlu1 %513  ;;  %v452_v30 = vadd.f32 %v420_v55, %v388_v9  ;;  %v3515_v9 = vld [vmem:[#allocation20_spill] sm:$0xff] }
  0x92   :  { %v2109_v60 = vsel %vm557_vm0, %v514_v20, %v2047_v40  ;;  %v422_v55 = vmul.f32 -0.4598775, %v3515_v9 }
  0x93   :  { %3509 = vst [vmem:[#allocation15_spill] sm:$0xff] %v2109_v60  ;;  %v512_v56 = vpop.permute.xlu0 %511  ;;  %v3512_v60 = vld [vmem:[#allocation17_spill] sm:$0xff] }
  0x94   :  { %v2113_v21 = vsel %vm557_vm0, %v2036_v29, %v512_v56  ;;  %v2116_v41 = vsel %vm557_vm0, %v512_v56, %v514_v20  ;;  %v391_v61 = vmul.f32 -0.13501102, %v3512_v60  ;;  %v3514_v20 = vld [vmem:[#allocation19_spill] sm:$0xff]  ;;  %v395_v60 = vmul.f32 -0.13501102, %v1980_v7 }
  0x95   :  { %3510 = vst [vmem:[#allocation16_spill] sm:$0xff] %v2113_v21  ;;  %v390_v56 = vmul.f32 -0.13501102, %v3514_v20  ;;  %v456_v21 = vadd.f32 %v424_v54, %v392_v57  ;;  %v3520_v57 = vld [vmem:[#allocation22_spill] sm:$0xff] }
  0x96   :  { %3511 = vst [vmem:[#allocation37_spill] sm:$0xff] %v2116_v41  ;;  %v426_v54 = vmul.f32 -0.4598775, %v3520_v57 }
  0x97   :  { %733 = vrot.lane.b32.xlu2 %v453_v23, %s1558_s7  ;;  %731 = vrot.lane.b32.xlu1 %v452_v30, %s1558_s7  ;;  %v454_v58 = vadd.f32 %v422_v55, %v390_v56 }
  0x99   :  { %729 = vrot.lane.b32.xlu0 %v451_v24, %s1558_s7  ;;  %v2125_v29 = vpop.permute.xlu2 %539  ;;  %v520_v5 = vpop.permute.xlu1 %519  ;;  %v455_v24 = vadd.f32 %v423_v13, %v391_v61  ;;  %v3522_v61 = vld [vmem:[#allocation24_spill] sm:$0xff] }
  0x9a   :  { %v2131_v23 = vsel %vm557_vm0, %v520_v5, %v2058_v28  ;;  %v425_v13 = vmul.f32 -0.4598775, %v3522_v61 }
  0x9b   :  { %3516 = vst [vmem:[#allocation19_spill] sm:$0xff] %v2131_v23  ;;  %v518_v59 = vpop.permute.xlu0 %517  ;;  %v3519_v23 = vld [vmem:[#allocation21_spill] sm:$0xff] }
  0x9c   :  { %v2135_v30 = vsel %vm557_vm0, %v2047_v40, %v518_v59  ;;  %v2138_v41 = vsel %vm557_vm0, %v518_v59, %v520_v5  ;;  %v394_v37 = vmul.f32 -0.13501102, %v3519_v23  ;;  %v3521_v5 = vld [vmem:[#allocation23_spill] sm:$0xff]  ;;  %v845_v23 = vmul.f32 0.33267054, %v1639_v18 }
  0x9d   :  { %3517 = vst [vmem:[#allocation20_spill] sm:$0xff] %v2135_v30  ;;  %v393_v59 = vmul.f32 -0.13501102, %v3521_v5  ;;  %v459_v30 = vadd.f32 %v427_v38, %v395_v60  ;;  %v3524_v38 = vld [vmem:[#allocation3_spill] sm:$0xff] }
  0x9e   :  { %3518 = vst [vmem:[#allocation38_spill] sm:$0xff] %v2138_v41  ;;  %v876_v60 = vmul.f32 0.035226293, %v3524_v38  ;;  %v880_v38 = vmul.f32 0.035226293, %v1588_v1 }
  0x9f   :  { %739 = vrot.lane.b32.xlu2 %v456_v21, %s1558_s7  ;;  %737 = vrot.lane.b32.xlu1 %v455_v24, %s1558_s7  ;;  %v457_v57 = vadd.f32 %v425_v13, %v393_v59 }
  0xa1   :  { %735 = vrot.lane.b32.xlu0 %v454_v58, %s1558_s7  ;;  %v2147_v40 = vpop.permute.xlu2 %545  ;;  %v526_v56 = vpop.permute.xlu1 %525  ;;  %v458_v58 = vadd.f32 %v426_v54, %v394_v37  ;;  %v3525_v37 = vld [vmem:[#allocation27_spill] sm:$0xff] }
  0xa2   :  { %v2153_v21 = vsel %vm557_vm0, %v526_v56, %v2081_v16  ;;  %v428_v54 = vmul.f32 -0.4598775, %v3525_v37 }
  0xa3   :  { %3523 = vst [vmem:[#allocation23_spill] sm:$0xff] %v2153_v21  ;;  %v524_v55 = vpop.permute.xlu0 %523  ;;  %v844_v21 = vmul.f32 0.33267054, %v1605_v6 }
  0xa4   :  { %v2157_v24 = vsel %vm557_vm0, %v2058_v28, %v524_v55  ;;  %v2160_v41 = vsel %vm557_vm0, %v524_v55, %v526_v56  ;;  %v396_v56 = vmul.f32 -0.13501102, %v1970_v42 }
  0xa6   :  { %v460_v55 = vadd.f32 %v428_v54, %v396_v56 }
  0xa7   :  { %745 = vrot.lane.b32.xlu2 %v459_v30, %s1558_s7  ;;  %743 = vrot.lane.b32.xlu1 %v458_v58, %s1558_s7  ;;  %v909_v30 = vadd.f32 %v877_v8, %v845_v23  ;;  %v848_v58 = vmul.f32 0.33267054, %v1583_v0  ;;  %v847_v8 = vmul.f32 0.33267054, %v1629_v15  ;;  %v879_v23 = vmul.f32 0.035226293, %v1634_v17 }
  0xa9   :  { %741 = vrot.lane.b32.xlu0 %v457_v57, %s1558_s7  ;;  %v2169_v28 = vpop.permute.xlu2 %551  ;;  %v532_v59 = vpop.permute.xlu1 %531  ;;  %v908_v57 = vadd.f32 %v876_v60, %v844_v21  ;;  %v846_v21 = vmul.f32 0.33267054, %v1593_v2  ;;  %v3527_v60 = vld [vmem:[#allocation2_spill] sm:$0xff]  ;;  %v851_v2 = vmul.f32 0.33267054, %v1668_v32 }
  0xaa   :  { %v2175_v18 = vsel %vm557_vm0, %v532_v59, %v2103_v39  ;;  %v878_v56 = vmul.f32 0.035226293, %v3527_v60 }
  0xab   :  { %3526 = vst [vmem:[#allocation24_spill] sm:$0xff] %v2175_v18  ;;  %v530_v22 = vpop.permute.xlu0 %529 }
  0xac   :  { %v2179_v6 = vsel %vm557_vm0, %v2081_v16, %v530_v22  ;;  %v2182_v13 = vsel %vm557_vm0, %v530_v22, %v532_v59  ;;  %v912_v59 = vadd.f32 %v880_v38, %v848_v58  ;;  %v911_v22 = vadd.f32 %v879_v23, %v847_v8 }
  0xad   :  { %v882_v58 = vmul.f32 0.035226293, %v1683_v35  ;;  %v849_v38 = vmul.f32 0.33267054, %v1617_v10  ;;  %v881_v8 = vmul.f32 0.035226293, %v1624_v14 }
  0xae   :  { %v854_v10 = vmul.f32 0.33267054, %v1707_v47  ;;  %v886_v14 = vmul.f32 0.035226293, %v1712_v48 }
  0xaf   :  { %1070 = vrot.lane.b32.xlu2 %v909_v30, %s1559_s10  ;;  %1068 = vrot.lane.b32.xlu1 %v908_v57, %s1559_s10  ;;  %v910_v30 = vadd.f32 %v878_v56, %v846_v21  ;;  %v883_v57 = vmul.f32 0.035226293, %v1673_v33  ;;  %v913_v56 = vadd.f32 %v881_v8, %v849_v38  ;;  %v857_v8 = vmul.f32 0.33267054, %v1746_v62 }
  0xb1   :  { %747 = vrot.lane.b32.xlu0 %v460_v55, %s1558_s7  ;;  %v2191_v16 = vpop.permute.xlu2 %685  ;;  %v538_v54 = vpop.permute.xlu1 %537  ;;  %v850_v55 = vmul.f32 0.33267054, %v1678_v34  ;;  %v915_v21 = vadd.f32 %v883_v57, %v851_v2 }
  0xb2   :  { %v2197_v0 = vsel %vm557_vm0, %v538_v54, %v2125_v29 }
  0xb3   :  { %3528 = vst [vmem:[#allocation3_spill] sm:$0xff] %v2197_v0  ;;  %v536_v1 = vpop.permute.xlu0 %535  ;;  %v914_v60 = vadd.f32 %v882_v58, %v850_v55  ;;  %v918_v55 = vadd.f32 %v886_v14, %v854_v10 }
  0xb4   :  { %v2201_v15 = vsel %vm557_vm0, %v2103_v39, %v536_v1  ;;  %v2204_v17 = vsel %vm557_vm0, %v536_v1, %v538_v54  ;;  %v853_v54 = vmul.f32 0.33267054, %v1717_v49  ;;  %v885_v1 = vmul.f32 0.035226293, %v1722_v50 }
  0xb5   :  { %3529 = vst [vmem:[#allocation27_spill] sm:$0xff] %v2201_v15 }
  0xb6   :  { %v917_v58 = vadd.f32 %v885_v1, %v853_v54  ;;  %v859_v1 = vmul.f32 0.33267054, %v1795_v27 }
  0xb7   :  { %1076 = vrot.lane.b32.xlu2 %v912_v59, %s1559_s10  ;;  %1074 = vrot.lane.b32.xlu1 %v911_v22, %s1559_s10  ;;  %v3533_v59 = vld [vmem:[#allocation4_spill] sm:$0xff] }
  0xb8   :  { %v852_v22 = vmul.f32 0.33267054, %v3533_v59  ;;  %v3540_v59 = vld [vmem:[#allocation10_spill] sm:$0xff] }
  0xb9   :  { %1072 = vrot.lane.b32.xlu0 %v910_v30, %s1559_s10  ;;  %v2213_v39 = vpop.permute.xlu2 %691  ;;  %v544_v23 = vpop.permute.xlu1 %543  ;;  %v3534_v30 = vld [vmem:[#allocation5_spill] sm:$0xff] }
  0xba   :  { %v2219_v32 = vsel %vm557_vm0, %v544_v23, %v2147_v40  ;;  %v884_v2 = vmul.f32 0.035226293, %v3534_v30  ;;  %v3541_v30 = vld [vmem:[#allocation6_spill] sm:$0xff] }
  0xbb   :  { %3530 = vst [vmem:[#allocation2_spill] sm:$0xff] %v2219_v32  ;;  %v542_v33 = vpop.permute.xlu0 %541 }
  0xbc   :  { %v2223_v34 = vsel %vm557_vm0, %v2125_v29, %v542_v33  ;;  %v2226_v35 = vsel %vm557_vm0, %v542_v33, %v544_v23  ;;  %v916_v38 = vadd.f32 %v884_v2, %v852_v22  ;;  %v889_v23 = vmul.f32 0.035226293, %v1751_v63 }
  0xbd   :  { %3531 = vst [vmem:[#allocation39_spill] sm:$0xff] %v2223_v34  ;;  %v856_v33 = vmul.f32 0.33267054, %v1756_v3  ;;  %v891_v22 = vmul.f32 0.035226293, %v3540_v59 }
  0xbe   :  { %3532 = vst [vmem:[#allocation40_spill] sm:$0xff] %v2226_v35  ;;  %v921_v62 = vadd.f32 %v889_v23, %v857_v8  ;;  %v858_v2 = vmul.f32 0.33267054, %v3541_v30 }
  0xbf   :  { %1082 = vrot.lane.b32.xlu2 %v915_v21, %s1559_s10  ;;  %1080 = vrot.lane.b32.xlu1 %v914_v60, %s1559_s10  ;;  %v888_v21 = vmul.f32 0.035226293, %v1761_v4  ;;  %v855_v60 = vmul.f32 0.33267054, %v1697_v44  ;;  %v860_v44 = vmul.f32 0.33267054, %v1785_v25  ;;  %v923_v8 = vadd.f32 %v891_v22, %v859_v1 }
  0xc1   :  { %1078 = vrot.lane.b32.xlu0 %v913_v56, %s1559_s10  ;;  %v2235_v29 = vpop.permute.xlu2 %697  ;;  %v550_v57 = vpop.permute.xlu1 %549  ;;  %v887_v56 = vmul.f32 0.035226293, %v1702_v45  ;;  %v920_v4 = vadd.f32 %v888_v21, %v856_v33  ;;  %v892_v45 = vmul.f32 0.035226293, %v1790_v26  ;;  %v863_v33 = vmul.f32 0.33267054, %v1824_v52 }
  0xc2   :  { %v2241_v47 = vsel %vm557_vm0, %v550_v57, %v2169_v28  ;;  %v895_v21 = vmul.f32 0.035226293, %v1829_v53 }
  0xc3   :  { %3535 = vst [vmem:[#allocation4_spill] sm:$0xff] %v2241_v47  ;;  %v548_v48 = vpop.permute.xlu0 %547  ;;  %v919_v54 = vadd.f32 %v887_v56, %v855_v60  ;;  %v3546_v60 = vld [vmem:[#allocation11_spill] sm:$0xff] }
  0xc4   :  { %v2245_v49 = vsel %vm557_vm0, %v2147_v40, %v548_v48  ;;  %v2248_v50 = vsel %vm557_vm0, %v548_v48, %v550_v57  ;;  %v3542_v57 = vld [vmem:[#allocation7_spill] sm:$0xff]  ;;  %v862_v56 = vmul.f32 0.33267054, %v3546_v60  ;;  %v927_v59 = vadd.f32 %v895_v21, %v863_v33 }
  0xc5   :  { %3536 = vst [vmem:[#allocation5_spill] sm:$0xff] %v2245_v49  ;;  %v890_v48 = vmul.f32 0.035226293, %v3542_v57 }
  0xc6   :  { %3537 = vst [vmem:[#allocation41_spill] sm:$0xff] %v2248_v50 }
  0xc7   :  { %1088 = vrot.lane.b32.xlu2 %v918_v55, %s1559_s10  ;;  %1086 = vrot.lane.b32.xlu1 %v917_v58, %s1559_s10  ;;  %v924_v58 = vadd.f32 %v892_v45, %v860_v44  ;;  %v922_v23 = vadd.f32 %v890_v48, %v858_v2  ;;  %v3549_v44 = vld [vmem:[#allocation9_spill] sm:$0xff]  ;;  %v866_v48 = vmul.f32 0.33267054, %v3507_v19 }
  0xc8   :  { %v893_v45 = vmul.f32 0.035226293, %v3549_v44  ;;  %v3557_v44 = vld [vmem:[#allocation14_spill] sm:$0xff] }
  0xc9   :  { %1084 = vrot.lane.b32.xlu0 %v916_v38, %s1559_s10  ;;  %v2257_v40 = vpop.permute.xlu2 %703  ;;  %v2261_v10 = vpop.permute.xlu1 %555 }
  0xcb   :  { %v554_v14 = vpop.permute.xlu0 %553 }
  0xcc   :  { %v2265_v63 = vsel %vm557_vm0, %v2169_v28, %v554_v14  ;;  %v2269_v3 = vsel %vm557_vm0, %v554_v14, %v2261_v10  ;;  %v3547_v14 = vld [vmem:[#allocation12_spill] sm:$0xff] }
  0xcd   :  { %3538 = vst [vmem:[#allocation42_spill] sm:$0xff] %v2265_v63 }
  0xce   :  { %3539 = vst [vmem:[#allocation43_spill] sm:$0xff] %v2269_v3 }
  0xcf   :  { %1094 = vrot.lane.b32.xlu2 %v921_v62, %s1559_s10  ;;  %1092 = vrot.lane.b32.xlu1 %v920_v4, %s1559_s10  ;;  %v894_v62 = vmul.f32 0.035226293, %v3547_v14  ;;  %v3548_v4 = vld [vmem:[#allocation8_spill] sm:$0xff]  ;;  %v868_v14 = vmul.f32 0.33267054, %v1912_v11 }
  0xd1   :  { %1090 = vrot.lane.b32.xlu0 %v919_v54, %s1559_s10  ;;  %v2278_v28 = vpop.permute.xlu2 %709  ;;  %v690_v55 = vpop.permute.xlu1 %689  ;;  %v861_v54 = vmul.f32 0.33267054, %v3548_v4  ;;  %v926_v2 = vadd.f32 %v894_v62, %v862_v56  ;;  %v900_v62 = vmul.f32 0.035226293, %v1917_v12  ;;  %v3556_v4 = vld [vmem:[#allocation13_spill] sm:$0xff] }
  0xd2   :  { %v2284_v25 = vsel %vm557_vm0, %v690_v55, %v2213_v39 }
  0xd3   :  { %3543 = vst [vmem:[#allocation10_spill] sm:$0xff] %v2284_v25  ;;  %v688_v26 = vpop.permute.xlu0 %687  ;;  %v925_v57 = vadd.f32 %v893_v45, %v861_v54  ;;  %v867_v54 = vmul.f32 0.33267054, %v3556_v4  ;;  %v899_v45 = vmul.f32 0.035226293, %v3557_v44 }
  0xd4   :  { %v2288_v27 = vsel %vm557_vm0, %v2191_v16, %v688_v26  ;;  %v2291_v38 = vsel %vm557_vm0, %v688_v26, %v690_v55  ;;  %v898_v55 = vmul.f32 0.035226293, %v3508_v51  ;;  %v865_v26 = vmul.f32 0.33267054, %v1873_v31 }
  0xd5   :  { %3544 = vst [vmem:[#allocation6_spill] sm:$0xff] %v2288_v27  ;;  %v875_v4 = vmul.f32 0.33267054, %v1970_v42  ;;  %v874_v44 = vmul.f32 0.33267054, %v1980_v7 }
  0xd6   :  { %3545 = vst [vmem:[#allocation7_spill] sm:$0xff] %v2291_v38  ;;  %v930_v21 = vadd.f32 %v898_v55, %v866_v48  ;;  %v904_v48 = vmul.f32 0.035226293, %v3522_v61  ;;  %v3561_v55 = vld [vmem:[#allocation25_spill] sm:$0xff]  ;;  %v2617_v38 = vld [vmem:[%s3387_s0 + $0x70] sm:$0xff] }
  0xd7   :  { %1100 = vrot.lane.b32.xlu2 %v924_v58, %s1559_s10  ;;  %1098 = vrot.lane.b32.xlu1 %v923_v8, %s1559_s10  ;;  %v897_v58 = vmul.f32 0.035226293, %v1878_v36  ;;  %v864_v8 = vmul.f32 0.33267054, %v1814_v43  ;;  %v869_v43 = vmul.f32 0.33267054, %v3514_v20 }
  0xd8   :  { %3610 = vst [vmem:[#allocation82_spill] sm:$0xff] %v2617_v38 }
  0xd9   :  { %1096 = vrot.lane.b32.xlu0 %v922_v23, %s1559_s10  ;;  %v2300_v16 = vpop.permute.xlu2 %715  ;;  %v696_v1 = vpop.permute.xlu1 %695  ;;  %v896_v23 = vmul.f32 0.035226293, %v1819_v46  ;;  %v929_v60 = vadd.f32 %v897_v58, %v865_v26  ;;  %v901_v46 = vmul.f32 0.035226293, %v3515_v9  ;;  %v871_v26 = vmul.f32 0.33267054, %v3561_v55 }
  0xda   :  { %v2306_v52 = vsel %vm557_vm0, %v696_v1, %v2235_v29  ;;  %v3562_v58 = vld [vmem:[#allocation26_spill] sm:$0xff] }
  0xdb   :  { %3550 = vst [vmem:[#allocation11_spill] sm:$0xff] %v2306_v52  ;;  %v694_v53 = vpop.permute.xlu0 %693  ;;  %v928_v56 = vadd.f32 %v896_v23, %v864_v8  ;;  %v903_v8 = vmul.f32 0.035226293, %v3562_v58  ;;  %v3563_v23 = vld [vmem:[#allocation17_spill] sm:$0xff] }
  0xdc   :  { %v2310_v22 = vsel %vm557_vm0, %v2213_v39, %v694_v53  ;;  %v2313_v30 = vsel %vm557_vm0, %v694_v53, %v696_v1  ;;  %v933_v53 = vadd.f32 %v901_v46, %v869_v43 }
  0xdd   :  { %3551 = vst [vmem:[#allocation12_spill] sm:$0xff] %v2310_v22 }
  0xde   :  { %3552 = vst [vmem:[#allocation8_spill] sm:$0xff] %v2313_v30 }
  0xdf   :  { %1106 = vrot.lane.b32.xlu2 %v927_v59, %s1559_s10  ;;  %1104 = vrot.lane.b32.xlu1 %v926_v2, %s1559_s10  ;;  %v932_v59 = vadd.f32 %v900_v62, %v868_v14  ;;  %v931_v2 = vadd.f32 %v899_v45, %v867_v54  ;;  %v935_v14 = vadd.f32 %v903_v8, %v871_v26  ;;  %v907_v54 = vmul.f32 0.035226293, %v3525_v37  ;;  %v3568_v45 = vld [vmem:[#allocation28_spill] sm:$0xff] }
  0xe0   :  { %v2407_v8 = vld [vmem:[%s3387_s0 + $0x10] sm:$0xff] }
  0xe1   :  { %1102 = vrot.lane.b32.xlu0 %v925_v57, %s1559_s10  ;;  %v2322_v39 = vpop.permute.xlu2 %721  ;;  %v702_v33 = vpop.permute.xlu1 %701  ;;  %v872_v57 = vmul.f32 0.33267054, %v3521_v5 }
  0xe2   :  { %v2328_v19 = vsel %vm557_vm0, %v702_v33, %v2257_v40 }
  0xe3   :  { %3553 = vst [vmem:[#allocation9_spill] sm:$0xff] %v2328_v19  ;;  %v700_v51 = vpop.permute.xlu0 %699  ;;  %v2563_v19 = vld [vmem:[%s3387_s0 + $0x58] sm:$0xff] }
  0xe4   :  { %v2332_v31 = vsel %vm557_vm0, %v2235_v29, %v700_v51  ;;  %v2335_v36 = vsel %vm557_vm0, %v700_v51, %v702_v33  ;;  %v870_v33 = vmul.f32 0.33267054, %v3563_v23  ;;  %v3564_v51 = vld [vmem:[#allocation18_spill] sm:$0xff]  ;;  %v942_v23 = vmul.f32 0.8068915, %v2407_v8  ;;  %3601 = vst [vmem:[#allocation73_spill] sm:$0xff] %v2563_v19 }
  0xe5   :  { %3554 = vst [vmem:[#allocation44_spill] sm:$0xff] %v2332_v31 }
  0xe6   :  { %3555 = vst [vmem:[#allocation45_spill] sm:$0xff] %v2335_v36 }
  0xe7   :  { %1112 = vrot.lane.b32.xlu2 %v930_v21, %s1559_s10  ;;  %1110 = vrot.lane.b32.xlu1 %v929_v60, %s1559_s10  ;;  %v902_v21 = vmul.f32 0.035226293, %v3564_v51  ;;  %v2420_v51 = vld [vmem:[%s3387_s0 + $0x8] sm:$0xff] }
  0xe8   :  { %3576 = vst [vmem:[#allocation48_spill] sm:$0xff] %v2420_v51  ;;  %v78_v63 = vmul.f32 -0.08544128, %v2420_v51 }
  0xe9   :  { %1108 = vrot.lane.b32.xlu0 %v928_v56, %s1559_s10  ;;  %v2344_v29 = vpop.permute.xlu2 %727  ;;  %v708_v1 = vpop.permute.xlu1 %707  ;;  %v936_v56 = vadd.f32 %v904_v48, %v872_v57  ;;  %v934_v62 = vadd.f32 %v902_v21, %v870_v33  ;;  %v939_v48 = vadd.f32 %v907_v54, %v875_v4  ;;  %v2413_v33 = vld [vmem:[%s3388_s1 + $0x10] sm:$0xff]  ;;  %v941_v21 = vmul.f32 0.8068915, %v2420_v51  ;;  %v2441_v4 = vld [vmem:[%s3388_s1] sm:$0xff] }
  0xea   :  { %v2350_v20 = vsel %vm557_vm0, %v708_v1, %v2278_v28  ;;  %3575 = vst [vmem:[#allocation47_spill] sm:$0xff] %v2413_v33  ;;  %v972_v54 = vmul.f32 0.08544128, %v2441_v4 }
  0xeb   :  { %3558 = vst [vmem:[#allocation13_spill] sm:$0xff] %v2350_v20  ;;  %v706_v9 = vpop.permute.xlu0 %705 }
  0xec   :  { %v2354_v11 = vsel %vm557_vm0, %v2257_v40, %v706_v9  ;;  %v2357_v12 = vsel %vm557_vm0, %v706_v9, %v708_v1  ;;  %v906_v1 = vmul.f32 0.035226293, %v3568_v45  ;;  %v3569_v9 = vld [vmem:[#allocation21_spill] sm:$0xff]  ;;  %3579 = vst [vmem:[#allocation51_spill] sm:$0xff] %v2441_v4 }
  0xed   :  { %3559 = vst [vmem:[#allocation14_spill] sm:$0xff] %v2354_v11 }
  0xee   :  { %3560 = vst [vmem:[#allocation46_spill] sm:$0xff] %v2357_v12  ;;  %v938_v26 = vadd.f32 %v906_v1, %v874_v44 }
  0xef   :  { %1118 = vrot.lane.b32.xlu2 %v933_v53, %s1559_s10  ;;  %1116 = vrot.lane.b32.xlu1 %v932_v59, %s1559_s10  ;;  %v873_v53 = vmul.f32 0.33267054, %v3569_v9  ;;  %v3570_v59 = vld [vmem:[#allocation22_spill] sm:$0xff] }
  0xf0   :  { %3574 = vst [vmem:[#allocation22_spill] sm:$0xff] %v2407_v8 }
  0xf1   :  { %1114 = vrot.lane.b32.xlu0 %v931_v2, %s1559_s10  ;;  %v2366_v40 = vpop.permute.xlu2 %733  ;;  %v714_v60 = vpop.permute.xlu1 %713  ;;  %v905_v2 = vmul.f32 0.035226293, %v3570_v59 }
  0xf2   :  { %v2372_v5 = vsel %vm557_vm0, %v714_v60, %v2300_v16 }
  0xf3   :  { %3565 = vst [vmem:[#allocation25_spill] sm:$0xff] %v2372_v5  ;;  %v712_v61 = vpop.permute.xlu0 %711  ;;  %v937_v58 = vadd.f32 %v905_v2, %v873_v53  ;;  %v2511_v5 = vld [vmem:[%s3387_s0 + $0x40] sm:$0xff] }
  0xf4   :  { %v2376_v43 = vsel %vm557_vm0, %v2278_v28, %v712_v61  ;;  %v2379_v46 = vsel %vm557_vm0, %v712_v61, %v714_v60  ;;  %v2426_v60 = vld [vmem:[%s3388_s1 + $0x8] sm:$0xff]  ;;  %3592 = vst [vmem:[#allocation64_spill] sm:$0xff] %v2511_v5 }
  0xf5   :  { %3566 = vst [vmem:[#allocation26_spill] sm:$0xff] %v2376_v43  ;;  %v973_v61 = vmul.f32 0.08544128, %v2426_v60  ;;  %v110_v47 = vmul.f32 0.8068915, %v2426_v60 }
  0xf6   :  { %3567 = vst [vmem:[#allocation17_spill] sm:$0xff] %v2379_v46 }
  0xf7   :  { %1124 = vrot.lane.b32.xlu2 %v936_v56, %s1559_s10  ;;  %1122 = vrot.lane.b32.xlu1 %v935_v14, %s1559_s10  ;;  %3577 = vst [vmem:[#allocation49_spill] sm:$0xff] %v2426_v60  ;;  %v2435_v14 = vld [vmem:[%s3387_s0] sm:$0xff]  ;;  %v1005_v2 = vadd.f32 %v973_v61, %v941_v21 }
  0xf8   :  { %3578 = vst [vmem:[#allocation50_spill] sm:$0xff] %v2435_v14 }
  0xf9   :  { %1120 = vrot.lane.b32.xlu0 %v934_v62, %s1559_s10  ;;  %v2388_v28 = vpop.permute.xlu2 %739  ;;  %v720_v57 = vpop.permute.xlu1 %719  ;;  %v940_v62 = vmul.f32 0.8068915, %v2435_v14 }
  0xfa   :  { %v2394_v42 = vsel %vm557_vm0, %v720_v57, %v2322_v39 }
  0xfb   :  { %3571 = vst [vmem:[#allocation18_spill] sm:$0xff] %v2394_v42  ;;  %v718_v37 = vpop.permute.xlu0 %717 }
  0xfc   :  { %v2398_v7 = vsel %vm557_vm0, %v2300_v16, %v718_v37  ;;  %v2401_v55 = vsel %vm557_vm0, %v718_v37, %v720_v57  ;;  %v974_v16 = vmul.f32 0.08544128, %v2413_v33  ;;  %v1004_v57 = vadd.f32 %v972_v54, %v940_v62  ;;  %v2459_v37 = vld [vmem:[%s3387_s0 + $0x28] sm:$0xff]  ;;  %v2487_v62 = vld [vmem:[%s3387_s0 + $0x18] sm:$0xff] }
  0xfd   :  { %3572 = vst [vmem:[#allocation28_spill] sm:$0xff] %v2398_v7  ;;  %v943_v54 = vmul.f32 0.8068915, %v2487_v62 }
  0xfe   :  { %3573 = vst [vmem:[#allocation21_spill] sm:$0xff] %v2401_v55  ;;  %v1006_v9 = vadd.f32 %v974_v16, %v942_v23  ;;  %v2478_v16 = vld [vmem:[%s3388_s1 + $0x20] sm:$0xff] }
  0xff   :  { %1130 = vrot.lane.b32.xlu2 %v939_v48, %s1559_s10  ;;  %1128 = vrot.lane.b32.xlu1 %v938_v26, %s1559_s10  ;;  %3583 = vst [vmem:[#allocation55_spill] sm:$0xff] %v2459_v37  ;;  %v945_v48 = vmul.f32 0.8068915, %v2459_v37  ;;  %v2465_v26 = vld [vmem:[%s3388_s1 + $0x28] sm:$0xff]  ;;  %v976_v21 = vmul.f32 0.08544128, %v2478_v16 }
 0x100   :  { %3584 = vst [vmem:[#allocation56_spill] sm:$0xff] %v2465_v26 }
 0x101   :  { %1126 = vrot.lane.b32.xlu0 %v937_v58, %s1559_s10  ;;  %v2430_v56 = vpop.permute.xlu2 %745  ;;  %v726_v44 = vpop.permute.xlu1 %725  ;;  %v2472_v58 = vld [vmem:[%s3387_s0 + $0x20] sm:$0xff]  ;;  %3586 = vst [vmem:[#allocation58_spill] sm:$0xff] %v2478_v16 }
 0x102   :  { %v2446_v45 = vsel %vm557_vm0, %v726_v44, %v2344_v29  ;;  %3585 = vst [vmem:[#allocation57_spill] sm:$0xff] %v2472_v58  ;;  %v944_v23 = vmul.f32 0.8068915, %v2472_v58 }
 0x103   :  { %3580 = vst [vmem:[#allocation52_spill] sm:$0xff] %v2446_v45  ;;  %v724_v1 = vpop.permute.xlu0 %723 }
 0x104   :  { %v2450_v53 = vsel %vm557_vm0, %v2322_v39, %v724_v1  ;;  %v2453_v59 = vsel %vm557_vm0, %v724_v1, %v726_v44  ;;  %v977_v39 = vmul.f32 0.08544128, %v2465_v26  ;;  %3587 = vst [vmem:[#allocation59_spill] sm:$0xff] %v2487_v62  ;;  %v2493_v44 = vld [vmem:[%s3388_s1 + $0x18] sm:$0xff] }
 0x105   :  { %3581 = vst [vmem:[#allocation53_spill] sm:$0xff] %v2450_v53  ;;  %v975_v1 = vmul.f32 0.08544128, %v2493_v44 }
 0x106   :  { %3582 = vst [vmem:[#allocation54_spill] sm:$0xff] %v2453_v59  ;;  %v1009_v45 = vadd.f32 %v977_v39, %v945_v48  ;;  %v1008_v59 = vadd.f32 %v976_v21, %v944_v23  ;;  %v2517_v48 = vld [vmem:[%s3388_s1 + $0x40] sm:$0xff]  ;;  %v2530_v23 = vld [vmem:[%s3388_s1 + $0x38] sm:$0xff] }
 0x107   :  { %1264 = vrot.lane.b32.xlu2 %v1006_v9, %s1559_s10  ;;  %1262 = vrot.lane.b32.xlu1 %v1005_v2, %s1559_s10  ;;  %3588 = vst [vmem:[#allocation60_spill] sm:$0xff] %v2493_v44  ;;  %v1007_v7 = vadd.f32 %v975_v1, %v943_v54  ;;  %v979_v21 = vmul.f32 0.08544128, %v2530_v23 }
 0x108   :  { %3593 = vst [vmem:[#allocation65_spill] sm:$0xff] %v2517_v48 }
 0x109   :  { %1260 = vrot.lane.b32.xlu0 %v1004_v57, %s1559_s10  ;;  %v2482_v61 = vpop.permute.xlu2 %1070  ;;  %v732_v9 = vpop.permute.xlu1 %731  ;;  %3595 = vst [vmem:[#allocation67_spill] sm:$0xff] %v2530_v23 }
 0x10a   :  { %v2498_v2 = vsel %vm557_vm0, %v732_v9, %v2366_v40 }
 0x10b   :  { %3589 = vst [vmem:[#allocation61_spill] sm:$0xff] %v2498_v2  ;;  %v730_v57 = vpop.permute.xlu0 %729  ;;  %v948_v2 = vmul.f32 0.8068915, %v2511_v5 }
 0x10c   :  { %v2502_v53 = vsel %vm557_vm0, %v2344_v29, %v730_v57  ;;  %v2505_v42 = vsel %vm557_vm0, %v730_v57, %v732_v9  ;;  %v980_v29 = vmul.f32 0.08544128, %v2517_v48  ;;  %v2545_v9 = vld [vmem:[%s3388_s1 + $0x30] sm:$0xff] }
 0x10d   :  { %3590 = vst [vmem:[#allocation62_spill] sm:$0xff] %v2502_v53  ;;  %v978_v57 = vmul.f32 0.08544128, %v2545_v9 }
 0x10e   :  { %3591 = vst [vmem:[#allocation63_spill] sm:$0xff] %v2505_v42  ;;  %v1012_v55 = vadd.f32 %v980_v29, %v948_v2  ;;  %v2569_v2 = vld [vmem:[%s3388_s1 + $0x58] sm:$0xff] }
 0x10f   :  { %1270 = vrot.lane.b32.xlu2 %v1009_v45, %s1559_s10  ;;  %1268 = vrot.lane.b32.xlu1 %v1008_v59, %s1559_s10  ;;  %v2524_v45 = vld [vmem:[%s3387_s0 + $0x38] sm:$0xff]  ;;  %v2539_v59 = vld [vmem:[%s3387_s0 + $0x30] sm:$0xff]  ;;  %3597 = vst [vmem:[#allocation69_spill] sm:$0xff] %v2545_v9 }
 0x110   :  { %3594 = vst [vmem:[#allocation66_spill] sm:$0xff] %v2524_v45  ;;  %v947_v39 = vmul.f32 0.8068915, %v2524_v45  ;;  %v946_v1 = vmul.f32 0.8068915, %v2539_v59 }
 0x111   :  { %1266 = vrot.lane.b32.xlu0 %v1007_v7, %s1559_s10  ;;  %v2534_v54 = vpop.permute.xlu2 %1076  ;;  %3596 = vst [vmem:[#allocation68_spill] sm:$0xff] %v2539_v59  ;;  %v738_v53 = vpop.permute.xlu1 %737 }
 0x112   :  { %v2550_v7 = vsel %vm557_vm0, %v738_v53, %v2388_v28  ;;  %v1011_v46 = vadd.f32 %v979_v21, %v947_v39  ;;  %v1010_v11 = vadd.f32 %v978_v57, %v946_v1  ;;  %3602 = vst [vmem:[#allocation74_spill] sm:$0xff] %v2569_v2  ;;  %v2597_v1 = vld [vmem:[%s3388_s1 + $0x48] sm:$0xff] }
 0x113   :  { %3598 = vst [vmem:[#allocation70_spill] sm:$0xff] %v2550_v7  ;;  %v736_v42 = vpop.permute.xlu0 %735  ;;  %v951_v7 = vmul.f32 0.8068915, %v2563_v19  ;;  %v981_v57 = vmul.f32 0.08544128, %v2597_v1 }
 0x114   :  { %v2554_v43 = vsel %vm557_vm0, %v2366_v40, %v736_v42  ;;  %v2557_v20 = vsel %vm557_vm0, %v736_v42, %v738_v53  ;;  %v983_v40 = vmul.f32 0.08544128, %v2569_v2  ;;  %v2576_v42 = vld [vmem:[%s3387_s0 + $0x50] sm:$0xff]  ;;  %3606 = vst [vmem:[#allocation78_spill] sm:$0xff] %v2597_v1 }
 0x115   :  { %3599 = vst [vmem:[#allocation71_spill] sm:$0xff] %v2554_v43  ;;  %v2582_v53 = vld [vmem:[%s3388_s1 + $0x50] sm:$0xff]  ;;  %v109_v43 = vmul.f32 0.8068915, %v2441_v4 }
 0x116   :  { %3600 = vst [vmem:[#allocation72_spill] sm:$0xff] %v2557_v20  ;;  %v982_v29 = vmul.f32 0.08544128, %v2582_v53  ;;  %v1015_v52 = vadd.f32 %v983_v40, %v951_v7  ;;  %v80_v40 = vmul.f32 -0.08544128, %v2487_v62 }
 0x117   :  { %1276 = vrot.lane.b32.xlu2 %v1012_v55, %s1559_s10  ;;  %1274 = vrot.lane.b32.xlu1 %v1011_v46, %s1559_s10  ;;  %3603 = vst [vmem:[#allocation75_spill] sm:$0xff] %v2576_v42  ;;  %v950_v55 = vmul.f32 0.8068915, %v2576_v42  ;;  %v2591_v46 = vld [vmem:[%s3387_s0 + $0x48] sm:$0xff] }
 0x118   :  { %3604 = vst [vmem:[#allocation76_spill] sm:$0xff] %v2582_v53  ;;  %v949_v21 = vmul.f32 0.8068915, %v2591_v46 }
 0x119   :  { %1272 = vrot.lane.b32.xlu0 %v1010_v11, %s1559_s10  ;;  %v2586_v39 = vpop.permute.xlu2 %1082  ;;  %3605 = vst [vmem:[#allocation77_spill] sm:$0xff] %v2591_v46  ;;  %v77_v11 = vmul.f32 -0.08544128, %v2435_v14  ;;  %v744_v20 = vpop.permute.xlu1 %743  ;;  %v1014_v25 = vadd.f32 %v982_v29, %v950_v55  ;;  %v2646_v55 = vld [vmem:[%s3387_s0 + $0x60] sm:$0xff] }
 0x11a   :  { %v2604_v12 = vsel %vm557_vm0, %v744_v20, %v2430_v56  ;;  %v1013_v30 = vadd.f32 %v981_v57, %v949_v21  ;;  %3614 = vst [vmem:[#allocation86_spill] sm:$0xff] %v2646_v55  ;;  %v952_v29 = vmul.f32 0.8068915, %v2646_v55  ;;  %v2652_v21 = vld [vmem:[%s3388_s1 + $0x60] sm:$0xff] }
 0x11b   :  { %3607 = vst [vmem:[#allocation79_spill] sm:$0xff] %v2604_v12  ;;  %v742_v31 = vpop.permute.xlu0 %741  ;;  %v141_v27 = vadd.f32 %v109_v43, %v77_v11  ;;  %v954_v12 = vmul.f32 0.8068915, %v2617_v38  ;;  %v2636_v43 = vld [vmem:[%s3388_s1 + $0x68] sm:$0xff]  ;;  %v984_v57 = vmul.f32 0.08544128, %v2652_v21 }
 0x11c   :  { %v2608_v36 = vsel %vm557_vm0, %v2388_v28, %v742_v31  ;;  %v2611_v22 = vsel %vm557_vm0, %v742_v31, %v744_v20  ;;  %v2623_v28 = vld [vmem:[%s3388_s1 + $0x70] sm:$0xff]  ;;  %3613 = vst [vmem:[#allocation85_spill] sm:$0xff] %v2636_v43  ;;  %v985_v7 = vmul.f32 0.08544128, %v2636_v43  ;;  %v111_v11 = vmul.f32 0.8068915, %v2413_v33 }
 0x11d   :  { %3608 = vst [vmem:[#allocation80_spill] sm:$0xff] %v2608_v36  ;;  %v986_v31 = vmul.f32 0.08544128, %v2623_v28  ;;  %v79_v36 = vmul.f32 -0.08544128, %v2407_v8  ;;  %v1016_v33 = vadd.f32 %v984_v57, %v952_v29  ;;  %v3623_v57 = vld [vmem:[#allocation31_spill] sm:$0xff] }
 0x11e   :  { %3609 = vst [vmem:[#allocation81_spill] sm:$0xff] %v2611_v22  ;;  %v3616_v22 = vld [vmem:[#allocation32_spill] sm:$0xff] }
 0x11f   :  { %1282 = vrot.lane.b32.xlu2 %v1015_v52, %s1559_s10  ;;  %3611 = vst [vmem:[#allocation83_spill] sm:$0xff] %v2623_v28  ;;  %1280 = vrot.lane.b32.xlu1 %v1014_v25, %s1559_s10  ;;  %v2630_v52 = vld [vmem:[%s3387_s0 + $0x68] sm:$0xff]  ;;  %v621_v62 = vadd.f32 %v3616_v22, %v141_v27  ;;  %v1018_v49 = vadd.f32 %v986_v31, %v954_v12  ;;  %v113_v27 = vmul.f32 0.8068915, %v2478_v16  ;;  %v82_v31 = vmul.f32 -0.08544128, %v2459_v37 }
 0x120   :  { %3612 = vst [vmem:[#allocation84_spill] sm:$0xff] %v2630_v52  ;;  %v953_v20 = vmul.f32 0.8068915, %v2630_v52  ;;  %v143_v60 = vadd.f32 %v111_v11, %v79_v36  ;;  %v2678_v12 = vld [vmem:[%s3387_s0 + $0x88] sm:$0xff]  ;;  %v3624_v37 = vld [vmem:[#allocation30_spill] sm:$0xff] }
 0x121   :  { %1278 = vrot.lane.b32.xlu0 %v1013_v30, %s1559_s10  ;;  %v2641_v25 = vpop.permute.xlu2 %1088  ;;  %3615 = vst [vmem:[#allocation87_spill] sm:$0xff] %v2652_v21  ;;  %v112_v30 = vmul.f32 0.8068915, %v2493_v44  ;;  %v1069_v14 = vpop.permute.xlu1 %1068 }
 0x122   :  { %v1133_v4 = vsel %vm1132_vm1, %v1069_v14, %v2482_v61  ;;  %v1017_v8 = vadd.f32 %v985_v7, %v953_v20  ;;  %v142_v14 = vadd.f32 %v110_v47, %v78_v63  ;;  %3619 = vst [vmem:[#allocation89_spill] sm:$0xff] %v2678_v12  ;;  %v2692_v47 = vld [vmem:[%s3387_s0 + $0x80] sm:$0xff]  ;;  %v623_v16 = vadd.f32 %v3624_v37, %v143_v60 }
 0x123   :  { %v2663_v3 = vpop.permute.xlu0 %747  ;;  %v1196_v32 = vadd.f32 %v1133_v4, %v621_v62  ;;  %v144_v22 = vadd.f32 %v112_v30, %v80_v40  ;;  %v2684_v4 = vld [vmem:[%s3388_s1 + $0x88] sm:$0xff]  ;;  %v2698_v63 = vld [vmem:[%s3388_s1 + $0x80] sm:$0xff]  ;;  %v2714_v40 = vld [vmem:[%s3388_s1 + $0x78] sm:$0xff]  ;;  %v114_v30 = vmul.f32 0.8068915, %v2465_v26 }
 0x124   :  { %3617 = vst [vmem:[#allocation32_spill] sm:$0xff] %v2663_v3  ;;  %v2668_v44 = vsel %vm557_vm0, %v2430_v56, %v2663_v3  ;;  %v957_v56 = vmul.f32 0.8068915, %v2678_v12  ;;  %v989_v62 = vmul.f32 0.08544128, %v2684_v4 }
 0x125   :  { %3618 = vst [vmem:[#allocation88_spill] sm:$0xff] %v2668_v44  ;;  %v988_v36 = vmul.f32 0.08544128, %v2698_v63  ;;  %v987_v29 = vmul.f32 0.08544128, %v2714_v40  ;;  %v624_v11 = vadd.f32 %v3623_v57, %v144_v22 }
 0x126   :  { %1419 = vst [vmem:[%s3389_s2] sm:$0xff] %v1196_v32  ;;  %v81_v32 = vmul.f32 -0.08544128, %v2472_v58  ;;  %v115_v44 = vmul.f32 0.8068915, %v2545_v9  ;;  %v3625_v58 = vld [vmem:[#allocation33_spill] sm:$0xff]  ;;  %v1021_v0 = vadd.f32 %v989_v62, %v957_v56  ;;  %v2778_v56 = vld [vmem:[%s3388_s1 + $0x90] sm:$0xff] }
 0x127   :  { %1288 = vrot.lane.b32.xlu2 %v1018_v49, %s1559_s10  ;;  %3620 = vst [vmem:[#allocation90_spill] sm:$0xff] %v2684_v4  ;;  %1286 = vrot.lane.b32.xlu1 %v1017_v8, %s1559_s10  ;;  %v956_v49 = vmul.f32 0.8068915, %v2692_v47  ;;  %v2708_v8 = vld [vmem:[%s3387_s0 + $0x78] sm:$0xff]  ;;  %v622_v51 = vadd.f32 %v3625_v58, %v142_v14  ;;  %v84_v60 = vmul.f32 -0.08544128, %v2524_v45  ;;  %v146_v58 = vadd.f32 %v114_v30, %v82_v31 }
 0x128   :  { %3621 = vst [vmem:[#allocation91_spill] sm:$0xff] %v2708_v8  ;;  %v955_v7 = vmul.f32 0.8068915, %v2708_v8  ;;  %v145_v26 = vadd.f32 %v113_v27, %v81_v32  ;;  %v2772_v27 = vld [vmem:[%s3387_s0 + $0x90] sm:$0xff]  ;;  %v90_v45 = vmul.f32 -0.08544128, %v2630_v52 }
 0x129   :  { %1284 = vrot.lane.b32.xlu0 %v1016_v33, %s1559_s10  ;;  %v2703_v20 = vpop.permute.xlu2 %1094  ;;  %3622 = vst [vmem:[#allocation92_spill] sm:$0xff] %v2714_v40  ;;  %v83_v33 = vmul.f32 -0.08544128, %v2539_v59  ;;  %v1075_v3 = vpop.permute.xlu1 %1074  ;;  %v1020_v59 = vadd.f32 %v988_v36, %v956_v49  ;;  %v958_v14 = vmul.f32 0.8068915, %v2772_v27  ;;  %v3629_v62 = vld [vmem:[#allocation36_spill] sm:$0xff] }
 0x12a   :  { %v1136_v50 = vsel %vm1132_vm1, %v1075_v3, %v2534_v54  ;;  %v1019_v18 = vadd.f32 %v987_v29, %v955_v7  ;;  %3627 = vst [vmem:[#allocation31_spill] sm:$0xff] %v2772_v27  ;;  %v86_v49 = vmul.f32 -0.08544128, %v2591_v46  ;;  %v118_v36 = vmul.f32 0.8068915, %v2597_v1  ;;  %v3630_v7 = vld [vmem:[#allocation35_spill] sm:$0xff] }
 0x12b   :  { %v1073_v34 = vpop.permute.xlu0 %1072  ;;  %v1199_v35 = vadd.f32 %v1136_v50, %v624_v11  ;;  %v147_v37 = vadd.f32 %v115_v44, %v83_v33  ;;  %3628 = vst [vmem:[#allocation30_spill] sm:$0xff] %v2778_v56  ;;  %v626_v29 = vadd.f32 %v3630_v7, %v146_v58  ;;  %v117_v11 = vmul.f32 0.8068915, %v2517_v48 }
 0x12c   :  { %v1134_v22 = vsel %vm1132_vm1, %v2482_v61, %v1073_v34  ;;  %v1135_v57 = vsel %vm1132_vm1, %v1073_v34, %v1075_v3  ;;  %v2739_v34 = vld [vmem:[%s3387_s0 + $0xa0] sm:$0xff]  ;;  %v3626_v61 = vld [vmem:[#allocation29_spill] sm:$0xff]  ;;  %v119_v58 = vmul.f32 0.8068915, %v2582_v53  ;;  %v150_v7 = vadd.f32 %v118_v36, %v86_v49  ;;  %v2842_v49 = vld [vmem:[%s3388_s1 + $0xa8] sm:$0xff] }
 0x12d   :  { %v1197_v15 = vadd.f32 %v1134_v22, %v622_v51  ;;  %v1198_v9 = vadd.f32 %v1135_v57, %v623_v16  ;;  %1422 = vst [vmem:[%s3389_s2 + $0x18] sm:$0xff] %v1199_v35  ;;  %v960_v50 = vmul.f32 0.8068915, %v2739_v34  ;;  %v2745_v3 = vld [vmem:[%s3388_s1 + $0xa0] sm:$0xff]  ;;  %v2761_v51 = vld [vmem:[%s3388_s1 + $0x98] sm:$0xff]  ;;  %v625_v44 = vadd.f32 %v3626_v61, %v145_v26 }
 0x12e   :  { %v992_v35 = vmul.f32 0.08544128, %v2745_v3  ;;  %v991_v16 = vmul.f32 0.08544128, %v2761_v51  ;;  %v990_v26 = vmul.f32 0.08544128, %v2778_v56  ;;  %v627_v32 = vadd.f32 %v3629_v62, %v147_v37 }
 0x12f   :  { %1420 = vst [vmem:[%s3389_s2 + $0x8] sm:$0xff] %v1197_v15  ;;  %1294 = vrot.lane.b32.xlu2 %v1021_v0, %s1559_s10  ;;  %1292 = vrot.lane.b32.xlu1 %v1020_v59, %s1559_s10  ;;  %v2755_v0 = vld [vmem:[%s3387_s0 + $0x98] sm:$0xff]  ;;  %v993_v36 = vmul.f32 0.08544128, %v2842_v49  ;;  %v93_v52 = vmul.f32 -0.08544128, %v2692_v47 }
 0x130   :  { %1421 = vst [vmem:[%s3389_s2 + $0x10] sm:$0xff] %v1198_v9  ;;  %v959_v15 = vmul.f32 0.8068915, %v2755_v0  ;;  %v116_v9 = vmul.f32 0.8068915, %v2530_v23  ;;  %v1024_v22 = vadd.f32 %v992_v35, %v960_v50  ;;  %v1022_v1 = vadd.f32 %v990_v26, %v958_v14 }
 0x131   :  { %1290 = vrot.lane.b32.xlu0 %v1019_v18, %s1559_s10  ;;  %v2767_v59 = vpop.permute.xlu2 %1100  ;;  %v85_v18 = vmul.f32 -0.08544128, %v2511_v5  ;;  %v1081_v31 = vpop.permute.xlu1 %1080  ;;  %v87_v23 = vmul.f32 -0.08544128, %v2576_v42  ;;  %v88_v26 = vmul.f32 -0.08544128, %v2563_v19 }
 0x132   :  { %v1139_v33 = vsel %vm1132_vm1, %v1081_v31, %v2586_v39  ;;  %v1023_v62 = vadd.f32 %v991_v16, %v959_v15  ;;  %v148_v50 = vadd.f32 %v116_v9, %v84_v60  ;;  %v2810_v16 = vld [vmem:[%s3388_s1 + $0xb8] sm:$0xff]  ;;  %v2826_v9 = vld [vmem:[%s3388_s1 + $0xb0] sm:$0xff] }
 0x133   :  { %v1079_v30 = vpop.permute.xlu0 %1078  ;;  %v1202_v57 = vadd.f32 %v1139_v33, %v627_v32  ;;  %v149_v35 = vadd.f32 %v117_v11, %v85_v18  ;;  %v995_v60 = vmul.f32 0.08544128, %v2810_v16  ;;  %v994_v14 = vmul.f32 0.08544128, %v2826_v9  ;;  %v2836_v32 = vld [vmem:[%s3387_s0 + $0xa8] sm:$0xff] }
 0x134   :  { %v1137_v37 = vsel %vm1132_vm1, %v2534_v54, %v1079_v30  ;;  %v1138_v61 = vsel %vm1132_vm1, %v1079_v30, %v1081_v31  ;;  %v2804_v54 = vld [vmem:[%s3387_s0 + $0xb8] sm:$0xff]  ;;  %v961_v18 = vmul.f32 0.8068915, %v2836_v32  ;;  %v120_v11 = vmul.f32 0.8068915, %v2569_v2 }
 0x135   :  { %v1200_v46 = vadd.f32 %v1137_v37, %v625_v44  ;;  %v1201_v5 = vadd.f32 %v1138_v61, %v626_v29  ;;  %1425 = vst [vmem:[%s3389_s2 + $0x30] sm:$0xff] %v1202_v57  ;;  %v963_v15 = vmul.f32 0.8068915, %v2804_v54  ;;  %v3631_v31 = vld [vmem:[#allocation37_spill] sm:$0xff]  ;;  %v121_v33 = vmul.f32 0.8068915, %v2652_v21 }
 0x136   :  { %v630_v29 = vadd.f32 %v3631_v31, %v150_v7  ;;  %v3633_v37 = vld [vmem:[#allocation16_spill] sm:$0xff]  ;;  %v1025_v21 = vadd.f32 %v993_v36, %v961_v18  ;;  %v2906_v18 = vld [vmem:[%s3388_s1 + $0xc0] sm:$0xff] }
 0x137   :  { %1423 = vst [vmem:[%s3389_s2 + $0x20] sm:$0xff] %v1200_v46  ;;  %1300 = vrot.lane.b32.xlu2 %v1024_v22, %s1559_s10  ;;  %1298 = vrot.lane.b32.xlu1 %v1023_v62, %s1559_s10  ;;  %v2820_v46 = vld [vmem:[%s3387_s0 + $0xb0] sm:$0xff]  ;;  %v3632_v22 = vld [vmem:[#allocation34_spill] sm:$0xff]  ;;  %v629_v61 = vadd.f32 %v3633_v37, %v149_v35  ;;  %v1027_v53 = vadd.f32 %v995_v60, %v963_v15  ;;  %v996_v36 = vmul.f32 0.08544128, %v2906_v18 }
 0x138   :  { %1424 = vst [vmem:[%s3389_s2 + $0x28] sm:$0xff] %v1201_v5  ;;  %v962_v44 = vmul.f32 0.8068915, %v2820_v46  ;;  %v628_v57 = vadd.f32 %v3632_v22, %v148_v50  ;;  %v122_v50 = vmul.f32 0.8068915, %v2636_v43  ;;  %v151_v15 = vadd.f32 %v119_v58, %v87_v23  ;;  %v3635_v22 = vld [vmem:[#allocation15_spill] sm:$0xff] }
 0x139   :  { %1296 = vrot.lane.b32.xlu0 %v1022_v1, %s1559_s10  ;;  %v2831_v5 = vpop.permute.xlu2 %1106  ;;  %v89_v1 = vmul.f32 -0.08544128, %v2646_v55  ;;  %v1087_v30 = vpop.permute.xlu1 %1086  ;;  %v152_v60 = vadd.f32 %v120_v11, %v88_v26  ;;  %v123_v11 = vmul.f32 0.8068915, %v2623_v28  ;;  %v3636_v37 = vld [vmem:[#allocation20_spill] sm:$0xff] }
 0x13a   :  { %v1142_v62 = vsel %vm1132_vm1, %v1087_v30, %v2641_v25  ;;  %v1026_v55 = vadd.f32 %v994_v14, %v962_v44  ;;  %v2874_v44 = vld [vmem:[%s3388_s1 + $0xd0] sm:$0xff]  ;;  %v91_v14 = vmul.f32 -0.08544128, %v2617_v38 }
 0x13b   :  { %v1085_v19 = vpop.permute.xlu0 %1084  ;;  %v1205_v42 = vadd.f32 %v1142_v62, %v630_v29  ;;  %v153_v35 = vadd.f32 %v121_v33, %v89_v1  ;;  %v998_v23 = vmul.f32 0.08544128, %v2874_v44  ;;  %v3634_v29 = vld [vmem:[#allocation38_spill] sm:$0xff]  ;;  %v124_v33 = vmul.f32 0.8068915, %v2714_v40 }
 0x13c   :  { %v1140_v7 = vsel %vm1132_vm1, %v2586_v39, %v1085_v19  ;;  %v1141_v31 = vsel %vm1132_vm1, %v1085_v19, %v1087_v30  ;;  %v2868_v19 = vld [vmem:[%s3387_s0 + $0xd0] sm:$0xff] }
 0x13d   :  { %v1203_v2 = vadd.f32 %v1140_v7, %v628_v57  ;;  %v1204_v48 = vadd.f32 %v1141_v31, %v629_v61  ;;  %1428 = vst [vmem:[%s3389_s2 + $0x48] sm:$0xff] %v1205_v42  ;;  %v966_v39 = vmul.f32 0.8068915, %v2868_v19  ;;  %v633_v1 = vadd.f32 %v3634_v29, %v153_v35 }
 0x13e   :  { %v631_v57 = vadd.f32 %v3635_v22, %v151_v15  ;;  %v632_v61 = vadd.f32 %v3636_v37, %v152_v60  ;;  %v125_v15 = vmul.f32 0.8068915, %v2698_v63 }
 0x13f   :  { %1426 = vst [vmem:[%s3389_s2 + $0x38] sm:$0xff] %v1203_v2  ;;  %1306 = vrot.lane.b32.xlu2 %v1027_v53, %s1559_s10  ;;  %1304 = vrot.lane.b32.xlu1 %v1026_v55, %s1559_s10  ;;  %v2884_v2 = vld [vmem:[%s3387_s0 + $0xc8] sm:$0xff]  ;;  %v1030_v31 = vadd.f32 %v998_v23, %v966_v39  ;;  %v154_v39 = vadd.f32 %v122_v50, %v90_v45 }
 0x140   :  { %1427 = vst [vmem:[%s3389_s2 + $0x40] sm:$0xff] %v1204_v48  ;;  %v965_v42 = vmul.f32 0.8068915, %v2884_v2  ;;  %v2890_v53 = vld [vmem:[%s3388_s1 + $0xc8] sm:$0xff]  ;;  %v2900_v55 = vld [vmem:[%s3387_s0 + $0xc0] sm:$0xff]  ;;  %v155_v23 = vadd.f32 %v123_v11, %v91_v14 }
 0x141   :  { %v997_v58 = vmul.f32 0.08544128, %v2890_v53  ;;  %1302 = vrot.lane.b32.xlu0 %v1025_v21, %s1559_s10  ;;  %v2895_v48 = vpop.permute.xlu2 %1112  ;;  %v964_v26 = vmul.f32 0.8068915, %v2900_v55  ;;  %v92_v21 = vmul.f32 -0.08544128, %v2708_v8  ;;  %v1093_v30 = vpop.permute.xlu1 %1092 }
 0x142   :  { %v1145_v62 = vsel %vm1132_vm1, %v1093_v30, %v2703_v20  ;;  %v2948_v45 = vld [vmem:[%s3387_s0 + $0xe0] sm:$0xff] }
 0x143   :  { %v1091_v7 = vpop.permute.xlu0 %1090  ;;  %v1208_v38 = vadd.f32 %v1145_v62, %v633_v1  ;;  %v1029_v8 = vadd.f32 %v997_v58, %v965_v42  ;;  %v1028_v40 = vadd.f32 %v996_v36, %v964_v26  ;;  %v156_v60 = vadd.f32 %v124_v33, %v92_v21  ;;  %v2938_v58 = vld [vmem:[%s3388_s1 + $0xe8] sm:$0xff]  ;;  %v2954_v50 = vld [vmem:[%s3388_s1 + $0xe0] sm:$0xff]  ;;  %v2970_v1 = vld [vmem:[%s3388_s1 + $0xd8] sm:$0xff] }
 0x144   :  { %v1143_v35 = vsel %vm1132_vm1, %v2641_v25, %v1091_v7  ;;  %v1144_v29 = vsel %vm1132_vm1, %v1091_v7, %v1093_v30  ;;  %v2932_v25 = vld [vmem:[%s3387_s0 + $0xe8] sm:$0xff]  ;;  %v1000_v14 = vmul.f32 0.08544128, %v2954_v50  ;;  %v94_v26 = vmul.f32 -0.08544128, %v2678_v12 }
 0x145   :  { %v1206_v28 = vadd.f32 %v1143_v35, %v631_v57  ;;  %v1207_v43 = vadd.f32 %v1144_v29, %v632_v61  ;;  %1431 = vst [vmem:[%s3389_s2 + $0x60] sm:$0xff] %v1208_v38  ;;  %v969_v42 = vmul.f32 0.8068915, %v2932_v25  ;;  %v1001_v38 = vmul.f32 0.08544128, %v2938_v58  ;;  %v3637_v57 = vld [vmem:[#allocation19_spill] sm:$0xff] }
 0x146   :  { %v999_v21 = vmul.f32 0.08544128, %v2970_v1  ;;  %v636_v11 = vadd.f32 %v2160_v41, %v156_v60  ;;  %v126_v33 = vmul.f32 0.8068915, %v2684_v4  ;;  %v127_v30 = vmul.f32 0.8068915, %v2778_v56 }
 0x147   :  { %1429 = vst [vmem:[%s3389_s2 + $0x50] sm:$0xff] %v1206_v28  ;;  %1312 = vrot.lane.b32.xlu2 %v1030_v31, %s1559_s10  ;;  %1310 = vrot.lane.b32.xlu1 %v1029_v8, %s1559_s10  ;;  %v968_v28 = vmul.f32 0.8068915, %v2948_v45  ;;  %v2964_v8 = vld [vmem:[%s3387_s0 + $0xd8] sm:$0xff]  ;;  %v634_v37 = vadd.f32 %v3637_v57, %v154_v39  ;;  %v635_v61 = vadd.f32 %v2157_v24, %v155_v23  ;;  %v96_v12 = vmul.f32 -0.08544128, %v2755_v0 }
 0x148   :  { %1430 = vst [vmem:[%s3389_s2 + $0x58] sm:$0xff] %v1207_v43  ;;  %v967_v36 = vmul.f32 0.8068915, %v2964_v8  ;;  %v1033_v31 = vadd.f32 %v1001_v38, %v969_v42  ;;  %v128_v39 = vmul.f32 0.8068915, %v2761_v51  ;;  %v157_v23 = vadd.f32 %v125_v15, %v93_v52  ;;  %v3640_v57 = vld [vmem:[#allocation23_spill] sm:$0xff] }
 0x149   :  { %1308 = vrot.lane.b32.xlu0 %v1028_v40, %s1559_s10  ;;  %v2959_v43 = vpop.permute.xlu2 %1118  ;;  %v95_v40 = vmul.f32 -0.08544128, %v2772_v27  ;;  %v1099_v22 = vpop.permute.xlu1 %1098  ;;  %v1032_v60 = vadd.f32 %v1000_v14, %v968_v28  ;;  %v158_v42 = vadd.f32 %v126_v33, %v94_v26  ;;  %v2998_v28 = vld [vmem:[%s3388_s1 + $0xf8] sm:$0xff]  ;;  %v97_v26 = vmul.f32 -0.08544128, %v2739_v34 }
 0x14a   :  { %v1148_v62 = vsel %vm1132_vm1, %v1099_v22, %v2767_v59  ;;  %v1031_v56 = vadd.f32 %v999_v21, %v967_v36  ;;  %3639 = vst [vmem:[#allocation29_spill] sm:$0xff] %v2998_v28  ;;  %v140_v14 = vmul.f32 0.8068915, %v2998_v28  ;;  %v1003_v15 = vmul.f32 0.08544128, %v2998_v28 }
 0x14b   :  { %v1097_v7 = vpop.permute.xlu0 %1096  ;;  %v1211_v35 = vadd.f32 %v1148_v62, %v636_v11  ;;  %v159_v24 = vadd.f32 %v127_v30, %v95_v40  ;;  %v129_v33 = vmul.f32 0.8068915, %v2745_v3  ;;  %v130_v30 = vmul.f32 0.8068915, %v2842_v49 }
 0x14c   :  { %v1146_v41 = vsel %vm1132_vm1, %v2703_v20, %v1097_v7  ;;  %v1147_v29 = vsel %vm1132_vm1, %v1097_v7, %v1099_v22  ;;  %v2992_v20 = vld [vmem:[%s3387_s0 + $0xf8] sm:$0xff] }
 0x14d   :  { %v1209_v27 = vadd.f32 %v1146_v41, %v634_v37  ;;  %v1210_v4 = vadd.f32 %v1147_v29, %v635_v61  ;;  %1434 = vst [vmem:[%s3389_s2 + $0x78] sm:$0xff] %v1211_v35  ;;  %v108_v38 = vmul.f32 -0.08544128, %v2992_v20  ;;  %v971_v52 = vmul.f32 0.8068915, %v2992_v20 }
 0x14e   :  { %3638 = vst [vmem:[#allocation33_spill] sm:$0xff] %v2992_v20  ;;  %v639_v40 = vadd.f32 %v2182_v13, %v159_v24  ;;  %v637_v37 = vadd.f32 %v3640_v57, %v157_v23  ;;  %v638_v61 = vadd.f32 %v2179_v6, %v158_v42  ;;  %v160_v6 = vadd.f32 %v128_v39, %v96_v12 }
 0x14f   :  { %1432 = vst [vmem:[%s3389_s2 + $0x68] sm:$0xff] %v1209_v27  ;;  %1318 = vrot.lane.b32.xlu2 %v1033_v31, %s1559_s10  ;;  %1316 = vrot.lane.b32.xlu1 %v1032_v60, %s1559_s10  ;;  %v3018_v27 = vld [vmem:[%s3387_s0 + $0xf0] sm:$0xff]  ;;  %v172_v62 = vadd.f32 %v140_v14, %v108_v38  ;;  %v1035_v29 = vadd.f32 %v1003_v15, %v971_v52  ;;  %v99_v42 = vmul.f32 -0.08544128, %v2820_v46  ;;  %v131_v38 = vmul.f32 0.8068915, %v2826_v9 }
 0x150   :  { %1433 = vst [vmem:[%s3389_s2 + $0x70] sm:$0xff] %v1210_v4  ;;  %v970_v21 = vmul.f32 0.8068915, %v3018_v27  ;;  %v3024_v4 = vld [vmem:[%s3388_s1 + $0xf0] sm:$0xff]  ;;  %v161_v23 = vadd.f32 %v129_v33, %v97_v26  ;;  %v100_v14 = vmul.f32 -0.08544128, %v2804_v54 }
 0x151   :  { %1314 = vrot.lane.b32.xlu0 %v1031_v56, %s1559_s10  ;;  %v3013_v36 = vpop.permute.xlu2 %1124  ;;  %v1002_v11 = vmul.f32 0.08544128, %v3024_v4  ;;  %v98_v56 = vmul.f32 -0.08544128, %v2836_v32  ;;  %v1105_v22 = vpop.permute.xlu1 %1104  ;;  %v101_v52 = vmul.f32 -0.08544128, %v2900_v55 }
 0x152   :  { %v1151_v7 = vsel %vm1132_vm1, %v1105_v22, %v2831_v5  ;;  %v132_v33 = vmul.f32 0.8068915, %v2810_v16 }
 0x153   :  { %v1103_v31 = vpop.permute.xlu0 %1102  ;;  %v1214_v35 = vadd.f32 %v1151_v7, %v639_v40  ;;  %v1034_v28 = vadd.f32 %v1002_v11, %v970_v21  ;;  %v162_v20 = vadd.f32 %v130_v30, %v98_v56  ;;  %v3641_v21 = vld [vmem:[#allocation24_spill] sm:$0xff]  ;;  %v3642_v40 = vld [vmem:[#allocation27_spill] sm:$0xff] }
 0x154   :  { %v1149_v13 = vsel %vm1132_vm1, %v2767_v59, %v1103_v31  ;;  %v1150_v41 = vsel %vm1132_vm1, %v1103_v31, %v1105_v22  ;;  %v652_v59 = vadd.f32 %v2261_v10, %v172_v62  ;;  %v133_v10 = vmul.f32 0.8068915, %v2906_v18 }
 0x155   :  { %v1212_v60 = vadd.f32 %v1149_v13, %v637_v37  ;;  %v1213_v24 = vadd.f32 %v1150_v41, %v638_v61  ;;  %1437 = vst [vmem:[%s3389_s2 + $0x90] sm:$0xff] %v1214_v35  ;;  %v642_v39 = vadd.f32 %v2204_v17, %v162_v20  ;;  %v640_v11 = vadd.f32 %v3641_v21, %v160_v6  ;;  %v3643_v35 = vld [vmem:[#allocation40_spill] sm:$0xff]  ;;  %v3644_v6 = vld [vmem:[#allocation3_spill] sm:$0xff] }
 0x156   :  { %v641_v56 = vadd.f32 %v3642_v40, %v161_v23  ;;  %v165_v61 = vadd.f32 %v133_v10, %v101_v52  ;;  %v163_v62 = vadd.f32 %v131_v38, %v99_v42  ;;  %v164_v7 = vadd.f32 %v132_v33, %v100_v14  ;;  %v3645_v42 = vld [vmem:[#allocation39_spill] sm:$0xff] }
 0x157   :  { %1435 = vst [vmem:[%s3389_s2 + $0x80] sm:$0xff] %v1212_v60  ;;  %1322 = vrot.lane.b32.xlu1 %v1035_v29, %s1559_s10  ;;  %v134_v31 = vmul.f32 0.8068915, %v2890_v53  ;;  %v103_v41 = vmul.f32 -0.08544128, %v2868_v19 }
 0x158   :  { %1436 = vst [vmem:[%s3389_s2 + $0x88] sm:$0xff] %v1213_v24  ;;  %v645_v13 = vadd.f32 %v3643_v35, %v165_v61  ;;  %v104_v29 = vmul.f32 -0.08544128, %v2964_v8  ;;  %v136_v60 = vmul.f32 0.8068915, %v2970_v1  ;;  %v643_v23 = vadd.f32 %v3644_v6, %v163_v62  ;;  %v3647_v61 = vld [vmem:[#allocation2_spill] sm:$0xff] }
 0x159   :  { %1320 = vrot.lane.b32.xlu0 %v1034_v28, %s1559_s10  ;;  %v3053_v12 = vpop.permute.xlu2 %1130  ;;  %v1111_v15 = vpop.permute.xlu1 %1110  ;;  %v135_v38 = vmul.f32 0.8068915, %v2874_v44 }
 0x15a   :  { %v1227_v26 = vadd.f32 %v3053_v12, %v652_v59  ;;  %v1154_v28 = vsel %vm1132_vm1, %v1111_v15, %v2895_v48  ;;  %v644_v59 = vadd.f32 %v3645_v42, %v164_v7  ;;  %v3648_v7 = vld [vmem:[#allocation5_spill] sm:$0xff] }
 0x15b   :  { %v1109_v30 = vpop.permute.xlu0 %1108  ;;  %v1217_v22 = vadd.f32 %v1154_v28, %v642_v39  ;;  %v167_v33 = vadd.f32 %v135_v38, %v103_v41  ;;  %v137_v28 = vmul.f32 0.8068915, %v2954_v50  ;;  %v3649_v38 = vld [vmem:[#allocation43_spill] sm:$0xff] }
 0x15c   :  { %1451 = vst.msk [vmem:[%s3389_s2 + $0xf8] sm:$0xff] %vm1450_vm2, %v1227_v26  ;;  %v1152_v17 = vsel %vm1132_vm1, %v2831_v5, %v1109_v30  ;;  %v1153_v20 = vsel %vm1132_vm1, %v1109_v30, %v1111_v15  ;;  %v102_v5 = vmul.f32 -0.08544128, %v2884_v2  ;;  %v3646_v30 = vld [vmem:[#allocation41_spill] sm:$0xff] }
 0x15d   :  { %v1215_v57 = vadd.f32 %v1152_v17, %v640_v11  ;;  %v1216_v37 = vadd.f32 %v1153_v20, %v641_v56  ;;  %1440 = vst [vmem:[%s3389_s2 + $0xa8] sm:$0xff] %v1217_v22  ;;  %v168_v11 = vadd.f32 %v136_v60, %v104_v29  ;;  %v106_v17 = vmul.f32 -0.08544128, %v2932_v25 }
 0x15e   :  { %v166_v56 = vadd.f32 %v134_v31, %v102_v5  ;;  %v107_v20 = vmul.f32 -0.08544128, %v3018_v27  ;;  %v647_v5 = vadd.f32 %v3648_v7, %v167_v33  ;;  %v138_v31 = vmul.f32 0.8068915, %v2938_v58 }
 0x15f   :  { %1438 = vst [vmem:[%s3389_s2 + $0x98] sm:$0xff] %v1215_v57  ;;  %v648_v22 = vadd.f32 %v3646_v30, %v168_v11  ;;  %v139_v57 = vmul.f32 0.8068915, %v3024_v4  ;;  %v3655_v30 = vld [vmem:[#allocation50_spill] sm:$0xff] }
 0x160   :  { %1439 = vst [vmem:[%s3389_s2 + $0xa0] sm:$0xff] %v1216_v37  ;;  %v646_v62 = vadd.f32 %v3647_v61, %v166_v56  ;;  %v3653_v56 = vld [vmem:[#allocation4_spill] sm:$0xff] }
 0x161   :  { %v1117_v24 = vpop.permute.xlu1 %1116  ;;  %v3097_v40 = vpop.permute.xlu2 %1264 }
 0x162   :  { %v1157_v14 = vsel %vm1132_vm1, %v1117_v24, %v2959_v43 }
 0x163   :  { %v1115_v39 = vpop.permute.xlu0 %1114  ;;  %v1220_v52 = vadd.f32 %v1157_v14, %v645_v13 }
 0x164   :  { %v1155_v10 = vsel %vm1132_vm1, %v2895_v48, %v1115_v39  ;;  %v1156_v15 = vsel %vm1132_vm1, %v1115_v39, %v1117_v24  ;;  %v105_v48 = vmul.f32 -0.08544128, %v2948_v45  ;;  %v3650_v39 = vld [vmem:[#allocation48_spill] sm:$0xff] }
 0x165   :  { %v1218_v26 = vadd.f32 %v1155_v10, %v643_v23  ;;  %v1219_v21 = vadd.f32 %v1156_v15, %v644_v59  ;;  %1443 = vst [vmem:[%s3389_s2 + $0xc0] sm:$0xff] %v1220_v52  ;;  %v171_v23 = vadd.f32 %v139_v57, %v107_v20  ;;  %v170_v59 = vadd.f32 %v138_v31, %v106_v17  ;;  %v3651_v10 = vld [vmem:[#allocation51_spill] sm:$0xff] }
 0x166   :  { %v169_v42 = vadd.f32 %v137_v28, %v105_v48  ;;  %v174_v52 = vmul.f32 0.035226293, %v3650_v39  ;;  %v205_v15 = vmul.f32 -0.33267054, %v3651_v10  ;;  %v3654_v48 = vld [vmem:[#allocation42_spill] sm:$0xff]  ;;  %v3662_v39 = vld [vmem:[#allocation59_spill] sm:$0xff] }
 0x167   :  { %1441 = vst [vmem:[%s3389_s2 + $0xb0] sm:$0xff] %v1218_v26  ;;  %v651_v14 = vadd.f32 %v3649_v38, %v171_v23  ;;  %v3652_v26 = vld [vmem:[#allocation49_spill] sm:$0xff]  ;;  %v650_v28 = vadd.f32 %v3654_v48, %v170_v59  ;;  %v3661_v38 = vld [vmem:[#allocation6_spill] sm:$0xff]  ;;  %v3663_v10 = vld [vmem:[#allocation60_spill] sm:$0xff] }
 0x168   :  { %1442 = vst [vmem:[%s3389_s2 + $0xb8] sm:$0xff] %v1219_v21  ;;  %v206_v21 = vmul.f32 -0.33267054, %v3652_v26  ;;  %v649_v33 = vadd.f32 %v3653_v56, %v169_v42 }
 0x169   :  { %v1123_v37 = vpop.permute.xlu1 %1122 }
 0x16a   :  { %v1160_v35 = vsel %vm1132_vm1, %v1123_v37, %v3013_v36 }
 0x16b   :  { %v1121_v13 = vpop.permute.xlu0 %1120  ;;  %v1223_v41 = vadd.f32 %v1160_v35, %v648_v22  ;;  %v173_v22 = vmul.f32 0.035226293, %v3655_v30  ;;  %v3657_v35 = vld [vmem:[#allocation22_spill] sm:$0xff] }
 0x16c   :  { %v1158_v29 = vsel %vm1132_vm1, %v2959_v43, %v1121_v13  ;;  %v1159_v60 = vsel %vm1132_vm1, %v1121_v13, %v1123_v37  ;;  %v3128_v43 = vpop.permute.xlu2 %1270  ;;  %v175_v13 = vmul.f32 0.035226293, %v3657_v35 }
 0x16d   :  { %v1221_v24 = vadd.f32 %v1158_v29, %v646_v62  ;;  %v1222_v6 = vadd.f32 %v1159_v60, %v647_v5  ;;  %1446 = vst [vmem:[%s3389_s2 + $0xd8] sm:$0xff] %v1223_v41  ;;  %v238_v5 = vadd.f32 %v206_v21, %v174_v52  ;;  %v237_v31 = vadd.f32 %v205_v15, %v173_v22  ;;  %v3658_v41 = vld [vmem:[#allocation7_spill] sm:$0xff]  ;;  %v3659_v60 = vld [vmem:[#allocation57_spill] sm:$0xff] }
 0x16e   :  { %v176_v52 = vmul.f32 0.035226293, %v3662_v39  ;;  %v208_v15 = vmul.f32 -0.33267054, %v3663_v10  ;;  %v3664_v22 = vld [vmem:[#allocation55_spill] sm:$0xff] }
 0x16f   :  { %1444 = vst [vmem:[%s3389_s2 + $0xc8] sm:$0xff] %v1221_v24  ;;  %v813_v29 = vadd.f32 %v3658_v41, %v238_v5  ;;  %v177_v24 = vmul.f32 0.035226293, %v3659_v60  ;;  %v3668_v5 = vld [vmem:[#allocation66_spill] sm:$0xff] }
 0x170   :  { %1445 = vst [vmem:[%s3389_s2 + $0xd0] sm:$0xff] %v1222_v6  ;;  %v3660_v6 = vld [vmem:[#allocation58_spill] sm:$0xff]  ;;  %v240_v30 = vadd.f32 %v208_v15, %v176_v52 }
 0x171   :  { %v1129_v11 = vpop.permute.xlu1 %1128  ;;  %v209_v23 = vmul.f32 -0.33267054, %v3660_v6 }
 0x172   :  { %v1163_v17 = vsel %vm1132_vm1, %v1129_v11, %v3053_v12  ;;  %v3656_v12 = vld [vmem:[#allocation47_spill] sm:$0xff] }
 0x173   :  { %v1127_v20 = vpop.permute.xlu0 %1126  ;;  %v1226_v57 = vadd.f32 %v1163_v17, %v651_v14  ;;  %v812_v14 = vadd.f32 %v3661_v38, %v237_v31  ;;  %v241_v48 = vadd.f32 %v209_v23, %v177_v24  ;;  %v178_v17 = vmul.f32 0.035226293, %v3664_v22  ;;  %v3672_v24 = vld [vmem:[#allocation69_spill] sm:$0xff] }
 0x174   :  { %v1161_v37 = vsel %vm1132_vm1, %v3013_v36, %v1127_v20  ;;  %v1162_v61 = vsel %vm1132_vm1, %v1127_v20, %v1129_v11  ;;  %v207_v36 = vmul.f32 -0.33267054, %v3656_v12  ;;  %v3156_v59 = vpop.permute.xlu2 %1276  ;;  %v3665_v20 = vld [vmem:[#allocation56_spill] sm:$0xff]  ;;  %v180_v31 = vmul.f32 0.035226293, %v3668_v5  ;;  %v3669_v12 = vld [vmem:[#allocation67_spill] sm:$0xff] }
 0x175   :  { %v1224_v62 = vadd.f32 %v1161_v37, %v649_v33  ;;  %v1225_v7 = vadd.f32 %v1162_v61, %v650_v28  ;;  %1449 = vst [vmem:[%s3389_s2 + $0xf0] sm:$0xff] %v1226_v57  ;;  %v210_v57 = vmul.f32 -0.33267054, %v3665_v20  ;;  %v3666_v37 = vld [vmem:[#allocation8_spill] sm:$0xff]  ;;  %v212_v35 = vmul.f32 -0.33267054, %v3669_v12 }
 0x176   :  { %v239_v28 = vadd.f32 %v207_v36, %v175_v13  ;;  %v816_v61 = vadd.f32 %v3666_v37, %v241_v48  ;;  %v3671_v13 = vld [vmem:[#allocation12_spill] sm:$0xff]  ;;  %v211_v6 = vmul.f32 -0.33267054, %v3672_v24  ;;  %v3676_v22 = vld [vmem:[#allocation77_spill] sm:$0xff]  ;;  %v3677_v37 = vld [vmem:[#allocation75_spill] sm:$0xff] }
 0x177   :  { %1447 = vst [vmem:[%s3389_s2 + $0xe0] sm:$0xff] %v1224_v62  ;;  %v3667_v62 = vld [vmem:[#allocation68_spill] sm:$0xff]  ;;  %v815_v60 = vadd.f32 %v3671_v13, %v240_v30  ;;  %v182_v20 = vmul.f32 0.035226293, %v3676_v22 }
 0x178   :  { %1448 = vst [vmem:[%s3389_s2 + $0xe8] sm:$0xff] %v1225_v7  ;;  %v179_v7 = vmul.f32 0.035226293, %v3667_v62 }
 0x179   :  { %v1263_v42 = vpop.permute.xlu1 %1262 }
 0x17a   :  { %v1325_v26 = vsel %vm1132_vm1, %v1263_v42, %v3097_v40 }
 0x17b   :  { %v1261_v21 = vpop.permute.xlu0 %1260  ;;  %v1388_v11 = vadd.f32 %v1325_v26, %v813_v29  ;;  %v3670_v29 = vld [vmem:[#allocation10_spill] sm:$0xff]  ;;  %v244_v26 = vadd.f32 %v212_v35, %v180_v31  ;;  %v3680_v31 = vld [vmem:[#allocation44_spill] sm:$0xff] }
 0x17c   :  { %v1324_v56 = vsel %vm1132_vm1, %v1261_v21, %v1263_v42  ;;  %v814_v36 = vadd.f32 %v3670_v29, %v239_v28  ;;  %v3184_v52 = vpop.permute.xlu2 %1282  ;;  %v242_v21 = vadd.f32 %v210_v57, %v178_v17  ;;  %v3675_v28 = vld [vmem:[#allocation45_spill] sm:$0xff]  ;;  %v3678_v17 = vld [vmem:[#allocation76_spill] sm:$0xff]  ;;  %v3681_v35 = vld [vmem:[#allocation78_spill] sm:$0xff] }
 0x17d   :  { %v1387_v33 = vadd.f32 %v1324_v56, %v812_v14  ;;  %1453 = vst [vmem:[%s3390_s3 + $0x8] sm:$0xff] %v1388_v11  ;;  %v243_v11 = vadd.f32 %v211_v6, %v179_v7  ;;  %v819_v30 = vadd.f32 %v3675_v28, %v244_v26  ;;  %v215_v57 = vmul.f32 -0.33267054, %v3678_v17  ;;  %v3679_v7 = vld [vmem:[#allocation11_spill] sm:$0xff]  ;;  %v3686_v28 = vld [vmem:[#allocation84_spill] sm:$0xff] }
 0x17e   :  { %v817_v5 = vadd.f32 %v3679_v7, %v242_v21  ;;  %v3684_v21 = vld [vmem:[#allocation46_spill] sm:$0xff] }
 0x17f   :  { %1452 = vst [vmem:[%s3390_s3] sm:$0xff] %v1387_v33  ;;  %v3674_v33 = vld [vmem:[#allocation65_spill] sm:$0xff]  ;;  %v818_v12 = vadd.f32 %v3680_v31, %v243_v11 }
 0x180   :  { %v213_v48 = vmul.f32 -0.33267054, %v3674_v33 }
 0x181   :  { %v1269_v41 = vpop.permute.xlu1 %1268 }
 0x182   :  { %v1328_v23 = vsel %vm1132_vm1, %v1269_v41, %v3128_v43 }
 0x183   :  { %v1267_v42 = vpop.permute.xlu0 %1266  ;;  %v1391_v38 = vadd.f32 %v1328_v23, %v816_v61  ;;  %v183_v61 = vmul.f32 0.035226293, %v3677_v37 }
 0x184   :  { %v1326_v14 = vsel %vm1132_vm1, %v3097_v40, %v1267_v42  ;;  %v1327_v39 = vsel %vm1132_vm1, %v1267_v42, %v1269_v41  ;;  %v3673_v40 = vld [vmem:[#allocation64_spill] sm:$0xff]  ;;  %v214_v41 = vmul.f32 -0.33267054, %v3681_v35 }
 0x185   :  { %v1389_v10 = vadd.f32 %v1326_v14, %v814_v36  ;;  %v1390_v15 = vadd.f32 %v1327_v39, %v815_v60  ;;  %1456 = vst [vmem:[%s3390_s3 + $0x20] sm:$0xff] %v1391_v38  ;;  %v181_v56 = vmul.f32 0.035226293, %v3673_v40  ;;  %v247_v42 = vadd.f32 %v215_v57, %v183_v61  ;;  %v3212_v38 = vpop.permute.xlu2 %1288  ;;  %v3685_v40 = vld [vmem:[#allocation86_spill] sm:$0xff]  ;;  %v3690_v57 = vld [vmem:[#allocation87_spill] sm:$0xff] }
 0x186   :  { %v246_v39 = vadd.f32 %v214_v41, %v182_v20  ;;  %v185_v33 = vmul.f32 0.035226293, %v3685_v40  ;;  %v3688_v20 = vld [vmem:[#allocation9_spill] sm:$0xff]  ;;  %v3689_v61 = vld [vmem:[#allocation14_spill] sm:$0xff] }
 0x187   :  { %1454 = vst [vmem:[%s3390_s3 + $0x10] sm:$0xff] %v1389_v10  ;;  %v245_v14 = vadd.f32 %v213_v48, %v181_v56  ;;  %v822_v11 = vadd.f32 %v3684_v21, %v247_v42  ;;  %v3687_v56 = vld [vmem:[#allocation85_spill] sm:$0xff] }
 0x188   :  { %1455 = vst [vmem:[%s3390_s3 + $0x18] sm:$0xff] %v1390_v15  ;;  %v3683_v15 = vld [vmem:[#allocation74_spill] sm:$0xff]  ;;  %v218_v48 = vmul.f32 -0.33267054, %v3687_v56  ;;  %v821_v17 = vadd.f32 %v3689_v61, %v246_v39 }
 0x189   :  { %v1275_v62 = vpop.permute.xlu1 %1274  ;;  %v216_v26 = vmul.f32 -0.33267054, %v3683_v15  ;;  %v820_v37 = vadd.f32 %v3688_v20, %v245_v14  ;;  %v3693_v14 = vld [vmem:[#allocation17_spill] sm:$0xff] }
 0x18a   :  { %v1331_v29 = vsel %vm1132_vm1, %v1275_v62, %v3156_v59 }
 0x18b   :  { %v1273_v36 = vpop.permute.xlu0 %1272  ;;  %v1394_v13 = vadd.f32 %v1331_v29, %v819_v30  ;;  %v186_v30 = vmul.f32 0.035226293, %v3686_v28 }
 0x18c   :  { %v1329_v60 = vsel %vm1132_vm1, %v3128_v43, %v1273_v36  ;;  %v1330_v24 = vsel %vm1132_vm1, %v1273_v36, %v1275_v62  ;;  %v3682_v43 = vld [vmem:[#allocation73_spill] sm:$0xff]  ;;  %v217_v62 = vmul.f32 -0.33267054, %v3690_v57 }
 0x18d   :  { %v1392_v6 = vadd.f32 %v1329_v60, %v817_v5  ;;  %v1393_v23 = vadd.f32 %v1330_v24, %v818_v12  ;;  %1459 = vst [vmem:[%s3390_s3 + $0x38] sm:$0xff] %v1394_v13  ;;  %v184_v10 = vmul.f32 0.035226293, %v3682_v43  ;;  %v250_v36 = vadd.f32 %v218_v48, %v186_v30  ;;  %v3691_v24 = vld [vmem:[#allocation82_spill] sm:$0xff]  ;;  %v3694_v43 = vld [vmem:[#allocation91_spill] sm:$0xff]  ;;  %v3697_v30 = vld [vmem:[#allocation92_spill] sm:$0xff] }
 0x18e   :  { %v249_v60 = vadd.f32 %v217_v62, %v185_v33  ;;  %v188_v15 = vmul.f32 0.035226293, %v3694_v43  ;;  %v3696_v33 = vld [vmem:[#allocation26_spill] sm:$0xff]  ;;  %v220_v56 = vmul.f32 -0.33267054, %v3697_v30 }
 0x18f   :  { %1457 = vst [vmem:[%s3390_s3 + $0x28] sm:$0xff] %v1392_v6  ;;  %v248_v13 = vadd.f32 %v216_v26, %v184_v10  ;;  %v187_v6 = vmul.f32 0.035226293, %v3691_v24  ;;  %v825_v39 = vadd.f32 %v3693_v14, %v250_v36  ;;  %v189_v10 = vmul.f32 0.035226293, %v2692_v47 }
 0x190   :  { %1458 = vst [vmem:[%s3390_s3 + $0x30] sm:$0xff] %v1393_v23  ;;  %v3692_v23 = vld [vmem:[#allocation83_spill] sm:$0xff]  ;;  %v221_v26 = vmul.f32 -0.33267054, %v2698_v63  ;;  %v824_v28 = vadd.f32 %v3696_v33, %v249_v60  ;;  %v252_v62 = vadd.f32 %v220_v56, %v188_v15  ;;  %v192_v36 = vmul.f32 0.035226293, %v2755_v0 }
 0x191   :  { %v1281_v22 = vpop.permute.xlu1 %1280  ;;  %v219_v42 = vmul.f32 -0.33267054, %v3692_v23  ;;  %v225_v30 = vmul.f32 -0.33267054, %v2745_v3  ;;  %v3705_v56 = vld [vmem:[#allocation54_spill] sm:$0xff] }
 0x192   :  { %v1334_v7 = vsel %vm1132_vm1, %v1281_v22, %v3184_v52  ;;  %v253_v63 = vadd.f32 %v221_v26, %v189_v10 }
 0x193   :  { %v1279_v5 = vpop.permute.xlu0 %1278  ;;  %v1397_v31 = vadd.f32 %v1334_v7, %v822_v11  ;;  %v3695_v11 = vld [vmem:[#allocation13_spill] sm:$0xff]  ;;  %v251_v57 = vadd.f32 %v219_v42, %v187_v6  ;;  %v3703_v42 = vld [vmem:[#allocation28_spill] sm:$0xff] }
 0x194   :  { %v1332_v12 = vsel %vm1132_vm1, %v3156_v59, %v1279_v5  ;;  %v1333_v35 = vsel %vm1132_vm1, %v1279_v5, %v1281_v22  ;;  %v1295_v59 = vpop.permute.xlu2 %1294  ;;  %v823_v40 = vadd.f32 %v3695_v11, %v248_v13  ;;  %v3699_v5 = vld [vmem:[#allocation90_spill] sm:$0xff]  ;;  %v224_v13 = vmul.f32 -0.33267054, %v2761_v51  ;;  %v3702_v6 = vld [vmem:[#allocation25_spill] sm:$0xff] }
 0x195   :  { %v1395_v41 = vadd.f32 %v1332_v12, %v820_v37  ;;  %v1396_v29 = vadd.f32 %v1333_v35, %v821_v17  ;;  %1462 = vst [vmem:[%s3390_s3 + $0x50] sm:$0xff] %v1397_v31  ;;  %v222_v31 = vmul.f32 -0.33267054, %v3699_v5  ;;  %v3700_v12 = vld [vmem:[#allocation21_spill] sm:$0xff]  ;;  %v826_v23 = vadd.f32 %v3702_v6, %v251_v57 }
 0x196   :  { %v828_v35 = vadd.f32 %v3700_v12, %v253_v63  ;;  %v827_v14 = vadd.f32 %v3703_v42, %v252_v62  ;;  %v256_v51 = vadd.f32 %v224_v13, %v192_v36  ;;  %v3707_v63 = vld [vmem:[#allocation53_spill] sm:$0xff]  ;;  %v226_v62 = vmul.f32 -0.33267054, %v2842_v49 }
 0x197   :  { %1460 = vst [vmem:[%s3390_s3 + $0x40] sm:$0xff] %v1395_v41  ;;  %v3701_v41 = vld [vmem:[#allocation31_spill] sm:$0xff]  ;;  %v196_v49 = vmul.f32 0.035226293, %v2804_v54  ;;  %v197_v36 = vmul.f32 0.035226293, %v2900_v55 }
 0x198   :  { %1461 = vst [vmem:[%s3390_s3 + $0x48] sm:$0xff] %v1396_v29  ;;  %v191_v29 = vmul.f32 0.035226293, %v3701_v41  ;;  %v3708_v41 = vld [vmem:[#allocation63_spill] sm:$0xff]  ;;  %v198_v13 = vmul.f32 0.035226293, %v2884_v2 }
 0x199   :  { %v1287_v21 = vpop.permute.xlu1 %1286 }
 0x19a   :  { %v1337_v48 = vsel %vm1132_vm1, %v1287_v21, %v3212_v38 }
 0x19b   :  { %v1285_v22 = vpop.permute.xlu0 %1284  ;;  %v1400_v20 = vadd.f32 %v1337_v48, %v825_v39  ;;  %v3704_v39 = vld [vmem:[#allocation30_spill] sm:$0xff]  ;;  %v831_v48 = vadd.f32 %v3705_v56, %v256_v51  ;;  %v3712_v56 = vld [vmem:[#allocation61_spill] sm:$0xff] }
 0x19c   :  { %v1335_v37 = vsel %vm1132_vm1, %v3184_v52, %v1285_v22  ;;  %v1336_v61 = vsel %vm1132_vm1, %v1285_v22, %v1287_v21  ;;  %v3698_v52 = vld [vmem:[#allocation89_spill] sm:$0xff]  ;;  %v1301_v24 = vpop.permute.xlu2 %1300  ;;  %v223_v43 = vmul.f32 -0.33267054, %v3704_v39  ;;  %v194_v22 = vmul.f32 0.035226293, %v2836_v32 }
 0x19d   :  { %v1398_v47 = vadd.f32 %v1335_v37, %v823_v40  ;;  %v1399_v17 = vadd.f32 %v1336_v61, %v824_v28  ;;  %1465 = vst [vmem:[%s3390_s3 + $0x68] sm:$0xff] %v1400_v20  ;;  %v190_v7 = vmul.f32 0.035226293, %v3698_v52  ;;  %v195_v20 = vmul.f32 0.035226293, %v2820_v46 }
 0x19e   :  { %v255_v28 = vadd.f32 %v223_v43, %v191_v29  ;;  %v227_v37 = vmul.f32 -0.33267054, %v2826_v9  ;;  %v229_v43 = vmul.f32 -0.33267054, %v2906_v18  ;;  %v199_v18 = vmul.f32 0.035226293, %v2868_v19 }
 0x19f   :  { %1463 = vst [vmem:[%s3390_s3 + $0x58] sm:$0xff] %v1398_v47  ;;  %v254_v33 = vadd.f32 %v222_v31, %v190_v7  ;;  %v3706_v47 = vld [vmem:[#allocation18_spill] sm:$0xff] }
 0x1a0   :  { %1464 = vst [vmem:[%s3390_s3 + $0x60] sm:$0xff] %v1399_v17  ;;  %v830_v57 = vadd.f32 %v3707_v63, %v255_v28  ;;  %v259_v12 = vadd.f32 %v227_v37, %v195_v20  ;;  %v201_v28 = vmul.f32 0.035226293, %v2948_v45  ;;  %v232_v37 = vmul.f32 -0.33267054, %v2970_v1 }
 0x1a1   :  { %v1293_v60 = vpop.permute.xlu1 %1292  ;;  %v829_v17 = vadd.f32 %v3706_v47, %v254_v33  ;;  %v200_v33 = vmul.f32 0.035226293, %v2964_v8 }
 0x1a2   :  { %v1340_v15 = vsel %vm1132_vm1, %v1293_v60, %v1295_v59  ;;  %v834_v29 = vadd.f32 %v3708_v41, %v259_v12  ;;  %v235_v41 = vmul.f32 -0.33267054, %v3024_v4  ;;  %v3719_v4 = vld [vmem:[#allocation32_spill] sm:$0xff] }
 0x1a3   :  { %v1291_v10 = vpop.permute.xlu0 %1290  ;;  %v1403_v26 = vadd.f32 %v1340_v15, %v828_v35  ;;  %v258_v35 = vadd.f32 %v226_v62, %v194_v22  ;;  %v3713_v22 = vld [vmem:[#allocation71_spill] sm:$0xff]  ;;  %v3714_v62 = vld [vmem:[#allocation33_spill] sm:$0xff] }
 0x1a4   :  { %v1338_v21 = vsel %vm1132_vm1, %v3212_v38, %v1291_v10  ;;  %v1339_v11 = vsel %vm1132_vm1, %v1291_v10, %v1293_v60  ;;  %v193_v38 = vmul.f32 0.035226293, %v2739_v34  ;;  %v1307_v32 = vpop.permute.xlu2 %1306  ;;  %v230_v60 = vmul.f32 -0.33267054, %v2890_v53 }
 0x1a5   :  { %v1401_v0 = vadd.f32 %v1338_v21, %v826_v23  ;;  %v1402_v40 = vadd.f32 %v1339_v11, %v827_v14  ;;  %1468 = vst [vmem:[%s3390_s3 + $0x80] sm:$0xff] %v1403_v26  ;;  %v3709_v23 = vld [vmem:[#allocation52_spill] sm:$0xff]  ;;  %v3710_v14 = vld [vmem:[#allocation62_spill] sm:$0xff] }
 0x1a6   :  { %v257_v9 = vadd.f32 %v225_v30, %v193_v38  ;;  %v833_v39 = vadd.f32 %v3710_v14, %v258_v35  ;;  %v262_v2 = vadd.f32 %v230_v60, %v198_v13  ;;  %v233_v38 = vmul.f32 -0.33267054, %v2954_v50 }
 0x1a7   :  { %1466 = vst [vmem:[%s3390_s3 + $0x70] sm:$0xff] %v1401_v0  ;;  %v261_v0 = vadd.f32 %v229_v43, %v197_v36  ;;  %v3720_v43 = vld [vmem:[#allocation79_spill] sm:$0xff] }
 0x1a8   :  { %1467 = vst [vmem:[%s3390_s3 + $0x78] sm:$0xff] %v1402_v40  ;;  %v832_v42 = vadd.f32 %v3709_v23, %v257_v9  ;;  %v3711_v40 = vld [vmem:[#allocation72_spill] sm:$0xff]  ;;  %v265_v45 = vadd.f32 %v233_v38, %v201_v28  ;;  %v3717_v9 = vld [vmem:[#allocation70_spill] sm:$0xff] }
 0x1a9   :  { %v1299_v61 = vpop.permute.xlu1 %1298  ;;  %v837_v51 = vadd.f32 %v3711_v40, %v262_v2  ;;  %v836_v20 = vadd.f32 %v3713_v22, %v261_v0 }
 0x1aa   :  { %v1343_v52 = vsel %vm1132_vm1, %v1299_v61, %v1301_v24 }
 0x1ab   :  { %v1297_v34 = vpop.permute.xlu0 %1296  ;;  %v1406_v7 = vadd.f32 %v1343_v52, %v831_v48  ;;  %v204_v52 = vmul.f32 0.035226293, %v3714_v62 }
 0x1ac   :  { %v1341_v3 = vsel %vm1132_vm1, %v1295_v59, %v1297_v34  ;;  %v1342_v5 = vsel %vm1132_vm1, %v1297_v34, %v1299_v61  ;;  %v228_v59 = vmul.f32 -0.33267054, %v2810_v16  ;;  %v1313_v53 = vpop.permute.xlu2 %1312  ;;  %v3715_v34 = vld [vmem:[#allocation29_spill] sm:$0xff] }
 0x1ad   :  { %v1404_v31 = vadd.f32 %v1341_v3, %v829_v17  ;;  %v1405_v46 = vadd.f32 %v1342_v5, %v830_v57  ;;  %1471 = vst [vmem:[%s3390_s3 + $0x98] sm:$0xff] %v1406_v7  ;;  %v264_v57 = vadd.f32 %v232_v37, %v200_v33  ;;  %v236_v7 = vmul.f32 -0.33267054, %v3715_v34 }
 0x1ae   :  { %v260_v11 = vadd.f32 %v228_v59, %v196_v49  ;;  %v202_v3 = vmul.f32 0.035226293, %v2932_v25  ;;  %v234_v5 = vmul.f32 -0.33267054, %v2938_v58  ;;  %v3718_v49 = vld [vmem:[#allocation80_spill] sm:$0xff] }
 0x1af   :  { %1469 = vst [vmem:[%s3390_s3 + $0x88] sm:$0xff] %v1404_v31  ;;  %v839_v59 = vadd.f32 %v3718_v49, %v264_v57  ;;  %v268_v58 = vadd.f32 %v236_v7, %v204_v52 }
 0x1b0   :  { %1470 = vst [vmem:[%s3390_s3 + $0x90] sm:$0xff] %v1405_v46  ;;  %v835_v48 = vadd.f32 %v3712_v56, %v260_v11  ;;  %v203_v46 = vmul.f32 0.035226293, %v3018_v27  ;;  %v266_v27 = vadd.f32 %v234_v5, %v202_v3 }
 0x1b1   :  { %v1305_v6 = vpop.permute.xlu1 %1304  ;;  %v843_v14 = vadd.f32 %v3719_v4, %v268_v58 }
 0x1b2   :  { %v1346_v15 = vsel %vm1132_vm1, %v1305_v6, %v1307_v32 }
 0x1b3   :  { %v1303_v54 = vpop.permute.xlu0 %1302  ;;  %v1409_v10 = vadd.f32 %v1346_v15, %v834_v29  ;;  %v841_v15 = vadd.f32 %v3720_v43, %v266_v27 }
 0x1b4   :  { %v1344_v16 = vsel %vm1132_vm1, %v1301_v24, %v1303_v54  ;;  %v1345_v26 = vsel %vm1132_vm1, %v1303_v54, %v1305_v6  ;;  %v231_v24 = vmul.f32 -0.33267054, %v2874_v44  ;;  %v1319_v1 = vpop.permute.xlu2 %1318  ;;  %v3721_v54 = vld [vmem:[#allocation88_spill] sm:$0xff] }
 0x1b5   :  { %v1407_v55 = vadd.f32 %v1344_v16, %v832_v42  ;;  %v1408_v21 = vadd.f32 %v1345_v26, %v833_v39  ;;  %1474 = vst [vmem:[%s3390_s3 + $0xb0] sm:$0xff] %v1409_v10  ;;  %v267_v42 = vadd.f32 %v235_v41, %v203_v46 }
 0x1b6   :  { %v263_v50 = vadd.f32 %v231_v24, %v199_v18 }
 0x1b7   :  { %1472 = vst [vmem:[%s3390_s3 + $0xa0] sm:$0xff] %v1407_v55  ;;  %v842_v10 = vadd.f32 %v3721_v54, %v267_v42 }
 0x1b8   :  { %1473 = vst [vmem:[%s3390_s3 + $0xa8] sm:$0xff] %v1408_v21  ;;  %v838_v35 = vadd.f32 %v3717_v9, %v263_v50 }
 0x1b9   :  { %v1311_v30 = vpop.permute.xlu1 %1310 }
 0x1ba   :  { %v1349_v61 = vsel %vm1132_vm1, %v1311_v30, %v1313_v53 }
 0x1bb   :  { %v1309_v19 = vpop.permute.xlu0 %1308  ;;  %v1412_v47 = vadd.f32 %v1349_v61, %v837_v51 }
 0x1bc   :  { %v1347_v44 = vsel %vm1132_vm1, %v1307_v32, %v1309_v19  ;;  %v1348_v17 = vsel %vm1132_vm1, %v1309_v19, %v1311_v30  ;;  %v3716_v32 = vld [vmem:[#allocation81_spill] sm:$0xff] }
 0x1bd   :  { %v1410_v8 = vadd.f32 %v1347_v44, %v835_v48  ;;  %v1411_v63 = vadd.f32 %v1348_v17, %v836_v20  ;;  %1477 = vst [vmem:[%s3390_s3 + $0xc8] sm:$0xff] %v1412_v47  ;;  %v840_v31 = vadd.f32 %v3716_v32, %v265_v45 }
 0x1bf   :  { %1475 = vst [vmem:[%s3390_s3 + $0xb8] sm:$0xff] %v1410_v8 }
 0x1c0   :  { %1476 = vst [vmem:[%s3390_s3 + $0xc0] sm:$0xff] %v1411_v63 }
 0x1c1   :  { %v1317_v12 = vpop.permute.xlu1 %1316 }
 0x1c2   :  { %v1352_v29 = vsel %vm1132_vm1, %v1317_v12, %v1319_v1 }
 0x1c3   :  { %v1315_v36 = vpop.permute.xlu0 %1314  ;;  %v1415_v13 = vadd.f32 %v1352_v29, %v840_v31 }
 0x1c4   :  { %v1350_v60 = vsel %vm1132_vm1, %v1313_v53, %v1315_v36  ;;  %v1351_v25 = vsel %vm1132_vm1, %v1315_v36, %v1317_v12 }
 0x1c5   :  { %v1413_v6 = vadd.f32 %v1350_v60, %v838_v35  ;;  %v1414_v23 = vadd.f32 %v1351_v25, %v839_v59  ;;  %1480 = vst [vmem:[%s3390_s3 + $0xe0] sm:$0xff] %v1415_v13 }
 0x1c7   :  { %1478 = vst [vmem:[%s3390_s3 + $0xd0] sm:$0xff] %v1413_v6 }
 0x1c8   :  { %1479 = vst [vmem:[%s3390_s3 + $0xd8] sm:$0xff] %v1414_v23 }
 0x1c9   :  { %v1323_v39 = vpop.permute.xlu1 %1322 }
 0x1ca   :  { %v1418_v16 = vadd.f32 %v1323_v39, %v843_v14 }
 0x1cb   :  { %v1321_v26 = vpop.permute.xlu0 %1320 }
 0x1cc   :  { %v1353_v55 = vsel %vm1132_vm1, %v1319_v1, %v1321_v26  ;;  %v1354_v21 = vsel %vm1132_vm1, %v1321_v26, %v1323_v39  ;;  %1483 = vst.msk [vmem:[%s3390_s3 + $0xf8] sm:$0xff] %vm1450_vm2, %v1418_v16 }
 0x1cd   :  { %v1416_v2 = vadd.f32 %v1353_v55, %v841_v15  ;;  %v1417_v53 = vadd.f32 %v1354_v21, %v842_v10 }
 0x1cf   :  { %1481 = vst [vmem:[%s3390_s3 + $0xe8] sm:$0xff] %v1416_v2 }
 0x1d0   :  { %1482 = vst [vmem:[%s3390_s3 + $0xf0] sm:$0xff] %v1417_v53 }

</bundles_post_ra>
